<compile_context>
chip_gen: v5e
topology: v5e:2x2
jax: 0.10.0
libtpu: 0.0.40
codegen_flags: <defaults>
</compile_context>

<pallas_src>
import functools

import numpy as np
import jax
import jax.numpy as jnp
from jax.experimental import pallas as pl
from jax.experimental.pallas import tpu as pltpu


# ----------------------------------------------------------------------------
# Host-side constant construction (done once per (params, tile layout))
# ----------------------------------------------------------------------------
def _conv_band_weights(w_oihw, w_in):
    """Conv weights (Cout, Cin, K, K) -> K banded matmul weights.

    blk[kh, ic*w_in + j + kw, oc*w_out + j] = w[oc, ic, kh, kw],  w_out = w_in-K+1
    so   conv[., oc*w_out + j] = sum_kh (rows shifted by kh) @ blk[kh].
    """
    w = np.asarray(w_oihw, np.float32)
    Cout, Cin, K, _ = w.shape
    w_out = w_in - K + 1
    blk = np.zeros((K, Cin * w_in, Cout * w_out), np.float32)
    for kh in range(K):
        for oc in range(Cout):
            for ic in range(Cin):
                for kw in range(K):
                    for j in range(w_out):
                        blk[kh, ic * w_in + j + kw, oc * w_out + j] = w[oc, ic, kh, kw]
    return blk


def _block_diag(blk, grp):
    """Tile `blk` block-diagonally `grp` times over its last two dims."""
    *lead, r, c = blk.shape
    out = np.zeros((*lead, grp * r, grp * c), np.float32)
    for g in range(grp):
        out[..., g * r:(g + 1) * r, g * c:(g + 1) * c] = blk
    return out


def _pool_w_selectors(C, w_in):
    """(2, C*w_in, C*w_out) even/odd 0/1 column selectors for 2x2/2 W pooling."""
    w_out = w_in // 2
    sel = np.zeros((2, C * w_in, C * w_out), np.float32)
    for c in range(C):
        for j in range(w_out):
            sel[0, c * w_in + 2 * j, c * w_out + j] = 1.0
            sel[1, c * w_in + 2 * j + 1, c * w_out + j] = 1.0
    return sel


def _pool_h_selectors(bsub, pitch, h_out, rows_in, h_major):
    """(2, bsub*h_out, rows_in) even/odd row selectors for H pooling.

    Also re-stacks images tightly and drops the cross-image garbage rows of the
    sublane-stacked conv output.  h_major=True emits rows ordered h*bsub + s
    (used for pool2 so the fc1 flatten needs no extra row-gather matmuls).
    """
    sel = np.zeros((2, bsub * h_out, rows_in), np.float32)
    for s in range(bsub):
        for i in range(h_out):
            r = (i * bsub + s) if h_major else (s * h_out + i)
            sel[0, r, s * pitch + 2 * i] = 1.0
            sel[1, r, s * pitch + 2 * i + 1] = 1.0
    return sel


def prepare_params(params, lane_groups=4, sublane_images=2):
    """One-time parameter prep: every reshape / permutation / packing lives here.

    lane_groups (G):   images packed side-by-side along the lane axis.
    sublane_images:    images stacked along the sublane (H) axis.
    Per grid step the kernel processes B_TILE = G * sublane_images images.
    """
    G, S = lane_groups, sublane_images
    c1w = np.asarray(params["conv1_w"], np.float32)   # (4, 1, 3, 3)
    c1b = np.asarray(params["conv1_b"], np.float32)   # (4,)
    c2w = np.asarray(params["conv2_w"], np.float32)   # (8, 4, 3, 3)
    c2b = np.asarray(params["conv2_b"], np.float32)   # (8,)
    f1w = np.asarray(params["fc1_w"], np.float32)     # (32, 200)
    f1b = np.asarray(params["fc1_b"], np.float32)     # (32,)
    f2w = np.asarray(params["fc2_w"], np.float32)     # (10, 32)
    f2b = np.asarray(params["fc2_b"], np.float32)     # (10,)

    # conv band weights (block-diagonal over lane groups)
    w1 = _block_diag(_conv_band_weights(c1w, 28), G)   # (3, G*28,  G*104)
    w2 = _block_diag(_conv_band_weights(c2w, 13), G)   # (3, G*52,  G*88)

    # pool selectors
    sw1 = _block_diag(_pool_w_selectors(4, 26), G)     # (2, G*104, G*52)
    sw2 = _block_diag(_pool_w_selectors(8, 11), G)     # (2, G*88,  G*40)
    sh1 = _pool_h_selectors(S, 28, 13, S * 28 - 2, h_major=False)  # (2, S*13, S*28-2)
    sh2 = _pool_h_selectors(S, 13, 5, S * 13 - 2, h_major=True)    # (2, 5*S,  S*13-2)

    # fc1: one (5*G*40, G*32) weight.  zcat[s, h*(G*40)+g*40+c*5+w] is torch
    # feature c*25+h*5+w of image (g, s); fold the permutation into the weight.
    wfc1 = np.zeros((5 * G * 40, G * 32), np.float32)
    for h in range(5):
        for g in range(G):
            for c in range(8):
                for w in range(5):
                    row = h * (G * 40) + g * 40 + c * 5 + w
                    wfc1[row, g * 32:(g + 1) * 32] = f1w[:, c * 25 + h * 5 + w]

    # fc2: block-diagonal over lane groups (output stays lane-packed)
    wfc2 = np.zeros((G * 32, G * 10), np.float32)
    for g in range(G):
        wfc2[g * 32:(g + 1) * 32, g * 10:(g + 1) * 10] = f2w.T

    # all biases packed into one row buffer, sliced with static offsets in-kernel
    bias = np.concatenate([
        np.tile(np.repeat(c1b, 26), G),                # G*104
        np.tile(np.repeat(c2b, 11), G),                # G*88
        np.tile(f1b, G),                               # G*32
        np.tile(f2b, G),                               # G*10
    ])[None, :]

    return {
        "w1": jnp.asarray(w1), "sw1": jnp.asarray(sw1), "sh1": jnp.asarray(sh1),
        "w2": jnp.asarray(w2), "sw2": jnp.asarray(sw2), "sh2": jnp.asarray(sh2),
        "wfc1": jnp.asarray(wfc1), "wfc2": jnp.asarray(wfc2),
        "bias": jnp.asarray(bias),
        "grp": G, "bsub": S,
    }


# ----------------------------------------------------------------------------
# The fused kernel: conv1+pool1+conv2+pool2+fc1+fc2 for one batch tile
# ----------------------------------------------------------------------------
def _simple_cnn_kernel(x_ref, w1_ref, sw1_ref, sh1_ref, w2_ref, sw2_ref,
                       sh2_ref, wfc1_ref, wfc2_ref, b_ref, o_ref, *, bsub, grp):
    f32 = jnp.float32
    dot = functools.partial(jnp.dot, preferred_element_type=f32)

    R1 = bsub * 28 - 2          # stacked conv1 rows (incl. cross-image rows)
    R2 = bsub * 13 - 2          # stacked conv2 rows
    n1 = grp * 104              # conv1 lanes  (G * 4*26)
    n2 = grp * 88               # conv2 lanes  (G * 8*11)
    nh = grp * 32               # fc1 lanes
    no = grp * 10               # fc2 lanes
    ob1, ob2 = 0, n1            # static offsets into the packed bias buffer
    obh, obo = n1 + n2, n1 + n2 + nh

    x = x_ref[0]                # (bsub*28, grp*28); images lane-packed by group

    # ---- conv1 + bias + ReLU: 3 banded MXU matmuls (acc += form -> v7x MRB) --
    acc1 = dot(x[0:R1, :], w1_ref[0])
    acc1 += dot(x[1:R1 + 1, :], w1_ref[1])
    acc1 += dot(x[2:R1 + 2, :], w1_ref[2])
    y1 = jnp.maximum(acc1 + b_ref[:, ob1:ob1 + n1], 0.0)            # (R1, G*104)

    # ---- maxpool1: even/odd W selectors, then H selectors (drop garbage rows)
    a1 = jnp.maximum(dot(y1, sw1_ref[0]), dot(y1, sw1_ref[1]))      # (R1, G*52)
    z1 = jnp.maximum(dot(sh1_ref[0], a1), dot(sh1_ref[1], a1))      # (bsub*13, G*52)

    # ---- conv2 + bias + ReLU -------------------------------------------------
    acc2 = dot(z1[0:R2, :], w2_ref[0])
    acc2 += dot(z1[1:R2 + 1, :], w2_ref[1])
    acc2 += dot(z1[2:R2 + 2, :], w2_ref[2])
    y2 = jnp.maximum(acc2 + b_ref[:, ob2:ob2 + n2], 0.0)            # (R2, G*88)

    # ---- maxpool2 (H selectors emit rows h-major: row = h*bsub + s) ----------
    a2 = jnp.maximum(dot(y2, sw2_ref[0]), dot(y2, sw2_ref[1]))      # (R2, G*40)
    z2 = jnp.maximum(dot(sh2_ref[0], a2), dot(sh2_ref[1], a2))      # (5*bsub, G*40)

    # ---- flatten + fc1 + ReLU: concat the 5 h-slices along lanes -> ONE matmul
    zcat = jnp.concatenate(
        [z2[h * bsub:(h + 1) * bsub, :] for h in range(5)], axis=1)  # (bsub, 5*G*40)
    h1 = jnp.maximum(dot(zcat, wfc1_ref[...]) + b_ref[:, obh:obh + nh], 0.0)

    # ---- fc2 (block-diagonal; logits stay lane-packed per group) -------------
    o_ref[0] = dot(h1, wfc2_ref[...]) + b_ref[:, obo:obo + no]       # (bsub, G*10)


def simple_cnn_forward(x, prepped):
    """x: (B, 1, 28, 28) float32 -> logits (B, 10). Batch-tiled fused pallas_call."""
    B = x.shape[0]
    bsub, grp = prepped["bsub"], prepped["grp"]
    bt = bsub * grp                                # images per grid step
    T = pl.cdiv(B, bt)
    pad = T * bt - B

    xf = x.astype(jnp.float32).reshape(B, 28, 28)
    if pad:
        xf = jnp.concatenate([xf, jnp.zeros((pad, 28, 28), jnp.float32)], axis=0)
    # Pack image b = i*bt + g*bsub + s into tile i, rows s*28+r, cols g*28+c.
    xp = (xf.reshape(T, grp, bsub, 28, 28)
            .transpose(0, 2, 3, 1, 4)
            .reshape(T, bsub * 28, grp * 28))

    operands = [prepped[k] for k in
                ("w1", "sw1", "sh1", "w2", "sw2", "sh2", "wfc1", "wfc2", "bias")]

    def const_spec(arr):                           # resident weights: block 0 always
        nd = arr.ndim
        return pl.BlockSpec(arr.shape, lambda i, _nd=nd: (0,) * _nd)

    kernel = functools.partial(_simple_cnn_kernel, bsub=bsub, grp=grp)
    out = pl.pallas_call(
        kernel,
        grid=(T,),
        in_specs=[pl.BlockSpec((1, bsub * 28, grp * 28), lambda i: (i, 0, 0))]
                 + [const_spec(a) for a in operands],
        out_specs=pl.BlockSpec((1, bsub, grp * 10), lambda i: (i, 0, 0)),
        out_shape=jax.ShapeDtypeStruct((T, bsub, grp * 10), jnp.float32),
        compiler_params=pltpu.CompilerParams(
            dimension_semantics=("parallel",)),
    )(xp, *operands)

    # Un-pack the lane-packed logits: tile i, group g, sublane s -> image b.
    logits = (out.reshape(T, bsub, grp, 10)
                 .transpose(0, 2, 1, 3)
                 .reshape(T * bt, 10))
    return logits[:B]


# ----------------------------------------------------------------------------
# Pure-JAX reference + smoke test
# ----------------------------------------------------------------------------
def reference_forward(x, params):
    def conv(x, w, b):
        y = jax.lax.conv_general_dilated(
            x, w, window_strides=(1, 1), padding="VALID",
            dimension_numbers=("NCHW", "OIHW", "NCHW"),
            precision=jax.lax.Precision.HIGHEST)
        return y + b[None, :, None, None]

    def pool(x):
        return jax.lax.reduce_window(x, -jnp.inf, jax.lax.max,
                                     (1, 1, 2, 2), (1, 1, 2, 2), "VALID")

    h = pool(jnp.maximum(conv(x, params["conv1_w"], params["conv1_b"]), 0.0))
    h = pool(jnp.maximum(conv(h, params["conv2_w"], params["conv2_b"]), 0.0))
    h = h.reshape(h.shape[0], -1)
    h = jnp.maximum(h @ params["fc1_w"].T + params["fc1_b"], 0.0)
    return h @ params["fc2_w"].T + params["fc2_b"]


def init_params(key):
    ks = jax.random.split(key, 8)
    scale = 0.1
    return {
        "conv1_w": scale * jax.random.normal(ks[0], (4, 1, 3, 3), jnp.float32),
        "conv1_b": scale * jax.random.normal(ks[1], (4,), jnp.float32),
        "conv2_w": scale * jax.random.normal(ks[2], (8, 4, 3, 3), jnp.float32),
        "conv2_b": scale * jax.random.normal(ks[3], (8,), jnp.float32),
        "fc1_w": scale * jax.random.normal(ks[4], (32, 8 * 5 * 5), jnp.float32),
        "fc1_b": scale * jax.random.normal(ks[5], (32,), jnp.float32),
        "fc2_w": scale * jax.random.normal(ks[6], (10, 32), jnp.float32),
        "fc2_b": scale * jax.random.normal(ks[7], (10,), jnp.float32),
    }


if __name__ == "__main__":
    key = jax.random.PRNGKey(0)
    k_param, k_x = jax.random.split(key)
    params = init_params(k_param)

    # Input shape implied by fc1 = Linear(8*5*5, 32): 28x28 single-channel.
    # B=16 with B_TILE=8 (G=4 lane groups x 2 sublane-stacked) -> grid of 2.
    B = 16
    x = jax.random.normal(k_x, (B, 1, 28, 28), jnp.float32)

    prepped = prepare_params(params, lane_groups=4, sublane_images=2)
    out = jax.block_until_ready(simple_cnn_forward(x, prepped))
    ref = jax.block_until_ready(reference_forward(x, params))

    assert out.shape == (B, 10) and out.dtype == jnp.float32
    if not jnp.allclose(out, ref, rtol=1e-3, atol=1e-3):
        err = float(jnp.max(jnp.abs(out - ref)))
        raise AssertionError(f"Pallas output does not match reference (max abs err {err})")

    print("KERNEL_OK")
</pallas_src>

<mosaic_0001>
module attributes {stable_mosaic.version = 11 : i64} {
  func.func @_simple_cnn_kernel(%arg0: i32, %arg1: memref<1x56x112xf32, #tpu.memory_space<vmem>>, %arg2: memref<3x112x416xf32, #tpu.memory_space<vmem>>, %arg3: memref<2x416x208xf32, #tpu.memory_space<vmem>>, %arg4: memref<2x26x54xf32, #tpu.memory_space<vmem>>, %arg5: memref<3x208x352xf32, #tpu.memory_space<vmem>>, %arg6: memref<2x352x160xf32, #tpu.memory_space<vmem>>, %arg7: memref<2x10x24xf32, #tpu.memory_space<vmem>>, %arg8: memref<800x128xf32, #tpu.memory_space<vmem>>, %arg9: memref<128x40xf32, #tpu.memory_space<vmem>>, %arg10: memref<1x936xf32, #tpu.memory_space<vmem>>, %arg11: memref<1x2x40xf32, #tpu.memory_space<vmem>>) attributes {dimension_semantics = [#tpu.dimension_semantics<parallel>], iteration_bounds = array<i64: 2>, scalar_prefetch = 0 : i64, scratch_operands = 0 : i64, tpu.core_type = #tpu.core_type<tc>, window_params = [{transform_indices = @transform_0, window_bounds = array<i64: 1, 56, 112>}, {pipeline_mode = #tpu.pipeline_mode<synchronous>, transform_indices = @transform_1, window_bounds = array<i64: 3, 112, 416>}, {pipeline_mode = #tpu.pipeline_mode<synchronous>, transform_indices = @transform_2, window_bounds = array<i64: 2, 416, 208>}, {pipeline_mode = #tpu.pipeline_mode<synchronous>, transform_indices = @transform_3, window_bounds = array<i64: 2, 26, 54>}, {pipeline_mode = #tpu.pipeline_mode<synchronous>, transform_indices = @transform_4, window_bounds = array<i64: 3, 208, 352>}, {pipeline_mode = #tpu.pipeline_mode<synchronous>, transform_indices = @transform_5, window_bounds = array<i64: 2, 352, 160>}, {pipeline_mode = #tpu.pipeline_mode<synchronous>, transform_indices = @transform_6, window_bounds = array<i64: 2, 10, 24>}, {pipeline_mode = #tpu.pipeline_mode<synchronous>, transform_indices = @transform_7, window_bounds = array<i64: 800, 128>}, {pipeline_mode = #tpu.pipeline_mode<synchronous>, transform_indices = @transform_8, window_bounds = array<i64: 128, 40>}, {pipeline_mode = #tpu.pipeline_mode<synchronous>, transform_indices = @transform_9, window_bounds = array<i64: 1, 936>}, {transform_indices = @transform_10, window_bounds = array<i64: 1, 2, 40>}]} {
    %c0 = arith.constant 0 : index
    %c0_0 = arith.constant 0 : index
    %c0_1 = arith.constant 0 : index
    %0 = vector.load %arg1[%c0, %c0_0, %c0_1] : memref<1x56x112xf32, #tpu.memory_space<vmem>>, vector<1x56x112xf32>
    %1 = vector.shape_cast %0 : vector<1x56x112xf32> to vector<56x112xf32>
    %2 = vector.extract_strided_slice %1 {offsets = [0, 0], sizes = [54, 112], strides = [1, 1]} : vector<56x112xf32> to vector<54x112xf32>
    %c0_2 = arith.constant 0 : index
    %c0_3 = arith.constant 0 : index
    %c0_4 = arith.constant 0 : index
    %3 = vector.load %arg2[%c0_2, %c0_3, %c0_4] : memref<3x112x416xf32, #tpu.memory_space<vmem>>, vector<1x112x416xf32>
    %4 = vector.shape_cast %3 : vector<1x112x416xf32> to vector<112x416xf32>
    %cst = arith.constant dense<0.000000e+00> : vector<54x416xf32>
    %5 = tpu.matmul %2, %4, %cst {dimension_numbers = #tpu.dot_dimension_numbers<[1], [0], [0], [1], [0, 0, 1, 1], [], []>} : vector<54x112xf32>, vector<112x416xf32>, vector<54x416xf32> -> vector<54x416xf32>
    %6 = vector.extract_strided_slice %1 {offsets = [1, 0], sizes = [54, 112], strides = [1, 1]} : vector<56x112xf32> to vector<54x112xf32>
    %c1 = arith.constant 1 : index
    %c0_5 = arith.constant 0 : index
    %c0_6 = arith.constant 0 : index
    %7 = vector.load %arg2[%c1, %c0_5, %c0_6] : memref<3x112x416xf32, #tpu.memory_space<vmem>>, vector<1x112x416xf32>
    %8 = vector.shape_cast %7 : vector<1x112x416xf32> to vector<112x416xf32>
    %cst_7 = arith.constant dense<0.000000e+00> : vector<54x416xf32>
    %9 = tpu.matmul %6, %8, %cst_7 {dimension_numbers = #tpu.dot_dimension_numbers<[1], [0], [0], [1], [0, 0, 1, 1], [], []>} : vector<54x112xf32>, vector<112x416xf32>, vector<54x416xf32> -> vector<54x416xf32>
    %10 = arith.addf %5, %9 : vector<54x416xf32>
    %11 = vector.extract_strided_slice %1 {offsets = [2, 0], sizes = [54, 112], strides = [1, 1]} : vector<56x112xf32> to vector<54x112xf32>
    %c2 = arith.constant 2 : index
    %c0_8 = arith.constant 0 : index
    %c0_9 = arith.constant 0 : index
    %12 = vector.load %arg2[%c2, %c0_8, %c0_9] : memref<3x112x416xf32, #tpu.memory_space<vmem>>, vector<1x112x416xf32>
    %13 = vector.shape_cast %12 : vector<1x112x416xf32> to vector<112x416xf32>
    %cst_10 = arith.constant dense<0.000000e+00> : vector<54x416xf32>
    %14 = tpu.matmul %11, %13, %cst_10 {dimension_numbers = #tpu.dot_dimension_numbers<[1], [0], [0], [1], [0, 0, 1, 1], [], []>} : vector<54x112xf32>, vector<112x416xf32>, vector<54x416xf32> -> vector<54x416xf32>
    %15 = arith.addf %10, %14 : vector<54x416xf32>
    %c0_11 = arith.constant 0 : index
    %c0_12 = arith.constant 0 : index
    %16 = vector.load %arg10[%c0_11, %c0_12] : memref<1x936xf32, #tpu.memory_space<vmem>>, vector<1x416xf32>
    %17 = vector.broadcast %16 : vector<1x416xf32> to vector<54x416xf32>
    %18 = arith.addf %15, %17 : vector<54x416xf32>
    %cst_13 = arith.constant 0.000000e+00 : f32
    %19 = vector.broadcast %cst_13 : f32 to vector<54x416xf32>
    %20 = arith.maximumf %18, %19 : vector<54x416xf32>
    %c0_14 = arith.constant 0 : index
    %c0_15 = arith.constant 0 : index
    %c0_16 = arith.constant 0 : index
    %21 = vector.load %arg3[%c0_14, %c0_15, %c0_16] : memref<2x416x208xf32, #tpu.memory_space<vmem>>, vector<1x416x208xf32>
    %22 = vector.shape_cast %21 : vector<1x416x208xf32> to vector<416x208xf32>
    %cst_17 = arith.constant dense<0.000000e+00> : vector<54x208xf32>
    %23 = tpu.matmul %20, %22, %cst_17 {dimension_numbers = #tpu.dot_dimension_numbers<[1], [0], [0], [1], [0, 0, 1, 1], [], []>} : vector<54x416xf32>, vector<416x208xf32>, vector<54x208xf32> -> vector<54x208xf32>
    %c1_18 = arith.constant 1 : index
    %c0_19 = arith.constant 0 : index
    %c0_20 = arith.constant 0 : index
    %24 = vector.load %arg3[%c1_18, %c0_19, %c0_20] : memref<2x416x208xf32, #tpu.memory_space<vmem>>, vector<1x416x208xf32>
    %25 = vector.shape_cast %24 : vector<1x416x208xf32> to vector<416x208xf32>
    %cst_21 = arith.constant dense<0.000000e+00> : vector<54x208xf32>
    %26 = tpu.matmul %20, %25, %cst_21 {dimension_numbers = #tpu.dot_dimension_numbers<[1], [0], [0], [1], [0, 0, 1, 1], [], []>} : vector<54x416xf32>, vector<416x208xf32>, vector<54x208xf32> -> vector<54x208xf32>
    %27 = arith.maximumf %23, %26 : vector<54x208xf32>
    %c0_22 = arith.constant 0 : index
    %c0_23 = arith.constant 0 : index
    %c0_24 = arith.constant 0 : index
    %28 = vector.load %arg4[%c0_22, %c0_23, %c0_24] : memref<2x26x54xf32, #tpu.memory_space<vmem>>, vector<1x26x54xf32>
    %29 = vector.shape_cast %28 : vector<1x26x54xf32> to vector<26x54xf32>
    %cst_25 = arith.constant dense<0.000000e+00> : vector<26x208xf32>
    %30 = tpu.matmul %29, %27, %cst_25 {dimension_numbers = #tpu.dot_dimension_numbers<[1], [0], [0], [1], [0, 0, 1, 1], [], []>} : vector<26x54xf32>, vector<54x208xf32>, vector<26x208xf32> -> vector<26x208xf32>
    %c1_26 = arith.constant 1 : index
    %c0_27 = arith.constant 0 : index
    %c0_28 = arith.constant 0 : index
    %31 = vector.load %arg4[%c1_26, %c0_27, %c0_28] : memref<2x26x54xf32, #tpu.memory_space<vmem>>, vector<1x26x54xf32>
    %32 = vector.shape_cast %31 : vector<1x26x54xf32> to vector<26x54xf32>
    %cst_29 = arith.constant dense<0.000000e+00> : vector<26x208xf32>
    %33 = tpu.matmul %32, %27, %cst_29 {dimension_numbers = #tpu.dot_dimension_numbers<[1], [0], [0], [1], [0, 0, 1, 1], [], []>} : vector<26x54xf32>, vector<54x208xf32>, vector<26x208xf32> -> vector<26x208xf32>
    %34 = arith.maximumf %30, %33 : vector<26x208xf32>
    %35 = vector.extract_strided_slice %34 {offsets = [0, 0], sizes = [24, 208], strides = [1, 1]} : vector<26x208xf32> to vector<24x208xf32>
    %c0_30 = arith.constant 0 : index
    %c0_31 = arith.constant 0 : index
    %c0_32 = arith.constant 0 : index
    %36 = vector.load %arg5[%c0_30, %c0_31, %c0_32] : memref<3x208x352xf32, #tpu.memory_space<vmem>>, vector<1x208x352xf32>
    %37 = vector.shape_cast %36 : vector<1x208x352xf32> to vector<208x352xf32>
    %cst_33 = arith.constant dense<0.000000e+00> : vector<24x352xf32>
    %38 = tpu.matmul %35, %37, %cst_33 {dimension_numbers = #tpu.dot_dimension_numbers<[1], [0], [0], [1], [0, 0, 1, 1], [], []>} : vector<24x208xf32>, vector<208x352xf32>, vector<24x352xf32> -> vector<24x352xf32>
    %39 = vector.extract_strided_slice %34 {offsets = [1, 0], sizes = [24, 208], strides = [1, 1]} : vector<26x208xf32> to vector<24x208xf32>
    %c1_34 = arith.constant 1 : index
    %c0_35 = arith.constant 0 : index
    %c0_36 = arith.constant 0 : index
    %40 = vector.load %arg5[%c1_34, %c0_35, %c0_36] : memref<3x208x352xf32, #tpu.memory_space<vmem>>, vector<1x208x352xf32>
    %41 = vector.shape_cast %40 : vector<1x208x352xf32> to vector<208x352xf32>
    %cst_37 = arith.constant dense<0.000000e+00> : vector<24x352xf32>
    %42 = tpu.matmul %39, %41, %cst_37 {dimension_numbers = #tpu.dot_dimension_numbers<[1], [0], [0], [1], [0, 0, 1, 1], [], []>} : vector<24x208xf32>, vector<208x352xf32>, vector<24x352xf32> -> vector<24x352xf32>
    %43 = arith.addf %38, %42 : vector<24x352xf32>
    %44 = vector.extract_strided_slice %34 {offsets = [2, 0], sizes = [24, 208], strides = [1, 1]} : vector<26x208xf32> to vector<24x208xf32>
    %c2_38 = arith.constant 2 : index
    %c0_39 = arith.constant 0 : index
    %c0_40 = arith.constant 0 : index
    %45 = vector.load %arg5[%c2_38, %c0_39, %c0_40] : memref<3x208x352xf32, #tpu.memory_space<vmem>>, vector<1x208x352xf32>
    %46 = vector.shape_cast %45 : vector<1x208x352xf32> to vector<208x352xf32>
    %cst_41 = arith.constant dense<0.000000e+00> : vector<24x352xf32>
    %47 = tpu.matmul %44, %46, %cst_41 {dimension_numbers = #tpu.dot_dimension_numbers<[1], [0], [0], [1], [0, 0, 1, 1], [], []>} : vector<24x208xf32>, vector<208x352xf32>, vector<24x352xf32> -> vector<24x352xf32>
    %48 = arith.addf %43, %47 : vector<24x352xf32>
    %c0_42 = arith.constant 0 : index
    %c416 = arith.constant 416 : index
    %49 = vector.load %arg10[%c0_42, %c416] : memref<1x936xf32, #tpu.memory_space<vmem>>, vector<1x352xf32>
    %50 = vector.broadcast %49 : vector<1x352xf32> to vector<24x352xf32>
    %51 = arith.addf %48, %50 : vector<24x352xf32>
    %cst_43 = arith.constant 0.000000e+00 : f32
    %52 = vector.broadcast %cst_43 : f32 to vector<24x352xf32>
    %53 = arith.maximumf %51, %52 : vector<24x352xf32>
    %c0_44 = arith.constant 0 : index
    %c0_45 = arith.constant 0 : index
    %c0_46 = arith.constant 0 : index
    %54 = vector.load %arg6[%c0_44, %c0_45, %c0_46] : memref<2x352x160xf32, #tpu.memory_space<vmem>>, vector<1x352x160xf32>
    %55 = vector.shape_cast %54 : vector<1x352x160xf32> to vector<352x160xf32>
    %cst_47 = arith.constant dense<0.000000e+00> : vector<24x160xf32>
    %56 = tpu.matmul %53, %55, %cst_47 {dimension_numbers = #tpu.dot_dimension_numbers<[1], [0], [0], [1], [0, 0, 1, 1], [], []>} : vector<24x352xf32>, vector<352x160xf32>, vector<24x160xf32> -> vector<24x160xf32>
    %c1_48 = arith.constant 1 : index
    %c0_49 = arith.constant 0 : index
    %c0_50 = arith.constant 0 : index
    %57 = vector.load %arg6[%c1_48, %c0_49, %c0_50] : memref<2x352x160xf32, #tpu.memory_space<vmem>>, vector<1x352x160xf32>
    %58 = vector.shape_cast %57 : vector<1x352x160xf32> to vector<352x160xf32>
    %cst_51 = arith.constant dense<0.000000e+00> : vector<24x160xf32>
    %59 = tpu.matmul %53, %58, %cst_51 {dimension_numbers = #tpu.dot_dimension_numbers<[1], [0], [0], [1], [0, 0, 1, 1], [], []>} : vector<24x352xf32>, vector<352x160xf32>, vector<24x160xf32> -> vector<24x160xf32>
    %60 = arith.maximumf %56, %59 : vector<24x160xf32>
    %c0_52 = arith.constant 0 : index
    %c0_53 = arith.constant 0 : index
    %c0_54 = arith.constant 0 : index
    %61 = vector.load %arg7[%c0_52, %c0_53, %c0_54] : memref<2x10x24xf32, #tpu.memory_space<vmem>>, vector<1x10x24xf32>
    %62 = vector.shape_cast %61 : vector<1x10x24xf32> to vector<10x24xf32>
    %cst_55 = arith.constant dense<0.000000e+00> : vector<10x160xf32>
    %63 = tpu.matmul %62, %60, %cst_55 {dimension_numbers = #tpu.dot_dimension_numbers<[1], [0], [0], [1], [0, 0, 1, 1], [], []>} : vector<10x24xf32>, vector<24x160xf32>, vector<10x160xf32> -> vector<10x160xf32>
    %c1_56 = arith.constant 1 : index
    %c0_57 = arith.constant 0 : index
    %c0_58 = arith.constant 0 : index
    %64 = vector.load %arg7[%c1_56, %c0_57, %c0_58] : memref<2x10x24xf32, #tpu.memory_space<vmem>>, vector<1x10x24xf32>
    %65 = vector.shape_cast %64 : vector<1x10x24xf32> to vector<10x24xf32>
    %cst_59 = arith.constant dense<0.000000e+00> : vector<10x160xf32>
    %66 = tpu.matmul %65, %60, %cst_59 {dimension_numbers = #tpu.dot_dimension_numbers<[1], [0], [0], [1], [0, 0, 1, 1], [], []>} : vector<10x24xf32>, vector<24x160xf32>, vector<10x160xf32> -> vector<10x160xf32>
    %67 = arith.maximumf %63, %66 : vector<10x160xf32>
    %68 = vector.extract_strided_slice %67 {offsets = [0, 0], sizes = [2, 160], strides = [1, 1]} : vector<10x160xf32> to vector<2x160xf32>
    %69 = vector.extract_strided_slice %67 {offsets = [2, 0], sizes = [2, 160], strides = [1, 1]} : vector<10x160xf32> to vector<2x160xf32>
    %70 = vector.extract_strided_slice %67 {offsets = [4, 0], sizes = [2, 160], strides = [1, 1]} : vector<10x160xf32> to vector<2x160xf32>
    %71 = vector.extract_strided_slice %67 {offsets = [6, 0], sizes = [2, 160], strides = [1, 1]} : vector<10x160xf32> to vector<2x160xf32>
    %72 = vector.extract_strided_slice %67 {offsets = [8, 0], sizes = [2, 160], strides = [1, 1]} : vector<10x160xf32> to vector<2x160xf32>
    %73 = tpu.concatenate %68, %69, %70, %71, %72 in 1 : vector<2x160xf32>, vector<2x160xf32>, vector<2x160xf32>, vector<2x160xf32>, vector<2x160xf32> -> vector<2x800xf32>
    %c0_60 = arith.constant 0 : index
    %c0_61 = arith.constant 0 : index
    %74 = vector.load %arg8[%c0_60, %c0_61] : memref<800x128xf32, #tpu.memory_space<vmem>>, vector<800x128xf32>
    %cst_62 = arith.constant dense<0.000000e+00> : vector<2x128xf32>
    %75 = tpu.matmul %73, %74, %cst_62 {dimension_numbers = #tpu.dot_dimension_numbers<[1], [0], [0], [1], [0, 0, 1, 1], [], []>} : vector<2x800xf32>, vector<800x128xf32>, vector<2x128xf32> -> vector<2x128xf32>
    %c0_63 = arith.constant 0 : index
    %c768 = arith.constant 768 : index
    %76 = vector.load %arg10[%c0_63, %c768] : memref<1x936xf32, #tpu.memory_space<vmem>>, vector<1x128xf32>
    %77 = vector.broadcast %76 : vector<1x128xf32> to vector<2x128xf32>
    %78 = arith.addf %75, %77 : vector<2x128xf32>
    %cst_64 = arith.constant 0.000000e+00 : f32
    %79 = vector.broadcast %cst_64 : f32 to vector<2x128xf32>
    %80 = arith.maximumf %78, %79 : vector<2x128xf32>
    %c0_65 = arith.constant 0 : index
    %c0_66 = arith.constant 0 : index
    %81 = vector.load %arg9[%c0_65, %c0_66] : memref<128x40xf32, #tpu.memory_space<vmem>>, vector<128x40xf32>
    %cst_67 = arith.constant dense<0.000000e+00> : vector<2x40xf32>
    %82 = tpu.matmul %80, %81, %cst_67 {dimension_numbers = #tpu.dot_dimension_numbers<[1], [0], [0], [1], [0, 0, 1, 1], [], []>} : vector<2x128xf32>, vector<128x40xf32>, vector<2x40xf32> -> vector<2x40xf32>
    %c0_68 = arith.constant 0 : index
    %c896 = arith.constant 896 : index
    %83 = vector.load %arg10[%c0_68, %c896] : memref<1x936xf32, #tpu.memory_space<vmem>>, vector<1x40xf32>
    %84 = vector.broadcast %83 : vector<1x40xf32> to vector<2x40xf32>
    %85 = arith.addf %82, %84 : vector<2x40xf32>
    %c0_69 = arith.constant 0 : index
    %c0_70 = arith.constant 0 : index
    %c0_71 = arith.constant 0 : index
    %86 = vector.load %arg11[%c0_69, %c0_70, %c0_71] : memref<1x2x40xf32, #tpu.memory_space<vmem>>, vector<1x2x40xf32>
    %87 = vector.shape_cast %86 : vector<1x2x40xf32> to vector<2x40xf32>
    %88 = vector.shape_cast %85 : vector<2x40xf32> to vector<1x2x40xf32>
    tpu.vector_store %arg11[%c0_69, %c0_70, %c0_71], %88 {strides = array<i32>} : memref<1x2x40xf32, #tpu.memory_space<vmem>>, vector<1x2x40xf32>,
    return
  }
  func.func @transform_0(%arg0: i32) -> (i32, i32, i32) {
    %c0_i32 = arith.constant 0 : i32
    %c0_i32_0 = arith.constant 0 : i32
    %c0_i32_1 = arith.constant 0 : i32
    return %arg0, %c0_i32, %c0_i32_0 : i32, i32, i32
  }
  func.func @transform_1(%arg0: i32) -> (i32, i32, i32) {
    %c0_i32 = arith.constant 0 : i32
    %c0_i32_0 = arith.constant 0 : i32
    %c0_i32_1 = arith.constant 0 : i32
    %c0_i32_2 = arith.constant 0 : i32
    return %c0_i32, %c0_i32_0, %c0_i32_1 : i32, i32, i32
  }
  func.func @transform_2(%arg0: i32) -> (i32, i32, i32) {
    %c0_i32 = arith.constant 0 : i32
    %c0_i32_0 = arith.constant 0 : i32
    %c0_i32_1 = arith.constant 0 : i32
    %c0_i32_2 = arith.constant 0 : i32
    return %c0_i32, %c0_i32_0, %c0_i32_1 : i32, i32, i32
  }
  func.func @transform_3(%arg0: i32) -> (i32, i32, i32) {
    %c0_i32 = arith.constant 0 : i32
    %c0_i32_0 = arith.constant 0 : i32
    %c0_i32_1 = arith.constant 0 : i32
    %c0_i32_2 = arith.constant 0 : i32
    return %c0_i32, %c0_i32_0, %c0_i32_1 : i32, i32, i32
  }
  func.func @transform_4(%arg0: i32) -> (i32, i32, i32) {
    %c0_i32 = arith.constant 0 : i32
    %c0_i32_0 = arith.constant 0 : i32
    %c0_i32_1 = arith.constant 0 : i32
    %c0_i32_2 = arith.constant 0 : i32
    return %c0_i32, %c0_i32_0, %c0_i32_1 : i32, i32, i32
  }
  func.func @transform_5(%arg0: i32) -> (i32, i32, i32) {
    %c0_i32 = arith.constant 0 : i32
    %c0_i32_0 = arith.constant 0 : i32
    %c0_i32_1 = arith.constant 0 : i32
    %c0_i32_2 = arith.constant 0 : i32
    return %c0_i32, %c0_i32_0, %c0_i32_1 : i32, i32, i32
  }
  func.func @transform_6(%arg0: i32) -> (i32, i32, i32) {
    %c0_i32 = arith.constant 0 : i32
    %c0_i32_0 = arith.constant 0 : i32
    %c0_i32_1 = arith.constant 0 : i32
    %c0_i32_2 = arith.constant 0 : i32
    return %c0_i32, %c0_i32_0, %c0_i32_1 : i32, i32, i32
  }
  func.func @transform_7(%arg0: i32) -> (i32, i32) {
    %c0_i32 = arith.constant 0 : i32
    %c0_i32_0 = arith.constant 0 : i32
    %c0_i32_1 = arith.constant 0 : i32
    return %c0_i32, %c0_i32_0 : i32, i32
  }
  func.func @transform_8(%arg0: i32) -> (i32, i32) {
    %c0_i32 = arith.constant 0 : i32
    %c0_i32_0 = arith.constant 0 : i32
    %c0_i32_1 = arith.constant 0 : i32
    return %c0_i32, %c0_i32_0 : i32, i32
  }
  func.func @transform_9(%arg0: i32) -> (i32, i32) {
    %c0_i32 = arith.constant 0 : i32
    %c0_i32_0 = arith.constant 0 : i32
    %c0_i32_1 = arith.constant 0 : i32
    return %c0_i32, %c0_i32_0 : i32, i32
  }
  func.func @transform_10(%arg0: i32) -> (i32, i32, i32) {
    %c0_i32 = arith.constant 0 : i32
    %c0_i32_0 = arith.constant 0 : i32
    %c0_i32_1 = arith.constant 0 : i32
    return %arg0, %c0_i32, %c0_i32_0 : i32, i32, i32
  }
}

</mosaic_0001>

<bundles_post_ra>
// kernel: tpu_custom_call.1
= control target key start
LH: loop header
LB: loop body
LE: loop exit
PB: predicated region body
PF: predicated region fallthrough
CT: control target
= control target key end

     0   :  { %s8658_s0 = inlined_call_operand.vmem [shape: f32[2,56,112], index: 0, kind: input, shape index: {}]   ;;  %s8659_s1 = inlined_call_operand.vmem [shape: f32[3,112,416], index: 1, kind: input, shape index: {}]   ;;  %s8660_s2 = inlined_call_operand.vmem [shape: f32[2,416,208], index: 2, kind: input, shape index: {}]   ;;  %s8661_s3 = inlined_call_operand.vmem [shape: f32[2,26,54], index: 3, kind: input, shape index: {}]   ;;  %s8662_s4 = inlined_call_operand.vmem [shape: f32[3,208,352], index: 4, kind: input, shape index: {}]   ;;  %s8663_s5 = inlined_call_operand.vmem [shape: f32[2,352,160], index: 5, kind: input, shape index: {}]   ;;  %s8664_s6 = inlined_call_operand.vmem [shape: f32[2,10,24], index: 6, kind: input, shape index: {}]   ;;  %s8665_s7 = inlined_call_operand.hbm [shape: f32[800,128], index: 7, kind: input, shape index: {}]   ;;  %s8666_s8 = inlined_call_operand.vmem [shape: f32[128,40], index: 8, kind: input, shape index: {}]   ;;  %s8667_s9 = inlined_call_operand.vmem [shape: f32[1,936], index: 9, kind: input, shape index: {}]   ;;  %s8668_s10 = inlined_call_operand.hbm [shape: f32[2,2,40], index: 10, kind: output, shape index: {}]  }
   0x1   :  { %8669 = sst [smem:[#allocation33_spill]] %s8658_s0 }
   0x2   :  { %8670 = sst [smem:[#allocation34_spill]] %s8665_s7 }
   0x3   :  { %15 = vsyncpa [#allocation3], 0 }
   0x4   :  { %16 = vsyncpa [#allocation4], 0 }
   0x5   :  { %18 = vsyncpa [#allocation4 + $0x1], 0  ;;  %s4940_s13 = smov 0   ;;  %s4942_s14 = smov 0  }
   0x6   :  { %s4944_s15 = smov 0   ;;  %s4946_s16 = smov 0  }
   0x7 LB: > { %s4961_s17 = sadd.s32 4294967295, %s4877_s16   ;;  %s4034_s18 = sadd.s32 4294967294, %s4877_s16   ;;  %s4877_s16 = sphi %s4946_s16, %s8736_s16   ;;  %s4873_s15 = sphi %s4944_s15, %s8735_s15   ;;  %s4869_s14 = sphi %s4942_s14, %s8734_s14   ;;  %s4865_s13 = sphi %s4940_s13, %s8733_s13  }
   0x8   : > { %s4965_s19 = sadd.s32 1, %s4877_s16   ;;  %s246_s20 = sadd.s32 1, %s4873_s15 }
   0x9   : > { %s243_s21 = ssub.s32 %s4877_s16, %s4965_s19  ;;  %p256_p0 = scmp.ne.s32.totalorder %s4873_s15, %s4869_s14 }
   0xa   : > { %p244_p1 = scmp.eq.s32.totalorder %s243_s21, 0  ;;  %p257_p2 = scmp.eq.s32.totalorder %s4961_s17, 1 }
   0xb   : > { %p262_p3 = scmp.ne.s32.totalorder %s4869_s14, %s4865_s13  ;;  %p263_p4 = scmp.eq.s32.totalorder %s4034_s18, 1 }
   0xc   : > { %s4976_s22 = scalar_select %p244_p1, %s4873_s15, %s246_s20  }
   0xd   : > { %p4978_p5 = por %p257_p2, %p256_p0  ;;  %p4982_p6 = por %p263_p4, %p262_p3 }
   0xe   : > { %p4035_p7 = scmp.ge.s32.totalorder %s4877_s16, 1  ;;  %p270_p8 = scmp.lt.s32.totalorder %s4877_s16, 3 }
   0xf   : > { %p4723_p9 = scmp.eq.s32.totalorder %s4961_s17, 0  ;;  %s8673_s7 = sld [smem:[#allocation34_spill]] }
  0x10   : > { %p271_p10 = pnand %p4035_p7, %p270_p8  ;;  %s4879_s28 = smov [#allocation2]  }
  0x11   : > { %s301_s29 = sshll.u32 %s4879_s28, 4  ;;  %s4880_s30 = smov 128   ;;  %s302_s29 = int_to_ptr.vmem [resolvable:$true] %s301_s29 }
  0x12   : > { %p4715_p11 = pneg %p271_p10  ;;  %s4881_s11 = smov 8  }
  0x13   : > { %331 = sbr.rel (%p271_p10) target bundleno = 1794 (0x702), region = 60 }
  0x14   : > { %p4716_p12 = pnand %p4723_p9, %p4715_p11 }
  0x15   : > { %s299_s27 = sshll.u32 %s8673_s7, 4  ;;  %s300_s27 = int_to_ptr.hbm [resolvable:$true] %s299_s27 }
  0x16   : > { %4718 = dma.hbm_to_vmem [thread:$0]  (!%p4716_p12), %s300_s27, 12800, %s302_s29, [#allocation3], %s4880_s30, %s4880_s30, %s4881_s11  }
  0x18   : > { %4856 = dma.done.wait (%p4723_p9), [#allocation3], 12800  }
  0x19   : > { %4858 = vsyncadd (%p4723_p9), [#allocation3], 4294954496  ;;  %v4094_v0 = vld [vmem:[%s8659_s1 + $0x360] sm:$0xff]  ;;  %v4095_v1 = vld [vmem:[%s8659_s1 + $0x368] sm:$0xff]  ;;  %p370_p13 = scmp.lt.s32.totalorder %s4961_s17, 1  ;;  %s8674_s0 = sld [smem:[#allocation33_spill]] }
  0x1a   : > { %v4096_v2 = vld [vmem:[%s8659_s1 + $0x370] sm:$0xff]  ;;  %533 = vmatpush.msra.mxu0 %v4094_v0  ;;  %571 = vmatpush.msra.mxu1 %v4095_v1  ;;  %v4097_v3 = vld [vmem:[%s8659_s1 + $0x378] sm:$0xff]  ;;  %v4090_v4 = vld [vmem:[%s8659_s1 + $0x340] sm:$0xff]  ;;  %vm502_vm0 = vcmask 1046528   ;;  %vm516_vm1 = vcmask 916480   ;;  %vm906_vm2 = vcmask 1045504  }
  0x1b   : > { %v4091_v5 = vld [vmem:[%s8659_s1 + $0x348] sm:$0xff]  ;;  %609 = vmatpush.msra.mxu2 %v4096_v2  ;;  %647 = vmatpush.msra.mxu3 %v4097_v3  ;;  %v4092_v6 = vld [vmem:[%s8659_s1 + $0x350] sm:$0xff]  ;;  %v4093_v7 = vld [vmem:[%s8659_s1 + $0x358] sm:$0xff]  ;;  %s5068_s12 = scalar_select %p370_p13, %s4961_s17, 1  ;;  %vm1284_vm3 = vcmask 261120   ;;  %vm2037_vm4 = vcmask 441344  }
  0x1c   : > { %v4086_v8 = vld [vmem:[%s8659_s1 + $0x320] sm:$0xff]  ;;  %534 = vmatpush.msra.mxu0 %v4090_v4  ;;  %572 = vmatpush.msra.mxu1 %v4091_v5  ;;  %v4087_v9 = vld [vmem:[%s8659_s1 + $0x328] sm:$0xff]  ;;  %v4088_v10 = vld [vmem:[%s8659_s1 + $0x330] sm:$0xff]  ;;  %vm2379_vm5 = vcmask 654336   ;;  %vm2982_vm6 = vcmask 785408   ;;  %vm3512_vm7 = vcmask 195584  }
  0x1d   : > { %v4089_v11 = vld [vmem:[%s8659_s1 + $0x338] sm:$0xff]  ;;  %610 = vmatpush.msra.mxu2 %v4092_v6  ;;  %648 = vmatpush.msra.mxu3 %v4093_v7  ;;  %v4082_v12 = vld [vmem:[%s8659_s1 + $0x300] sm:$0xff]  ;;  %v4083_v13 = vld [vmem:[%s8659_s1 + $0x308] sm:$0xff]  ;;  %s4708_s28 = smul.u32 56, %s5068_s12  ;;  %s4882_s12 = smov 96   ;;  %vm3641_vm8 = vcmask 523264  }
  0x1e   : > { %535 = vmatpush.msra.mxu0 %v4086_v8  ;;  %573 = vmatpush.msra.mxu1 %v4087_v9  ;;  %v4084_v14 = vld [vmem:[%s8659_s1 + $0x310] sm:$0xff]  ;;  %v4085_v15 = vld [vmem:[%s8659_s1 + $0x318] sm:$0xff]  ;;  %v4078_v16 = vld [vmem:[%s8659_s1 + $0x2e0] sm:$0xff]  ;;  %vm3945_vm9 = vcmask 320512  }
  0x1f   : > { %611 = vmatpush.msra.mxu2 %v4088_v10  ;;  %649 = vmatpush.msra.mxu3 %v4089_v11  ;;  %v4079_v17 = vld [vmem:[%s8659_s1 + $0x2e8] sm:$0xff]  ;;  %v4080_v18 = vld [vmem:[%s8659_s1 + $0x2f0] sm:$0xff]  ;;  %v4081_v19 = vld [vmem:[%s8659_s1 + $0x2f8] sm:$0xff]  ;;  %s5122_s7 = scalar_lea.vmem %s8674_s0, %s4708_s28  ;;  %s4884_s28 = smov 32  }
  0x20   : > { %536 = vmatpush.msra.mxu0 %v4082_v12  ;;  %574 = vmatpush.msra.mxu1 %v4083_v13  ;;  %v4074_v20 = vld [vmem:[%s8659_s1 + $0x2c0] sm:$0xff]  ;;  %v4075_v21 = vld [vmem:[%s8659_s1 + $0x2c8] sm:$0xff]  ;;  %v4076_v22 = vld [vmem:[%s8659_s1 + $0x2d0] sm:$0xff] }
  0x21   : > { %612 = vmatpush.msra.mxu2 %v4084_v14  ;;  %650 = vmatpush.msra.mxu3 %v4085_v15  ;;  %v4077_v23 = vld [vmem:[%s8659_s1 + $0x2d8] sm:$0xff]  ;;  %v4070_v24 = vld [vmem:[%s8659_s1 + $0x2a0] sm:$0xff]  ;;  %v4071_v25 = vld [vmem:[%s8659_s1 + $0x2a8] sm:$0xff] }
  0x22   : > { %537 = vmatpush.msra.mxu0 %v4078_v16  ;;  %575 = vmatpush.msra.mxu1 %v4079_v17  ;;  %v4072_v26 = vld [vmem:[%s8659_s1 + $0x2b0] sm:$0xff]  ;;  %v4073_v27 = vld [vmem:[%s8659_s1 + $0x2b8] sm:$0xff]  ;;  %v4066_v28 = vld [vmem:[%s8659_s1 + $0x280] sm:$0xff] }
  0x23   : > { %613 = vmatpush.msra.mxu2 %v4080_v18  ;;  %651 = vmatpush.msra.mxu3 %v4081_v19  ;;  %v4067_v29 = vld [vmem:[%s8659_s1 + $0x288] sm:$0xff]  ;;  %v4068_v30 = vld [vmem:[%s8659_s1 + $0x290] sm:$0xff]  ;;  %v4069_v31 = vld [vmem:[%s8659_s1 + $0x298] sm:$0xff] }
  0x24   : > { %538 = vmatpush.msra.mxu0 %v4074_v20  ;;  %576 = vmatpush.msra.mxu1 %v4075_v21  ;;  %v4062_v32 = vld [vmem:[%s8659_s1 + $0x260] sm:$0xff]  ;;  %v4063_v33 = vld [vmem:[%s8659_s1 + $0x268] sm:$0xff]  ;;  %v4064_v34 = vld [vmem:[%s8659_s1 + $0x270] sm:$0xff] }
  0x25   : > { %614 = vmatpush.msra.mxu2 %v4076_v22  ;;  %652 = vmatpush.msra.mxu3 %v4077_v23  ;;  %v4065_v35 = vld [vmem:[%s8659_s1 + $0x278] sm:$0xff]  ;;  %v4058_v36 = vld [vmem:[%s8659_s1 + $0x240] sm:$0xff]  ;;  %v4059_v37 = vld [vmem:[%s8659_s1 + $0x248] sm:$0xff] }
  0x26   : > { %539 = vmatpush.msra.mxu0 %v4070_v24  ;;  %577 = vmatpush.msra.mxu1 %v4071_v25  ;;  %v4060_v38 = vld [vmem:[%s8659_s1 + $0x250] sm:$0xff]  ;;  %v4061_v39 = vld [vmem:[%s8659_s1 + $0x258] sm:$0xff]  ;;  %v4054_v40 = vld [vmem:[%s8659_s1 + $0x220] sm:$0xff] }
  0x27   : > { %615 = vmatpush.msra.mxu2 %v4072_v26  ;;  %653 = vmatpush.msra.mxu3 %v4073_v27  ;;  %v4055_v41 = vld [vmem:[%s8659_s1 + $0x228] sm:$0xff]  ;;  %v4056_v42 = vld [vmem:[%s8659_s1 + $0x230] sm:$0xff]  ;;  %v4057_v43 = vld [vmem:[%s8659_s1 + $0x238] sm:$0xff] }
  0x28   : > { %540 = vmatpush.msra.mxu0 %v4066_v28  ;;  %578 = vmatpush.msra.mxu1 %v4067_v29  ;;  %v5143_v44 = vld [vmem:[%s5122_s7] sm:$0xff]  ;;  %v5146_v45 = vld [vmem:[%s5122_s7 + $0x8] sm:$0xff]  ;;  %v4052_v48 = vld [vmem:[%s8659_s1 + $0x210] sm:$0xff] }
  0x29   : > { %616 = vmatpush.msra.mxu2 %v4068_v30  ;;  %654 = vmatpush.msra.mxu3 %v4069_v31  ;;  %v4050_v46 = vld [vmem:[%s8659_s1 + $0x200] sm:$0xff]  ;;  %v4051_v47 = vld [vmem:[%s8659_s1 + $0x208] sm:$0xff]  ;;  %v4053_v49 = vld [vmem:[%s8659_s1 + $0x218] sm:$0xff]  ;;  %v503_v52 = vrot.slane %v5143_v44, 1  ;;  %v504_v53 = vrot.slane %v5146_v45, 1 }
  0x2a   : > { %541 = vmatpush.msra.mxu0 %v4062_v32  ;;  %579 = vmatpush.msra.mxu1 %v4063_v33  ;;  %v4046_v50 = vld [vmem:[%s8659_s1 + $0x1e0] sm:$0xff]  ;;  %v4047_v51 = vld [vmem:[%s8659_s1 + $0x1e8] sm:$0xff]  ;;  %v4048_v54 = vld [vmem:[%s8659_s1 + $0x1f0] sm:$0xff] }
  0x2b   : > { %617 = vmatpush.msra.mxu2 %v4064_v34  ;;  %655 = vmatpush.msra.mxu3 %v4065_v35  ;;  %v4049_v55 = vld [vmem:[%s8659_s1 + $0x1f8] sm:$0xff]  ;;  %v4042_v56 = vld [vmem:[%s8659_s1 + $0x1c0] sm:$0xff]  ;;  %v4043_v57 = vld [vmem:[%s8659_s1 + $0x1c8] sm:$0xff]  ;;  %v505_v60 = vsel %vm502_vm0, %v503_v52, %v504_v53 }
  0x2c   : > { %542 = vmatpush.msra.mxu0 %v4058_v36  ;;  %580 = vmatpush.msra.mxu1 %v4059_v37  ;;  %v4044_v58 = vld [vmem:[%s8659_s1 + $0x1d0] sm:$0xff]  ;;  %v4045_v59 = vld [vmem:[%s8659_s1 + $0x1d8] sm:$0xff]  ;;  %v434_v62 = vld [vmem:[%s8659_s1 + $0x1a0] sm:$0xff] }
  0x2d   : > { %618 = vmatpush.msra.mxu2 %v4060_v38  ;;  %656 = vmatpush.msra.mxu3 %v4061_v39  ;;  %v5188_v61 = vld [vmem:[%s5122_s7 + $0x10] sm:$0xff]  ;;  %v435_v63 = vld [vmem:[%s8659_s1 + $0x1a8] sm:$0xff]  ;;  %v437_v1 = vld [vmem:[%s8659_s1 + $0x1b8] sm:$0xff] }
  0x2e   : > { %543 = vmatpush.msra.mxu0 %v4054_v40  ;;  %581 = vmatpush.msra.mxu1 %v4055_v41  ;;  %v436_v0 = vld [vmem:[%s8659_s1 + $0x1b0] sm:$0xff]  ;;  %v506_v2 = vrot.slane %v5188_v61, 1  ;;  %v430_v3 = vld [vmem:[%s8659_s1 + $0x180] sm:$0xff]  ;;  %v431_v4 = vld [vmem:[%s8659_s1 + $0x188] sm:$0xff] }
  0x2f   : > { %619 = vmatpush.msra.mxu2 %v4056_v42  ;;  %657 = vmatpush.msra.mxu3 %v4057_v43  ;;  %v432_v5 = vld [vmem:[%s8659_s1 + $0x190] sm:$0xff]  ;;  %v433_v6 = vld [vmem:[%s8659_s1 + $0x198] sm:$0xff]  ;;  %v426_v7 = vld [vmem:[%s8659_s1 + $0x160] sm:$0xff] }
  0x30   : > { %544 = vmatpush.msra.mxu0 %v4050_v46  ;;  %582 = vmatpush.msra.mxu1 %v4051_v47  ;;  %v427_v8 = vld [vmem:[%s8659_s1 + $0x168] sm:$0xff]  ;;  %v428_v9 = vld [vmem:[%s8659_s1 + $0x170] sm:$0xff]  ;;  %v429_v10 = vld [vmem:[%s8659_s1 + $0x178] sm:$0xff]  ;;  %v507_v11 = vsel %vm502_vm0, %v504_v53, %v506_v2 }
  0x31   : > { %620 = vmatpush.msra.mxu2 %v4052_v48  ;;  %658 = vmatpush.msra.mxu3 %v4053_v49  ;;  %v5233_v12 = vld [vmem:[%s5122_s7 + $0x18] sm:$0xff]  ;;  %v422_v13 = vld [vmem:[%s8659_s1 + $0x140] sm:$0xff]  ;;  %v423_v14 = vld [vmem:[%s8659_s1 + $0x148] sm:$0xff] }
  0x32   : > { %545 = vmatpush.msra.mxu0 %v4046_v50  ;;  %583 = vmatpush.msra.mxu1 %v4047_v51  ;;  %v424_v15 = vld [vmem:[%s8659_s1 + $0x150] sm:$0xff]  ;;  %v425_v16 = vld [vmem:[%s8659_s1 + $0x158] sm:$0xff]  ;;  %v508_v17 = vrot.slane %v5233_v12, 1  ;;  %v418_v18 = vld [vmem:[%s8659_s1 + $0x120] sm:$0xff] }
  0x33   : > { %621 = vmatpush.msra.mxu2 %v4048_v54  ;;  %659 = vmatpush.msra.mxu3 %v4049_v55  ;;  %v419_v19 = vld [vmem:[%s8659_s1 + $0x128] sm:$0xff]  ;;  %v420_v20 = vld [vmem:[%s8659_s1 + $0x130] sm:$0xff]  ;;  %v421_v21 = vld [vmem:[%s8659_s1 + $0x138] sm:$0xff] }
  0x34   : > { %546 = vmatpush.msra.mxu0 %v4042_v56  ;;  %584 = vmatpush.msra.mxu1 %v4043_v57  ;;  %v414_v22 = vld [vmem:[%s8659_s1 + $0x100] sm:$0xff]  ;;  %v415_v23 = vld [vmem:[%s8659_s1 + $0x108] sm:$0xff]  ;;  %v416_v24 = vld [vmem:[%s8659_s1 + $0x110] sm:$0xff]  ;;  %v509_v26 = vsel %vm502_vm0, %v506_v2, %v508_v17 }
  0x35   : > { %622 = vmatpush.msra.mxu2 %v4044_v58  ;;  %660 = vmatpush.msra.mxu3 %v4045_v59  ;;  %v417_v25 = vld [vmem:[%s8659_s1 + $0x118] sm:$0xff]  ;;  %v5278_v27 = vld [vmem:[%s5122_s7 + $0x20] sm:$0xff]  ;;  %v411_v29 = vld [vmem:[%s8659_s1 + $0xe8] sm:$0xff] }
  0x36   : > { %4098 = vmatmul.msk.f32.vlgmr.msra.gmra.mxu0 %vm516_vm1, %v505_v60  ;;  %4105 = vmatmul.msk.f32.vlgmr.msra.gmra.mxu1 %vm516_vm1, %v505_v60  ;;  %v410_v28 = vld [vmem:[%s8659_s1 + $0xe0] sm:$0xff]  ;;  %v412_v30 = vld [vmem:[%s8659_s1 + $0xf0] sm:$0xff]  ;;  %v413_v31 = vld [vmem:[%s8659_s1 + $0xf8] sm:$0xff]  ;;  %v510_v32 = vrot.slane %v5278_v27, 1 }
  0x37   : > { %4112 = vmatmul.msk.f32.vlgmr.msra.gmra.mxu2 %vm516_vm1, %v505_v60  ;;  %4119 = vmatmul.msk.f32.vlgmr.msra.gmra.mxu3 %vm516_vm1, %v505_v60  ;;  %v406_v33 = vld [vmem:[%s8659_s1 + $0xc0] sm:$0xff]  ;;  %v407_v34 = vld [vmem:[%s8659_s1 + $0xc8] sm:$0xff]  ;;  %v408_v35 = vld [vmem:[%s8659_s1 + $0xd0] sm:$0xff] }
  0x38   : > { %699 = vmatpush.msrb.mxu0 %v434_v62  ;;  %737 = vmatpush.msrb.mxu1 %v435_v63  ;;  %v409_v36 = vld [vmem:[%s8659_s1 + $0xd8] sm:$0xff]  ;;  %v402_v37 = vld [vmem:[%s8659_s1 + $0xa0] sm:$0xff]  ;;  %v403_v38 = vld [vmem:[%s8659_s1 + $0xa8] sm:$0xff]  ;;  %v511_v41 = vsel %vm502_vm0, %v508_v17, %v510_v32 }
  0x39   : > { %775 = vmatpush.msrb.mxu2 %v436_v0  ;;  %813 = vmatpush.msrb.mxu3 %v437_v1  ;;  %v404_v39 = vld [vmem:[%s8659_s1 + $0xb0] sm:$0xff]  ;;  %v405_v40 = vld [vmem:[%s8659_s1 + $0xb8] sm:$0xff]  ;;  %v5323_v42 = vld [vmem:[%s5122_s7 + $0x28] sm:$0xff] }
  0x3a   : > { %700 = vmatpush.msrb.mxu0 %v430_v3  ;;  %738 = vmatpush.msrb.mxu1 %v431_v4  ;;  %v398_v43 = vld [vmem:[%s8659_s1 + $0x80] sm:$0xff]  ;;  %v399_v46 = vld [vmem:[%s8659_s1 + $0x88] sm:$0xff]  ;;  %v400_v47 = vld [vmem:[%s8659_s1 + $0x90] sm:$0xff]  ;;  %v512_v49 = vrot.slane %v5323_v42, 1 }
  0x3b   : > { %776 = vmatpush.msrb.mxu2 %v432_v5  ;;  %814 = vmatpush.msrb.mxu3 %v433_v6  ;;  %v401_v48 = vld [vmem:[%s8659_s1 + $0x98] sm:$0xff]  ;;  %v394_v50 = vld [vmem:[%s8659_s1 + $0x60] sm:$0xff]  ;;  %v395_v51 = vld [vmem:[%s8659_s1 + $0x68] sm:$0xff] }
  0x3c   : > { %701 = vmatpush.msrb.mxu0 %v426_v7  ;;  %739 = vmatpush.msrb.mxu1 %v427_v8  ;;  %v396_v52 = vld [vmem:[%s8659_s1 + $0x70] sm:$0xff]  ;;  %v397_v53 = vld [vmem:[%s8659_s1 + $0x78] sm:$0xff]  ;;  %v390_v54 = vld [vmem:[%s8659_s1 + $0x40] sm:$0xff]  ;;  %v513_v58 = vsel %vm502_vm0, %v510_v32, %v512_v49 }
  0x3d   : > { %777 = vmatpush.msrb.mxu2 %v428_v9  ;;  %815 = vmatpush.msrb.mxu3 %v429_v10  ;;  %v391_v55 = vld [vmem:[%s8659_s1 + $0x48] sm:$0xff]  ;;  %v392_v56 = vld [vmem:[%s8659_s1 + $0x50] sm:$0xff]  ;;  %v393_v57 = vld [vmem:[%s8659_s1 + $0x58] sm:$0xff] }
  0x3e   : > { %4099 = vmatmul.msk.f32.gmra.mxu0 %vm516_vm1, %v507_v11  ;;  %4106 = vmatmul.msk.f32.gmra.mxu1 %vm516_vm1, %v507_v11  ;;  %v5368_v59 = vld [vmem:[%s5122_s7 + $0x30] sm:$0xff]  ;;  %v386_v60 = vld [vmem:[%s8659_s1 + $0x20] sm:$0xff]  ;;  %v387_v62 = vld [vmem:[%s8659_s1 + $0x28] sm:$0xff]  ;;  %s4883_s7 = smov 64  }
  0x3f   : > { %4113 = vmatmul.msk.f32.gmra.mxu2 %vm516_vm1, %v507_v11  ;;  %4120 = vmatmul.msk.f32.gmra.mxu3 %vm516_vm1, %v507_v11  ;;  %v388_v63 = vld [vmem:[%s8659_s1 + $0x30] sm:$0xff]  ;;  %v389_v0 = vld [vmem:[%s8659_s1 + $0x38] sm:$0xff]  ;;  %v514_v1 = vrot.slane %v5368_v59, 1  ;;  %v382_v2 = vld [vmem:[%s8659_s1] sm:$0xff] }
  0x40   : > { %702 = vmatpush.msrb.mxu0 %v422_v13  ;;  %740 = vmatpush.msrb.mxu1 %v423_v14  ;;  %v383_v3 = vld [vmem:[%s8659_s1 + $0x8] sm:$0xff]  ;;  %v384_v4 = vld [vmem:[%s8659_s1 + $0x10] sm:$0xff]  ;;  %v385_v5 = vld [vmem:[%s8659_s1 + $0x18] sm:$0xff] }
  0x41   : > { %778 = vmatpush.msrb.mxu2 %v424_v15  ;;  %816 = vmatpush.msrb.mxu3 %v425_v16  ;;  %v515_v6 = vsel %vm502_vm0, %v512_v49, %v514_v1  ;;  %v4206_v7 = vld [vmem:[%s8659_s1 + $0x520] sm:$0xff]  ;;  %v4207_v8 = vld [vmem:[%s8659_s1 + $0x528] sm:$0xff]  ;;  %v4208_v9 = vld [vmem:[%s8659_s1 + $0x530] sm:$0xff] }
  0x42   : > { %703 = vmatpush.msrb.mxu0 %v418_v18  ;;  %741 = vmatpush.msrb.mxu1 %v419_v19  ;;  %v4209_v10 = vld [vmem:[%s8659_s1 + $0x538] sm:$0xff]  ;;  %v4202_v11 = vld [vmem:[%s8659_s1 + $0x500] sm:$0xff]  ;;  %v4203_v13 = vld [vmem:[%s8659_s1 + $0x508] sm:$0xff] }
  0x43   : > { %779 = vmatpush.msrb.mxu2 %v420_v20  ;;  %817 = vmatpush.msrb.mxu3 %v421_v21  ;;  %v4204_v14 = vld [vmem:[%s8659_s1 + $0x510] sm:$0xff]  ;;  %v4205_v15 = vld [vmem:[%s8659_s1 + $0x518] sm:$0xff]  ;;  %v4198_v16 = vld [vmem:[%s8659_s1 + $0x4e0] sm:$0xff] }
  0x44   : > { %704 = vmatpush.msrb.mxu0 %v414_v22  ;;  %742 = vmatpush.msrb.mxu1 %v415_v23  ;;  %v4199_v17 = vld [vmem:[%s8659_s1 + $0x4e8] sm:$0xff]  ;;  %v4200_v18 = vld [vmem:[%s8659_s1 + $0x4f0] sm:$0xff]  ;;  %v4201_v19 = vld [vmem:[%s8659_s1 + $0x4f8] sm:$0xff] }
  0x45   : > { %780 = vmatpush.msrb.mxu2 %v416_v24  ;;  %818 = vmatpush.msrb.mxu3 %v417_v25  ;;  %v4194_v20 = vld [vmem:[%s8659_s1 + $0x4c0] sm:$0xff]  ;;  %v4195_v21 = vld [vmem:[%s8659_s1 + $0x4c8] sm:$0xff]  ;;  %v4196_v22 = vld [vmem:[%s8659_s1 + $0x4d0] sm:$0xff] }
  0x46   : > { %4100 = vmatmul.msk.f32.gmra.mxu0 %vm516_vm1, %v509_v26  ;;  %4107 = vmatmul.msk.f32.gmra.mxu1 %vm516_vm1, %v509_v26  ;;  %v4197_v23 = vld [vmem:[%s8659_s1 + $0x4d8] sm:$0xff]  ;;  %v4190_v24 = vld [vmem:[%s8659_s1 + $0x4a0] sm:$0xff]  ;;  %v4191_v25 = vld [vmem:[%s8659_s1 + $0x4a8] sm:$0xff] }
  0x47   : > { %4114 = vmatmul.msk.f32.gmra.mxu2 %vm516_vm1, %v509_v26  ;;  %4121 = vmatmul.msk.f32.gmra.mxu3 %vm516_vm1, %v509_v26  ;;  %v4192_v26 = vld [vmem:[%s8659_s1 + $0x4b0] sm:$0xff]  ;;  %v4189_v32 = vld [vmem:[%s8659_s1 + $0x498] sm:$0xff]  ;;  %v4171_v49 = vld [vmem:[%s8659_s1 + $0x408] sm:$0xff] }
  0x48   : > { %705 = vmatpush.msrb.mxu0 %v410_v28  ;;  %743 = vmatpush.msrb.mxu1 %v411_v29  ;;  %v4193_v28 = vld [vmem:[%s8659_s1 + $0x4b8] sm:$0xff]  ;;  %v4186_v29 = vld [vmem:[%s8659_s1 + $0x480] sm:$0xff] }
  0x49   : > { %781 = vmatpush.msrb.mxu2 %v412_v30  ;;  %819 = vmatpush.msrb.mxu3 %v413_v31  ;;  %v4187_v30 = vld [vmem:[%s8659_s1 + $0x488] sm:$0xff]  ;;  %v4188_v31 = vld [vmem:[%s8659_s1 + $0x490] sm:$0xff] }
  0x4a   : > { %706 = vmatpush.msrb.mxu0 %v406_v33  ;;  %744 = vmatpush.msrb.mxu1 %v407_v34  ;;  %v4182_v33 = vld [vmem:[%s8659_s1 + $0x460] sm:$0xff]  ;;  %v4183_v34 = vld [vmem:[%s8659_s1 + $0x468] sm:$0xff] }
  0x4b   : > { %782 = vmatpush.msrb.mxu2 %v408_v35  ;;  %820 = vmatpush.msrb.mxu3 %v409_v36  ;;  %v4184_v35 = vld [vmem:[%s8659_s1 + $0x470] sm:$0xff]  ;;  %v4185_v36 = vld [vmem:[%s8659_s1 + $0x478] sm:$0xff] }
  0x4c   : > { %707 = vmatpush.msrb.mxu0 %v402_v37  ;;  %745 = vmatpush.msrb.mxu1 %v403_v38  ;;  %v4178_v37 = vld [vmem:[%s8659_s1 + $0x440] sm:$0xff]  ;;  %v4179_v38 = vld [vmem:[%s8659_s1 + $0x448] sm:$0xff] }
  0x4d   : > { %783 = vmatpush.msrb.mxu2 %v404_v39  ;;  %821 = vmatpush.msrb.mxu3 %v405_v40  ;;  %v4180_v39 = vld [vmem:[%s8659_s1 + $0x450] sm:$0xff]  ;;  %v4181_v40 = vld [vmem:[%s8659_s1 + $0x458] sm:$0xff] }
  0x4e   : > { %4101 = vmatmul.msk.f32.gmra.mxu0 %vm516_vm1, %v511_v41  ;;  %4108 = vmatmul.msk.f32.gmra.mxu1 %vm516_vm1, %v511_v41 }
  0x4f   : > { %4115 = vmatmul.msk.f32.gmra.mxu2 %vm516_vm1, %v511_v41  ;;  %4122 = vmatmul.msk.f32.gmra.mxu3 %vm516_vm1, %v511_v41  ;;  %v4174_v41 = vld [vmem:[%s8659_s1 + $0x420] sm:$0xff] }
  0x50   : > { %708 = vmatpush.msrb.mxu0 %v398_v43  ;;  %746 = vmatpush.msrb.mxu1 %v399_v46  ;;  %v4175_v43 = vld [vmem:[%s8659_s1 + $0x428] sm:$0xff]  ;;  %v4176_v46 = vld [vmem:[%s8659_s1 + $0x430] sm:$0xff] }
  0x51   : > { %784 = vmatpush.msrb.mxu2 %v400_v47  ;;  %822 = vmatpush.msrb.mxu3 %v401_v48  ;;  %v4177_v47 = vld [vmem:[%s8659_s1 + $0x438] sm:$0xff]  ;;  %v4170_v48 = vld [vmem:[%s8659_s1 + $0x400] sm:$0xff] }
  0x52   : > { %709 = vmatpush.msrb.mxu0 %v394_v50  ;;  %747 = vmatpush.msrb.mxu1 %v395_v51  ;;  %v4172_v50 = vld [vmem:[%s8659_s1 + $0x410] sm:$0xff]  ;;  %v4173_v51 = vld [vmem:[%s8659_s1 + $0x418] sm:$0xff] }
  0x53   : > { %785 = vmatpush.msrb.mxu2 %v396_v52  ;;  %823 = vmatpush.msrb.mxu3 %v397_v53  ;;  %v4166_v52 = vld [vmem:[%s8659_s1 + $0x3e0] sm:$0xff]  ;;  %v4167_v53 = vld [vmem:[%s8659_s1 + $0x3e8] sm:$0xff] }
  0x54   : > { %710 = vmatpush.msrb.mxu0 %v390_v54  ;;  %748 = vmatpush.msrb.mxu1 %v391_v55  ;;  %v4168_v54 = vld [vmem:[%s8659_s1 + $0x3f0] sm:$0xff]  ;;  %v4169_v55 = vld [vmem:[%s8659_s1 + $0x3f8] sm:$0xff] }
  0x55   : > { %786 = vmatpush.msrb.mxu2 %v392_v56  ;;  %824 = vmatpush.msrb.mxu3 %v393_v57  ;;  %v4162_v56 = vld [vmem:[%s8659_s1 + $0x3c0] sm:$0xff]  ;;  %v4163_v57 = vld [vmem:[%s8659_s1 + $0x3c8] sm:$0xff] }
  0x56   : > { %4102 = vmatmul.msk.f32.gmra.mxu0 %vm516_vm1, %v513_v58  ;;  %4109 = vmatmul.msk.f32.gmra.mxu1 %vm516_vm1, %v513_v58 }
  0x57   : > { %4116 = vmatmul.msk.f32.gmra.mxu2 %vm516_vm1, %v513_v58  ;;  %4123 = vmatmul.msk.f32.gmra.mxu3 %vm516_vm1, %v513_v58  ;;  %v4164_v58 = vld [vmem:[%s8659_s1 + $0x3d0] sm:$0xff] }
  0x58   : > { %711 = vmatpush.msrb.mxu0 %v386_v60  ;;  %749 = vmatpush.msrb.mxu1 %v387_v62  ;;  %v4165_v60 = vld [vmem:[%s8659_s1 + $0x3d8] sm:$0xff]  ;;  %v4158_v62 = vld [vmem:[%s8659_s1 + $0x3a0] sm:$0xff] }
  0x59   : > { %787 = vmatpush.msrb.mxu2 %v388_v63  ;;  %825 = vmatpush.msrb.mxu3 %v389_v0  ;;  %v4159_v63 = vld [vmem:[%s8659_s1 + $0x3a8] sm:$0xff]  ;;  %v4160_v0 = vld [vmem:[%s8659_s1 + $0x3b0] sm:$0xff] }
  0x5a   : > { %712 = vmatpush.msrb.mxu0 %v382_v2  ;;  %750 = vmatpush.msrb.mxu1 %v383_v3  ;;  %v4154_v2 = vld [vmem:[%s8659_s1 + $0x380] sm:$0xff]  ;;  %v4155_v3 = vld [vmem:[%s8659_s1 + $0x388] sm:$0xff] }
  0x5b   : > { %788 = vmatpush.msrb.mxu2 %v384_v4  ;;  %826 = vmatpush.msrb.mxu3 %v385_v5  ;;  %v4156_v4 = vld [vmem:[%s8659_s1 + $0x390] sm:$0xff]  ;;  %v4157_v5 = vld [vmem:[%s8659_s1 + $0x398] sm:$0xff] }
  0x5c   : > { %936 = vmatpush.msra.mxu0 %v4206_v7  ;;  %974 = vmatpush.msra.mxu1 %v4207_v8  ;;  %v908_v7 = vrot.slane %v5146_v45, 2 }
  0x5d   : > { %1012 = vmatpush.msra.mxu2 %v4208_v9  ;;  %1050 = vmatpush.msra.mxu3 %v4209_v10  ;;  %v910_v9 = vrot.slane %v5188_v61, 2 }
  0x5e   : > { %4103 = vmatmul.msk.f32.gmra.mxu0 %vm516_vm1, %v515_v6  ;;  %4110 = vmatmul.msk.f32.gmra.mxu1 %vm516_vm1, %v515_v6 }
  0x5f   : > { %4117 = vmatmul.msk.f32.gmra.mxu2 %vm516_vm1, %v515_v6  ;;  %4124 = vmatmul.msk.f32.gmra.mxu3 %vm516_vm1, %v515_v6  ;;  %v907_v6 = vrot.slane %v5143_v44, 2  ;;  %v911_v10 = vsel %vm906_vm2, %v908_v7, %v910_v9 }
  0x60   : > { %937 = vmatpush.msra.mxu0 %v4202_v11  ;;  %975 = vmatpush.msra.mxu1 %v4203_v13 }
  0x61   : > { %1013 = vmatpush.msra.mxu2 %v4204_v14  ;;  %1051 = vmatpush.msra.mxu3 %v4205_v15  ;;  %v909_v8 = vsel %vm906_vm2, %v907_v6, %v908_v7  ;;  %v1268_v6 = vld [vmem:[%s8660_s2 + $0x2c0] sm:$0xff] }
  0x62   : > { %938 = vmatpush.msra.mxu0 %v4198_v16  ;;  %976 = vmatpush.msra.mxu1 %v4199_v17  ;;  %v1196_v7 = vld [vmem:[%s8660_s2 + $0x80] sm:$0xff] }
  0x63   : > { %1014 = vmatpush.msra.mxu2 %v4200_v18  ;;  %1052 = vmatpush.msra.mxu3 %v4201_v19 }
  0x64   : > { %939 = vmatpush.msra.mxu0 %v4194_v20  ;;  %977 = vmatpush.msra.mxu1 %v4195_v21 }
  0x65   : > { %1015 = vmatpush.msra.mxu2 %v4196_v22  ;;  %1053 = vmatpush.msra.mxu3 %v4197_v23 }
  0x66   : > { %4104 = vmatmul.msk.f32.gmra.mxu0 %vm516_vm1, %v514_v1  ;;  %4111 = vmatmul.msk.f32.gmra.mxu1 %vm516_vm1, %v514_v1 }
  0x67   : > { %4118 = vmatmul.msk.f32.gmra.mxu2 %vm516_vm1, %v514_v1  ;;  %4125 = vmatmul.msk.f32.gmra.mxu3 %vm516_vm1, %v514_v1  ;;  %v4161_v1 = vld [vmem:[%s8659_s1 + $0x3b8] sm:$0xff] }
  0x68   : > { %940 = vmatpush.msra.mxu0 %v4190_v24  ;;  %978 = vmatpush.msra.mxu1 %v4191_v25 }
  0x69   : > { %1016 = vmatpush.msra.mxu2 %v4192_v26  ;;  %1054 = vmatpush.msra.mxu3 %v4193_v28 }
  0x6a   : > { %941 = vmatpush.msra.mxu0 %v4186_v29  ;;  %979 = vmatpush.msra.mxu1 %v4187_v30 }
  0x6b   : > { %1017 = vmatpush.msra.mxu2 %v4188_v31  ;;  %1055 = vmatpush.msra.mxu3 %v4189_v32 }
  0x6c   : > { %942 = vmatpush.msra.mxu0 %v4182_v33  ;;  %980 = vmatpush.msra.mxu1 %v4183_v34 }
  0x6d   : > { %1018 = vmatpush.msra.mxu2 %v4184_v35  ;;  %1056 = vmatpush.msra.mxu3 %v4185_v36 }
  0x6e   : > { %4126 = vmatmul.msk.f32.vlgmr.msrb.gmra.mxu0 %vm516_vm1, %v5143_v44  ;;  %4133 = vmatmul.msk.f32.vlgmr.msrb.gmra.mxu1 %vm516_vm1, %v5143_v44 }
  0x6f   : > { %4140 = vmatmul.msk.f32.vlgmr.msrb.gmra.mxu2 %vm516_vm1, %v5143_v44  ;;  %4147 = vmatmul.msk.f32.vlgmr.msrb.gmra.mxu3 %vm516_vm1, %v5143_v44  ;;  %v912_v44 = vrot.slane %v5233_v12, 2 }
  0x70   : > { %943 = vmatpush.msra.mxu0 %v4178_v37  ;;  %981 = vmatpush.msra.mxu1 %v4179_v38 }
  0x71   : > { %1019 = vmatpush.msra.mxu2 %v4180_v39  ;;  %1057 = vmatpush.msra.mxu3 %v4181_v40  ;;  %v913_v13 = vsel %vm906_vm2, %v910_v9, %v912_v44  ;;  %v1266_v9 = vld [vmem:[%s8660_s2 + $0x2b0] sm:$0xff] }
  0x72   : > { %944 = vmatpush.msra.mxu0 %v4174_v41  ;;  %982 = vmatpush.msra.mxu1 %v4175_v43 }
  0x73   : > { %1020 = vmatpush.msra.mxu2 %v4176_v46  ;;  %1058 = vmatpush.msra.mxu3 %v4177_v47  ;;  %v1210_v47 = vld [vmem:[%s8660_s2 + $0xf0] sm:$0xff] }
  0x74   : > { %945 = vmatpush.msra.mxu0 %v4170_v48  ;;  %983 = vmatpush.msra.mxu1 %v4171_v49  ;;  %v1242_v48 = vld [vmem:[%s8660_s2 + $0x1f0] sm:$0xff]  ;;  %v1208_v49 = vld [vmem:[%s8660_s2 + $0xe0] sm:$0xff] }
  0x75   : > { %1021 = vmatpush.msra.mxu2 %v4172_v50  ;;  %1059 = vmatpush.msra.mxu3 %v4173_v51  ;;  %v1240_v50 = vld [vmem:[%s8660_s2 + $0x1e0] sm:$0xff]  ;;  %v1206_v51 = vld [vmem:[%s8660_s2 + $0xd0] sm:$0xff] }
  0x76   : > { %4127 = vmatmul.msk.f32.gmra.mxu0 %vm516_vm1, %v5146_v45  ;;  %4134 = vmatmul.msk.f32.gmra.mxu1 %vm516_vm1, %v5146_v45 }
  0x77   : > { %4141 = vmatmul.msk.f32.gmra.mxu2 %vm516_vm1, %v5146_v45  ;;  %4148 = vmatmul.msk.f32.gmra.mxu3 %vm516_vm1, %v5146_v45 }
  0x78   : > { %946 = vmatpush.msra.mxu0 %v4166_v52  ;;  %984 = vmatpush.msra.mxu1 %v4167_v53  ;;  %v1238_v52 = vld [vmem:[%s8660_s2 + $0x1d0] sm:$0xff]  ;;  %v1204_v53 = vld [vmem:[%s8660_s2 + $0xc0] sm:$0xff] }
  0x79   : > { %1022 = vmatpush.msra.mxu2 %v4168_v54  ;;  %1060 = vmatpush.msra.mxu3 %v4169_v55  ;;  %v1236_v54 = vld [vmem:[%s8660_s2 + $0x1c0] sm:$0xff]  ;;  %v1274_v55 = vld [vmem:[%s8660_s2 + $0x2f0] sm:$0xff] }
  0x7a   : > { %947 = vmatpush.msra.mxu0 %v4162_v56  ;;  %985 = vmatpush.msra.mxu1 %v4163_v57 }
  0x7b   : > { %1023 = vmatpush.msra.mxu2 %v4164_v58  ;;  %1061 = vmatpush.msra.mxu3 %v4165_v60 }
  0x7c   : > { %948 = vmatpush.msra.mxu0 %v4158_v62  ;;  %986 = vmatpush.msra.mxu1 %v4159_v63  ;;  %v1202_v62 = vld [vmem:[%s8660_s2 + $0xb0] sm:$0xff] }
  0x7d   : > { %1024 = vmatpush.msra.mxu2 %v4160_v0  ;;  %1062 = vmatpush.msra.mxu3 %v4161_v1  ;;  %v1234_v63 = vld [vmem:[%s8660_s2 + $0x1b0] sm:$0xff]  ;;  %v1272_v0 = vld [vmem:[%s8660_s2 + $0x2e0] sm:$0xff] }
  0x7e   : > { %4128 = vmatmul.msk.f32.gmra.mxu0 %vm516_vm1, %v5188_v61  ;;  %4135 = vmatmul.msk.f32.gmra.mxu1 %vm516_vm1, %v5188_v61  ;;  %v1200_v1 = vld [vmem:[%s8660_s2 + $0xa0] sm:$0xff] }
  0x7f   : > { %4142 = vmatmul.msk.f32.gmra.mxu2 %vm516_vm1, %v5188_v61  ;;  %4149 = vmatmul.msk.f32.gmra.mxu3 %vm516_vm1, %v5188_v61  ;;  %v914_v61 = vrot.slane %v5278_v27, 2 }
  0x80   : > { %949 = vmatpush.msra.mxu0 %v4154_v2  ;;  %987 = vmatpush.msra.mxu1 %v4155_v3  ;;  %v1232_v2 = vld [vmem:[%s8660_s2 + $0x1a0] sm:$0xff]  ;;  %v1270_v3 = vld [vmem:[%s8660_s2 + $0x2d0] sm:$0xff] }
  0x81   : > { %1025 = vmatpush.msra.mxu2 %v4156_v4  ;;  %1063 = vmatpush.msra.mxu3 %v4157_v5  ;;  %v915_v17 = vsel %vm906_vm2, %v912_v44, %v914_v61  ;;  %v1198_v4 = vld [vmem:[%s8660_s2 + $0x90] sm:$0xff] }
  0x82   : > { %1306 = vmatpush.msrb.mxu0 %v1210_v47  ;;  %1344 = vmatpush.msrb.mxu1 %v1242_v48  ;;  %v1230_v5 = vld [vmem:[%s8660_s2 + $0x190] sm:$0xff] }
  0x83   : > { %1382 = vmatpush.msrb.mxu2 %v1274_v55  ;;  %v1262_v47 = vld [vmem:[%s8660_s2 + $0x290] sm:$0xff] }
  0x84   : > { %1307 = vmatpush.msrb.mxu0 %v1208_v49  ;;  %1345 = vmatpush.msrb.mxu1 %v1240_v50  ;;  %v1190_v48 = vld [vmem:[%s8660_s2 + $0x50] sm:$0xff]  ;;  %v1260_v50 = vld [vmem:[%s8660_s2 + $0x280] sm:$0xff] }
  0x85   : > { %1383 = vmatpush.msrb.mxu2 %v1272_v0  ;;  %v1222_v49 = vld [vmem:[%s8660_s2 + $0x150] sm:$0xff] }
  0x86   : > { %4129 = vmatmul.msk.f32.gmra.mxu0 %vm516_vm1, %v5233_v12  ;;  %4136 = vmatmul.msk.f32.gmra.mxu1 %vm516_vm1, %v5233_v12  ;;  %v1186_v0 = vld [vmem:[%s8660_s2 + $0x30] sm:$0xff] }
  0x87   : > { %4143 = vmatmul.msk.f32.gmra.mxu2 %vm516_vm1, %v5233_v12  ;;  %4150 = vmatmul.msk.f32.gmra.mxu3 %vm516_vm1, %v5233_v12 }
  0x88   : > { %1308 = vmatpush.msrb.mxu0 %v1206_v51  ;;  %1346 = vmatpush.msrb.mxu1 %v1238_v52  ;;  %v1188_v51 = vld [vmem:[%s8660_s2 + $0x40] sm:$0xff] }
  0x89   : > { %1384 = vmatpush.msrb.mxu2 %v1270_v3  ;;  %v1220_v52 = vld [vmem:[%s8660_s2 + $0x140] sm:$0xff] }
  0x8a   : > { %1309 = vmatpush.msrb.mxu0 %v1204_v53  ;;  %1347 = vmatpush.msrb.mxu1 %v1236_v54  ;;  %v1258_v53 = vld [vmem:[%s8660_s2 + $0x270] sm:$0xff]  ;;  %v1184_v3 = vld [vmem:[%s8660_s2 + $0x20] sm:$0xff] }
  0x8b   : > { %1385 = vmatpush.msrb.mxu2 %v1268_v6  ;;  %v1182_v6 = vld [vmem:[%s8660_s2 + $0x10] sm:$0xff] }
  0x8c   : > { %1310 = vmatpush.msrb.mxu0 %v1202_v62  ;;  %1348 = vmatpush.msrb.mxu1 %v1234_v63 }
  0x8d   : > { %1386 = vmatpush.msrb.mxu2 %v1266_v9  ;;  %v1282_v9 = vld [vmem:[%s8660_s2 + $0x330] sm:$0xff] }
  0x8e   : > { %4130 = vmatmul.msk.f32.gmra.mxu0 %vm516_vm1, %v5278_v27  ;;  %4137 = vmatmul.msk.f32.gmra.mxu1 %vm516_vm1, %v5278_v27 }
  0x8f   : > { %4144 = vmatmul.msk.f32.gmra.mxu2 %vm516_vm1, %v5278_v27  ;;  %4151 = vmatmul.msk.f32.gmra.mxu3 %vm516_vm1, %v5278_v27  ;;  %v916_v27 = vrot.slane %v5323_v42, 2 }
  0x90   : > { %1311 = vmatpush.msrb.mxu0 %v1200_v1  ;;  %1349 = vmatpush.msrb.mxu1 %v1232_v2  ;;  %v1218_v1 = vld [vmem:[%s8660_s2 + $0x130] sm:$0xff]  ;;  %v1256_v2 = vld [vmem:[%s8660_s2 + $0x260] sm:$0xff] }
  0x91   : > { %v917_v22 = vsel %vm906_vm2, %v914_v61, %v916_v27  ;;  %1432 = vmatpush.msrb.mxu3 %v1282_v9  ;;  %v1114_v9 = vld [vmem:[%s8667_s9] sm:$0xf] }
  0x92   : > { %1312 = vmatpush.msrb.mxu0 %v1198_v4  ;;  %1350 = vmatpush.msrb.mxu1 %v1230_v5  ;;  %v1216_v4 = vld [vmem:[%s8660_s2 + $0x120] sm:$0xff]  ;;  %v1254_v5 = vld [vmem:[%s8660_s2 + $0x250] sm:$0xff] }
  0x94   : > { %1313 = vmatpush.msrb.mxu0 %v1196_v7  ;;  %v1214_v7 = vld [vmem:[%s8660_s2 + $0x110] sm:$0xff] }
  0x96   : > { %4131 = vmatmul.msk.f32.gmra.mxu0 %vm516_vm1, %v5323_v42  ;;  %4138 = vmatmul.msk.f32.gmra.mxu1 %vm516_vm1, %v5323_v42 }
  0x97   : > { %4145 = vmatmul.msk.f32.gmra.mxu2 %vm516_vm1, %v5323_v42  ;;  %4152 = vmatmul.msk.f32.gmra.mxu3 %vm516_vm1, %v5323_v42  ;;  %v918_v42 = vrot.slane %v5368_v59, 2 }
  0x99   : > { %v919_v28 = vsel %vm906_vm2, %v916_v27, %v918_v42  ;;  %v1226_v27 = vld [vmem:[%s8660_s2 + $0x170] sm:$0xff] }
  0x9e   : > { %4132 = vmatmul.msk.f32.gmra.mxu0 %vm516_vm1, %v5368_v59  ;;  %4139 = vmatmul.msk.f32.gmra.mxu1 %vm516_vm1, %v5368_v59 }
  0x9f   : > { %4146 = vmatmul.msk.f32.gmra.mxu2 %vm516_vm1, %v5368_v59  ;;  %4153 = vmatmul.msk.f32.gmra.mxu3 %vm516_vm1, %v5368_v59 }
  0xa6   : > { %4210 = vmatmul.msk.f32.vlgmr.msra.gmra.mxu0 %vm516_vm1, %v909_v8  ;;  %4217 = vmatmul.msk.f32.vlgmr.msra.gmra.mxu1 %vm516_vm1, %v909_v8 }
  0xa7   : > { %4224 = vmatmul.msk.f32.vlgmr.msra.gmra.mxu2 %vm516_vm1, %v909_v8  ;;  %4231 = vmatmul.msk.f32.vlgmr.msra.gmra.mxu3 %vm516_vm1, %v909_v8  ;;  %v1228_v8 = vld [vmem:[%s8660_s2 + $0x180] sm:$0xff] }
  0xa8   : > { %1351 = vmatpush.msrb.mxu1 %v1228_v8  ;;  %v1252_v8 = vld [vmem:[%s8660_s2 + $0x240] sm:$0xff] }
  0xaa   : > { %1352 = vmatpush.msrb.mxu1 %v1226_v27  ;;  %v1212_v27 = vld [vmem:[%s8660_s2 + $0x100] sm:$0xff] }
  0xae   : > { %4211 = vmatmul.msk.f32.gmra.mxu0 %vm516_vm1, %v911_v10  ;;  %4218 = vmatmul.msk.f32.gmra.mxu1 %vm516_vm1, %v911_v10 }
  0xaf   : > { %4225 = vmatmul.msk.f32.gmra.mxu2 %vm516_vm1, %v911_v10  ;;  %4232 = vmatmul.msk.f32.gmra.mxu3 %vm516_vm1, %v911_v10 }
  0xb3   : > { %v5646_v45 = vpop.f32.mrf.mxu0  ;;  %v5648_v11 = vpop.f32.mrf.mxu1 }
  0xb6   : > { %4212 = vmatmul.msk.f32.gmra.mxu0 %vm516_vm1, %v913_v13  ;;  %4219 = vmatmul.msk.f32.gmra.mxu1 %vm516_vm1, %v913_v13 }
  0xb7   : > { %4226 = vmatmul.msk.f32.gmra.mxu2 %vm516_vm1, %v913_v13  ;;  %4233 = vmatmul.msk.f32.gmra.mxu3 %vm516_vm1, %v913_v13 }
  0xba   : > { %v5656_v14 = vpop.f32.mrf.mxu2  ;;  %v5658_v15 = vpop.f32.mrf.mxu3 }
  0xbb   : > { %v5660_v12 = vpop.f32.mrf.mxu0  ;;  %v5662_v16 = vpop.f32.mrf.mxu1 }
  0xbe   : > { %4213 = vmatmul.msk.f32.gmra.mxu0 %vm516_vm1, %v915_v17  ;;  %4220 = vmatmul.msk.f32.gmra.mxu1 %vm516_vm1, %v915_v17 }
  0xbf   : > { %4227 = vmatmul.msk.f32.gmra.mxu2 %vm516_vm1, %v915_v17  ;;  %4234 = vmatmul.msk.f32.gmra.mxu3 %vm516_vm1, %v915_v17  ;;  %v1194_v17 = vld [vmem:[%s8660_s2 + $0x70] sm:$0xff] }
  0xc0   : > { %1314 = vmatpush.msrb.mxu0 %v1194_v17  ;;  %v1180_v17 = vld [vmem:[%s8660_s2] sm:$0xff] }
  0xc2   : > { %v5670_v18 = vpop.f32.mrf.mxu2  ;;  %v5672_v19 = vpop.f32.mrf.mxu3 }
  0xc3   : > { %v5674_v20 = vpop.f32.mrf.mxu0  ;;  %v5676_v21 = vpop.f32.mrf.mxu1 }
  0xc6   : > { %4214 = vmatmul.msk.f32.gmra.mxu0 %vm516_vm1, %v917_v22  ;;  %4221 = vmatmul.msk.f32.gmra.mxu1 %vm516_vm1, %v917_v22 }
  0xc7   : > { %4228 = vmatmul.msk.f32.gmra.mxu2 %vm516_vm1, %v917_v22  ;;  %4235 = vmatmul.msk.f32.gmra.mxu3 %vm516_vm1, %v917_v22  ;;  %v1264_v22 = vld [vmem:[%s8660_s2 + $0x2a0] sm:$0xff] }
  0xc8   : > { %1387 = vmatpush.msrb.mxu2 %v1264_v22  ;;  %v1250_v22 = vld [vmem:[%s8660_s2 + $0x230] sm:$0xff] }
  0xca   : > { %v5684_v23 = vpop.f32.mrf.mxu2  ;;  %v5686_v24 = vpop.f32.mrf.mxu3  ;;  %1388 = vmatpush.msrb.mxu2 %v1262_v47 }
  0xcb   : > { %v5688_v25 = vpop.f32.mrf.mxu0  ;;  %v5690_v26 = vpop.f32.mrf.mxu1 }
  0xcc   : > { %1389 = vmatpush.msrb.mxu2 %v1260_v50  ;;  %v1280_v50 = vld [vmem:[%s8660_s2 + $0x320] sm:$0xff] }
  0xcd   : > { %1433 = vmatpush.msrb.mxu3 %v1280_v50  ;;  %v5948_v50 = vperm.slane %v1114_v9, 0 }
  0xce   : > { %4215 = vmatmul.msk.f32.gmra.mxu0 %vm516_vm1, %v919_v28  ;;  %4222 = vmatmul.msk.f32.gmra.mxu1 %vm516_vm1, %v919_v28 }
  0xcf   : > { %4229 = vmatmul.msk.f32.gmra.mxu2 %vm516_vm1, %v919_v28  ;;  %4236 = vmatmul.msk.f32.gmra.mxu3 %vm516_vm1, %v919_v28  ;;  %v1224_v28 = vld [vmem:[%s8660_s2 + $0x160] sm:$0xff] }
  0xd0   : > { %1353 = vmatpush.msrb.mxu1 %v1224_v28  ;;  %1390 = vmatpush.msrb.mxu2 %v1258_v53  ;;  %v1244_v53 = vld [vmem:[%s8660_s2 + $0x200] sm:$0xff] }
  0xd2   : > { %v5697_v29 = vpop.f32.mrf.mxu2  ;;  %v5699_v59 = vpop.f32.mrf.mxu3  ;;  %1354 = vmatpush.msrb.mxu1 %v1222_v49  ;;  %1391 = vmatpush.msrb.mxu2 %v1256_v2  ;;  %v1248_v49 = vld [vmem:[%s8660_s2 + $0x220] sm:$0xff] }
  0xd3   : > { %v5701_v30 = vpop.f32.mrf.mxu0  ;;  %v5703_v31 = vpop.f32.mrf.mxu1 }
  0xd4   : > { %1355 = vmatpush.msrb.mxu1 %v1220_v52  ;;  %1392 = vmatpush.msrb.mxu2 %v1254_v5  ;;  %v1278_v52 = vld [vmem:[%s8660_s2 + $0x310] sm:$0xff] }
  0xd5   : > { %1434 = vmatpush.msrb.mxu3 %v1278_v52 }
  0xd6   : > { %4216 = vmatmul.msk.f32.gmra.mxu0 %vm516_vm1, %v918_v42  ;;  %4223 = vmatmul.msk.f32.gmra.mxu1 %vm516_vm1, %v918_v42 }
  0xd7   : > { %4230 = vmatmul.msk.f32.gmra.mxu2 %vm516_vm1, %v918_v42  ;;  %4237 = vmatmul.msk.f32.gmra.mxu3 %vm516_vm1, %v918_v42  ;;  %v1192_v42 = vld [vmem:[%s8660_s2 + $0x60] sm:$0xff] }
  0xd8   : > { %1315 = vmatpush.msrb.mxu0 %v1192_v42  ;;  %1356 = vmatpush.msrb.mxu1 %v1218_v1 }
  0xd9   : > { %1393 = vmatpush.msrb.mxu2 %v1252_v8 }
  0xda   : > { %v5709_v32 = vpop.f32.mrf.mxu2  ;;  %v5711_v33 = vpop.f32.mrf.mxu3  ;;  %1316 = vmatpush.msrb.mxu0 %v1190_v48  ;;  %1357 = vmatpush.msrb.mxu1 %v1216_v4 }
  0xdb   : > { %v5713_v34 = vpop.f32.mrf.mxu0  ;;  %v5715_v35 = vpop.f32.mrf.mxu1  ;;  %1394 = vmatpush.msrb.mxu2 %v1250_v22 }
  0xdc   : > { %1317 = vmatpush.msrb.mxu0 %v1188_v51  ;;  %1358 = vmatpush.msrb.mxu1 %v1214_v7  ;;  %v1246_v51 = vld [vmem:[%s8660_s2 + $0x210] sm:$0xff] }
  0xdd   : > { %1395 = vmatpush.msrb.mxu2 %v1248_v49 }
  0xde   : > { %1318 = vmatpush.msrb.mxu0 %v1186_v0  ;;  %1359 = vmatpush.msrb.mxu1 %v1212_v27  ;;  %v1276_v0 = vld [vmem:[%s8660_s2 + $0x300] sm:$0xff] }
  0xdf   : > { %1396 = vmatpush.msrb.mxu2 %v1246_v51  ;;  %1435 = vmatpush.msrb.mxu3 %v1276_v0  ;;  %v5950_v51 = vperm.slane %v1114_v9, 1  ;;  %v1211_v0 = vld [vmem:[%s8660_s2 + $0xf8] sm:$0xff] }
  0xe0   : > { %1319 = vmatpush.msrb.mxu0 %v1184_v3 }
  0xe1   : > { %1397 = vmatpush.msrb.mxu2 %v1244_v53 }
  0xe2   : > { %v5717_v36 = vpop.f32.mrf.mxu2  ;;  %v5719_v37 = vpop.f32.mrf.mxu3  ;;  %1320 = vmatpush.msrb.mxu0 %v1182_v6 }
  0xe3   : > { %v5721_v38 = vpop.f32.mrf.mxu0  ;;  %v5723_v39 = vpop.f32.mrf.mxu1 }
  0xe4   : > { %1321 = vmatpush.msrb.mxu0 %v1180_v17 }
  0xe6   : > { %1458 = vmatpush.msra.mxu0 %v1211_v0 }
  0xea   : > { %v5725_v40 = vpop.f32.mrf.mxu2  ;;  %v5727_v41 = vpop.f32.mrf.mxu3 }
  0xeb   : > { %8675 = vst [vmem:[#allocation8_spill] sm:$0xff] %v5725_v40  ;;  %v5729_v43 = vpop.f32.mrf.mxu0  ;;  %v5731_v46 = vpop.f32.mrf.mxu1  ;;  %v1203_v40 = vld [vmem:[%s8660_s2 + $0xb8] sm:$0xff] }
  0xec   : > { %8676 = vst [vmem:[#allocation9_spill] sm:$0xff] %v5727_v41  ;;  %v715_v17 = vadd.f32 %v5729_v43, %v5646_v45  ;;  %v753_v27 = vadd.f32 %v5731_v46, %v5648_v11  ;;  %v1243_v45 = vld [vmem:[%s8660_s2 + $0x1f8] sm:$0xff]  ;;  %v1209_v46 = vld [vmem:[%s8660_s2 + $0xe8] sm:$0xff] }
  0xed   : > { %1496 = vmatpush.msra.mxu1 %v1243_v45  ;;  %1459 = vmatpush.msra.mxu0 %v1209_v46  ;;  %v5980_v45 = vperm.slane %v1114_v9, 2 }
  0xf2   : > { %v5760_v56 = vpop.f32.mrf.mxu2  ;;  %v5762_v57 = vpop.f32.mrf.mxu3 }
  0xf3   : > { %v5764_v58 = vpop.f32.mrf.mxu0  ;;  %v5766_v60 = vpop.f32.mrf.mxu1  ;;  %v791_v0 = vadd.f32 %v5760_v56, %v5656_v14 }
  0xf4   : > { %v718_v14 = vadd.f32 %v5764_v58, %v5660_v12  ;;  %v1235_v12 = vld [vmem:[%s8660_s2 + $0x1b8] sm:$0xff] }
  0xfa   : > { %v5804_v10 = vpop.f32.mrf.mxu2  ;;  %v5806_v44 = vpop.f32.mrf.mxu3 }
  0xfb   : > { %v5808_v13 = vpop.f32.mrf.mxu0  ;;  %v5810_v61 = vpop.f32.mrf.mxu1 }
 0x102   : > { %v5848_v54 = vpop.f32.mrf.mxu2  ;;  %v5850_v55 = vpop.f32.mrf.mxu3 }
 0x103   : > { %v5852_v62 = vpop.f32.mrf.mxu0  ;;  %v5854_v63 = vpop.f32.mrf.mxu1 }
 0x10a   : > { %v5895_v42 = vpop.f32.mrf.mxu2  ;;  %v5897_v28 = vpop.f32.mrf.mxu3 }
 0x10b   : > { %v5899_v47 = vpop.f32.mrf.mxu0  ;;  %v5901_v48 = vpop.f32.mrf.mxu1 }
 0x112   : > { %v5921_v1 = vpop.f32.mrf.mxu2  ;;  %v5923_v2 = vpop.f32.mrf.mxu3 }
 0x113   : > { %v5925_v3 = vpop.f32.mrf.mxu0  ;;  %v5927_v4 = vpop.f32.mrf.mxu1 }
 0x11a   : > { %v5929_v5 = vpop.f32.mrf.mxu2  ;;  %v5931_v6 = vpop.f32.mrf.mxu3 }
 0x11b   : > { %v5933_v7 = vpop.f32.mrf.mxu0  ;;  %v5935_v8 = vpop.f32.mrf.mxu1 }
 0x122   : > { %v5944_v22 = vpop.f32.mrf.mxu2  ;;  %v5946_v49 = vpop.f32.mrf.mxu3 }
 0x123   : > { %8677 = vst [vmem:[#allocation10_spill] sm:$0xff] %v5944_v22  ;;  %v951_v52 = vpop.f32.mrf.mxu0  ;;  %v989_v53 = vpop.f32.mrf.mxu1 }
 0x124   : > { %8678 = vst [vmem:[#allocation11_spill] sm:$0xff] %v5946_v49  ;;  %v1086_v43 = vadd.f32 %v951_v52, %v715_v17  ;;  %v1087_v11 = vadd.f32 %v989_v53, %v753_v27  ;;  %v1241_v49 = vld [vmem:[%s8660_s2 + $0x1e8] sm:$0xff]  ;;  %v1207_v17 = vld [vmem:[%s8660_s2 + $0xd8] sm:$0xff] }
 0x125   : > { %1497 = vmatpush.msra.mxu1 %v1241_v49  ;;  %v1239_v27 = vld [vmem:[%s8660_s2 + $0x1d8] sm:$0xff]  ;;  %1460 = vmatpush.msra.mxu0 %v1207_v17  ;;  %v829_v49 = vadd.f32 %v5762_v57, %v5658_v15  ;;  %v756_v15 = vadd.f32 %v5766_v60, %v5662_v16  ;;  %v1273_v16 = vld [vmem:[%s8660_s2 + $0x2e8] sm:$0xff] }
 0x126   : > { %v1124_v41 = vadd.f32 %v5948_v50, %v1086_v43  ;;  %v1125_v22 = vadd.f32 %v5950_v51, %v1087_v11  ;;  %v5982_v43 = vperm.slane %v1114_v9, 3  ;;  %v1205_v11 = vld [vmem:[%s8660_s2 + $0xc8] sm:$0xff] }
 0x127   : > { %1498 = vmatpush.msra.mxu1 %v1239_v27  ;;  %1461 = vmatpush.msra.mxu0 %v1205_v11  ;;  %v1201_v11 = vld [vmem:[%s8660_s2 + $0xa8] sm:$0xff] }
 0x128   : > { %v5972_v52 = vmax.f32 %v1124_v41, 0.0  ;;  %v5974_v53 = vmax.f32 %v1125_v22, 0.0  ;;  %v1237_v41 = vld [vmem:[%s8660_s2 + $0x1c8] sm:$0xff]  ;;  %v1275_v22 = vld [vmem:[%s8660_s2 + $0x2f8] sm:$0xff] }
 0x129   : > { %1499 = vmatpush.msra.mxu1 %v1237_v41  ;;  %1534 = vmatpush.msra.mxu2 %v1275_v22  ;;  %v1233_v41 = vld [vmem:[%s8660_s2 + $0x1a8] sm:$0xff] }
 0x12a   : > { %v1027_v56 = vpop.f32.mrf.mxu2  ;;  %v1065_v57 = vpop.f32.mrf.mxu3  ;;  %1322 = vmatmul.f32.vlgmr.msrb.gmra.mxu0 %v5972_v52  ;;  %1360 = vmatmul.f32.vlgmr.msrb.gmra.mxu1 %v5974_v53 }
 0x12b   : > { %v1088_v9 = vadd.f32 %v1027_v56, %v791_v0  ;;  %v1089_v46 = vadd.f32 %v1065_v57, %v829_v49  ;;  %v954_v17 = vpop.f32.mrf.mxu0  ;;  %v992_v27 = vpop.f32.mrf.mxu1  ;;  %1462 = vmatpush.msra.mxu0 %v1203_v40  ;;  %1500 = vmatpush.msra.mxu1 %v1235_v12  ;;  %v832_v12 = vadd.f32 %v5806_v44, %v5672_v19  ;;  %v1197_v19 = vld [vmem:[%s8660_s2 + $0x88] sm:$0xff] }
 0x12c   : > { %v1090_v58 = vadd.f32 %v954_v17, %v718_v14  ;;  %v1091_v60 = vadd.f32 %v992_v27, %v756_v15  ;;  %v1271_v14 = vld [vmem:[%s8660_s2 + $0x2d8] sm:$0xff]  ;;  %1535 = vmatpush.msra.mxu2 %v1273_v16  ;;  %v794_v27 = vadd.f32 %v5804_v10, %v5670_v18  ;;  %v1269_v16 = vld [vmem:[%s8660_s2 + $0x2c8] sm:$0xff] }
 0x12d   : > { %v1126_v0 = vadd.f32 %v5980_v45, %v1088_v9  ;;  %v1127_v49 = vadd.f32 %v5982_v43, %v1089_v46  ;;  %1463 = vmatpush.msra.mxu0 %v1201_v11  ;;  %1501 = vmatpush.msra.mxu1 %v1233_v41  ;;  %v1199_v46 = vld [vmem:[%s8660_s2 + $0x98] sm:$0xff]  ;;  %v1229_v10 = vld [vmem:[%s8660_s2 + $0x188] sm:$0xff] }
 0x12e   : > { %v1128_v22 = vadd.f32 %v5948_v50, %v1090_v58  ;;  %v1129_v15 = vadd.f32 %v5950_v51, %v1091_v60  ;;  %1536 = vmatpush.msra.mxu2 %v1271_v14  ;;  %v1231_v17 = vld [vmem:[%s8660_s2 + $0x198] sm:$0xff]  ;;  %v721_v58 = vadd.f32 %v5808_v13, %v5674_v20  ;;  %v759_v60 = vadd.f32 %v5810_v61, %v5676_v21 }
 0x12f   : > { %v6021_v40 = vmax.f32 %v1126_v0, 0.0  ;;  %v6023_v56 = vmax.f32 %v1127_v49, 0.0  ;;  %1464 = vmatpush.msra.mxu0 %v1199_v46  ;;  %1502 = vmatpush.msra.mxu1 %v1231_v17  ;;  %v1267_v21 = vld [vmem:[%s8660_s2 + $0x2b8] sm:$0xff]  ;;  %v1265_v46 = vld [vmem:[%s8660_s2 + $0x2a8] sm:$0xff] }
 0x130   : > { %v6025_v57 = vmax.f32 %v1128_v22, 0.0  ;;  %v6027_v9 = vmax.f32 %v1129_v15, 0.0  ;;  %1537 = vmatpush.msra.mxu2 %v1269_v16  ;;  %v1195_v41 = vld [vmem:[%s8660_s2 + $0x78] sm:$0xff] }
 0x131   : > { %1398 = vmatmul.f32.vlgmr.msrb.gmra.mxu2 %v6021_v40  ;;  %4238 = vmatmul.msk.f32.vlgmr.msrb.gmra.mxu3 %vm1284_vm3, %v6023_v56  ;;  %v1227_v14 = vld [vmem:[%s8660_s2 + $0x178] sm:$0xff] }
 0x132   : > { %v1030_v0 = vpop.f32.mrf.mxu2  ;;  %v1068_v18 = vpop.f32.mrf.mxu3  ;;  %1325 = vmatmul.f32.gmra.mxu0 %v6025_v57  ;;  %1363 = vmatmul.f32.gmra.mxu1 %v6027_v9 }
 0x133   : > { %v1092_v44 = vadd.f32 %v1030_v0, %v794_v27  ;;  %v1093_v49 = vadd.f32 %v1068_v18, %v832_v12  ;;  %v957_v20 = vpop.f32.mrf.mxu0  ;;  %v995_v13 = vpop.f32.mrf.mxu1  ;;  %1465 = vmatpush.msra.mxu0 %v1197_v19  ;;  %1503 = vmatpush.msra.mxu1 %v1229_v10  ;;  %v1193_v0 = vld [vmem:[%s8660_s2 + $0x68] sm:$0xff]  ;;  %v797_v19 = vadd.f32 %v5848_v54, %v5684_v23  ;;  %v1223_v54 = vld [vmem:[%s8660_s2 + $0x158] sm:$0xff] }
 0x134   : > { %v1094_v61 = vadd.f32 %v957_v20, %v721_v58  ;;  %v1095_v11 = vadd.f32 %v995_v13, %v759_v60  ;;  %1538 = vmatpush.msra.mxu2 %v1267_v21  ;;  %v1225_v18 = vld [vmem:[%s8660_s2 + $0x168] sm:$0xff]  ;;  %v835_v10 = vadd.f32 %v5850_v55, %v5686_v24  ;;  %v762_v20 = vadd.f32 %v5854_v63, %v5690_v26  ;;  %v1191_v24 = vld [vmem:[%s8660_s2 + $0x58] sm:$0xff] }
 0x135   : > { %v1130_v22 = vadd.f32 %v5980_v45, %v1092_v44  ;;  %v1131_v15 = vadd.f32 %v5982_v43, %v1093_v49  ;;  %1466 = vmatpush.msra.mxu0 %v1195_v41  ;;  %1504 = vmatpush.msra.mxu1 %v1227_v14  ;;  %v1263_v44 = vld [vmem:[%s8660_s2 + $0x298] sm:$0xff]  ;;  %v724_v49 = vadd.f32 %v5852_v62, %v5688_v25  ;;  %v1261_v26 = vld [vmem:[%s8660_s2 + $0x288] sm:$0xff] }
 0x136   : > { %v1132_v17 = vadd.f32 %v5948_v50, %v1094_v61  ;;  %v1133_v27 = vadd.f32 %v5950_v51, %v1095_v11  ;;  %1539 = vmatpush.msra.mxu2 %v1265_v46  ;;  %v1189_v11 = vld [vmem:[%s8660_s2 + $0x48] sm:$0xff] }
 0x137   : > { %v6073_v12 = vmax.f32 %v1130_v22, 0.0  ;;  %v6075_v16 = vmax.f32 %v1131_v15, 0.0  ;;  %1467 = vmatpush.msra.mxu0 %v1193_v0  ;;  %1505 = vmatpush.msra.mxu1 %v1225_v18  ;;  %v1221_v41 = vld [vmem:[%s8660_s2 + $0x148] sm:$0xff]  ;;  %v1259_v15 = vld [vmem:[%s8660_s2 + $0x278] sm:$0xff] }
 0x138   : > { %v6077_v58 = vmax.f32 %v1132_v17, 0.0  ;;  %v6079_v60 = vmax.f32 %v1133_v27, 0.0  ;;  %1540 = vmatpush.msra.mxu2 %v1263_v44  ;;  %v1283_v18 = vld [vmem:[%s8660_s2 + $0x338] sm:$0xff] }
 0x139   : > { %1401 = vmatmul.f32.gmra.mxu2 %v6073_v12  ;;  %4239 = vmatmul.msk.f32.gmra.mxu3 %vm1284_vm3, %v6075_v16  ;;  %v1187_v44 = vld [vmem:[%s8660_s2 + $0x38] sm:$0xff] }
 0x13a   : > { %v1033_v13 = vpop.f32.mrf.mxu2  ;;  %v1071_v23 = vpop.f32.mrf.mxu3  ;;  %1328 = vmatmul.f32.gmra.mxu0 %v6077_v58  ;;  %1366 = vmatmul.f32.gmra.mxu1 %v6079_v60 }
 0x13b   : > { %v1096_v55 = vadd.f32 %v1033_v13, %v797_v19  ;;  %v1097_v21 = vadd.f32 %v1071_v23, %v835_v10  ;;  %v960_v25 = vpop.f32.mrf.mxu0  ;;  %v998_v62 = vpop.f32.mrf.mxu1  ;;  %1468 = vmatpush.msra.mxu0 %v1191_v24  ;;  %1506 = vmatpush.msra.mxu1 %v1223_v54  ;;  %v838_v13 = vadd.f32 %v5897_v28, %v5699_v59  ;;  %v1257_v23 = vld [vmem:[%s8660_s2 + $0x268] sm:$0xff] }
 0x13c   : > { %v1098_v63 = vadd.f32 %v960_v25, %v724_v49  ;;  %v1099_v61 = vadd.f32 %v998_v62, %v762_v20  ;;  %1541 = vmatpush.msra.mxu2 %v1261_v26  ;;  %v1219_v49 = vld [vmem:[%s8660_s2 + $0x138] sm:$0xff]  ;;  %1584 = vmatpush.msra.mxu3 %v1283_v18  ;;  %v800_v20 = vadd.f32 %v5895_v42, %v5697_v29  ;;  %v1185_v59 = vld [vmem:[%s8660_s2 + $0x28] sm:$0xff] }
 0x13d   : > { %v1134_v14 = vadd.f32 %v5980_v45, %v1096_v55  ;;  %v1135_v22 = vadd.f32 %v5982_v43, %v1097_v21  ;;  %1469 = vmatpush.msra.mxu0 %v1189_v11  ;;  %1507 = vmatpush.msra.mxu1 %v1221_v41  ;;  %v727_v24 = vadd.f32 %v5899_v47, %v5701_v30  ;;  %v1217_v42 = vld [vmem:[%s8660_s2 + $0x128] sm:$0xff]  ;;  %v1255_v21 = vld [vmem:[%s8660_s2 + $0x258] sm:$0xff] }
 0x13e   : > { %v1136_v46 = vadd.f32 %v5948_v50, %v1098_v63  ;;  %v1137_v17 = vadd.f32 %v5950_v51, %v1099_v61  ;;  %1542 = vmatpush.msra.mxu2 %v1259_v15  ;;  %v765_v54 = vadd.f32 %v5901_v48, %v5703_v31  ;;  %v1281_v30 = vld [vmem:[%s8660_s2 + $0x328] sm:$0xff]  ;;  %v1279_v25 = vld [vmem:[%s8660_s2 + $0x318] sm:$0xff] }
 0x13f   : > { %v6125_v27 = vmax.f32 %v1134_v14, 0.0  ;;  %v6127_v0 = vmax.f32 %v1135_v22, 0.0  ;;  %1470 = vmatpush.msra.mxu0 %v1187_v44  ;;  %1508 = vmatpush.msra.mxu1 %v1219_v49  ;;  %v1183_v63 = vld [vmem:[%s8660_s2 + $0x18] sm:$0xff]  ;;  %v1253_v14 = vld [vmem:[%s8660_s2 + $0x248] sm:$0xff] }
 0x140   : > { %v6132_v19 = vmax.f32 %v1136_v46, 0.0  ;;  %v6134_v10 = vmax.f32 %v1137_v17, 0.0  ;;  %1543 = vmatpush.msra.mxu2 %v1257_v23  ;;  %v1215_v61 = vld [vmem:[%s8660_s2 + $0x118] sm:$0xff]  ;;  %1585 = vmatpush.msra.mxu3 %v1281_v30  ;;  %v1277_v22 = vld [vmem:[%s8660_s2 + $0x308] sm:$0xff]  ;;  %v803_v23 = vadd.f32 %v5921_v1, %v5709_v32 }
 0x141   : > { %1404 = vmatmul.f32.gmra.mxu2 %v6125_v27  ;;  %4240 = vmatmul.msk.f32.gmra.mxu3 %vm1284_vm3, %v6127_v0  ;;  %v1249_v30 = vld [vmem:[%s8660_s2 + $0x228] sm:$0xff] }
 0x142   : > { %v1036_v55 = vpop.f32.mrf.mxu2  ;;  %v1074_v29 = vpop.f32.mrf.mxu3  ;;  %1331 = vmatmul.f32.gmra.mxu0 %v6132_v19  ;;  %1369 = vmatmul.f32.gmra.mxu1 %v6134_v10 }
 0x143   : > { %v1100_v28 = vadd.f32 %v1036_v55, %v800_v20  ;;  %v1101_v31 = vadd.f32 %v1074_v29, %v838_v13  ;;  %v963_v47 = vpop.f32.mrf.mxu0  ;;  %v1001_v48 = vpop.f32.mrf.mxu1  ;;  %1471 = vmatpush.msra.mxu0 %v1185_v59  ;;  %1509 = vmatpush.msra.mxu1 %v1217_v42  ;;  %v1181_v20 = vld [vmem:[%s8660_s2 + $0x8] sm:$0xff]  ;;  %v730_v55 = vadd.f32 %v5925_v3, %v5713_v34 }
 0x144   : > { %v1102_v62 = vadd.f32 %v963_v47, %v727_v24  ;;  %v1103_v26 = vadd.f32 %v1001_v48, %v765_v54  ;;  %1544 = vmatpush.msra.mxu2 %v1255_v21  ;;  %1586 = vmatpush.msra.mxu3 %v1279_v25  ;;  %v1213_v13 = vld [vmem:[%s8660_s2 + $0x108] sm:$0xff]  ;;  %v841_v24 = vadd.f32 %v5923_v2, %v5711_v33  ;;  %v1251_v54 = vld [vmem:[%s8660_s2 + $0x238] sm:$0xff] }
 0x145   : > { %v1138_v11 = vadd.f32 %v5980_v45, %v1100_v28  ;;  %v1139_v41 = vadd.f32 %v5982_v43, %v1101_v31  ;;  %1472 = vmatpush.msra.mxu0 %v1183_v63  ;;  %1510 = vmatpush.msra.mxu1 %v1215_v61  ;;  %v768_v29 = vadd.f32 %v5927_v4, %v5715_v35  ;;  %v1247_v28 = vld [vmem:[%s8660_s2 + $0x218] sm:$0xff] }
 0x146   : > { %v1140_v15 = vadd.f32 %v5948_v50, %v1102_v62  ;;  %v1141_v46 = vadd.f32 %v5950_v51, %v1103_v26  ;;  %1545 = vmatpush.msra.mxu2 %v1253_v14  ;;  %1587 = vmatpush.msra.mxu3 %v1277_v22  ;;  %v1245_v26 = vld [vmem:[%s8660_s2 + $0x208] sm:$0xff]  ;;  %v806_v63 = vadd.f32 %v5929_v5, %v5717_v36 }
 0x147   : > { %v6189_v17 = vmax.f32 %v1138_v11, 0.0  ;;  %v6191_v18 = vmax.f32 %v1139_v41, 0.0  ;;  %1473 = vmatpush.msra.mxu0 %v1181_v20  ;;  %1511 = vmatpush.msra.mxu1 %v1213_v13  ;;  %v844_v61 = vadd.f32 %v5931_v6, %v5719_v37  ;;  %v733_v11 = vadd.f32 %v5933_v7, %v5721_v38 }
 0x148   : > { %v6193_v44 = vmax.f32 %v1140_v15, 0.0  ;;  %v6195_v49 = vmax.f32 %v1141_v46, 0.0  ;;  %1546 = vmatpush.msra.mxu2 %v1251_v54  ;;  %v771_v41 = vadd.f32 %v5935_v8, %v5723_v39  ;;  %v8679_v54 = vld [vmem:[#allocation8_spill] sm:$0xff] }
 0x149   : > { %1407 = vmatmul.f32.gmra.mxu2 %v6189_v17  ;;  %4241 = vmatmul.msk.f32.gmra.mxu3 %vm1284_vm3, %v6191_v18 }
 0x14a   : > { %v1039_v59 = vpop.f32.mrf.mxu2  ;;  %v1077_v32 = vpop.f32.mrf.mxu3  ;;  %1334 = vmatmul.f32.gmra.mxu0 %v6193_v44  ;;  %1372 = vmatmul.f32.gmra.mxu1 %v6195_v49 }
 0x14b   : > { %v1104_v33 = vadd.f32 %v1039_v59, %v803_v23  ;;  %v1105_v1 = vadd.f32 %v1077_v32, %v841_v24  ;;  %v966_v2 = vpop.f32.mrf.mxu0  ;;  %v1004_v42 = vpop.f32.mrf.mxu1  ;;  %1547 = vmatpush.msra.mxu2 %v1249_v30  ;;  %v8681_v59 = vld [vmem:[#allocation9_spill] sm:$0xff]  ;;  %v8682_v32 = vld [vmem:[#allocation11_spill] sm:$0xff] }
 0x14c   : > { %v1106_v34 = vadd.f32 %v966_v2, %v730_v55  ;;  %v1107_v3 = vadd.f32 %v1004_v42, %v768_v29  ;;  %v8680_v55 = vld [vmem:[#allocation10_spill] sm:$0xff]  ;;  %v4280_v42 = vld [vmem:[%s8660_s2 + $0x420] sm:$0xff] }
 0x14d   : > { %v1142_v35 = vadd.f32 %v5980_v45, %v1104_v33  ;;  %v1143_v4 = vadd.f32 %v5982_v43, %v1105_v1  ;;  %1548 = vmatpush.msra.mxu2 %v1247_v28  ;;  %v809_v29 = vadd.f32 %v8680_v55, %v8679_v54  ;;  %v847_v33 = vadd.f32 %v8682_v32, %v8681_v59  ;;  %v4282_v1 = vld [vmem:[%s8660_s2 + $0x430] sm:$0xff]  ;;  %v4264_v54 = vld [vmem:[%s8660_s2 + $0x3a0] sm:$0xff] }
 0x14e   : > { %v1144_v31 = vadd.f32 %v5948_v50, %v1106_v34  ;;  %v1145_v47 = vadd.f32 %v5950_v51, %v1107_v3  ;;  %v4314_v2 = vld [vmem:[%s8660_s2 + $0x530] sm:$0xff]  ;;  %1715 = vmatpush.msrb.mxu0 %v4282_v1  ;;  %v4312_v3 = vld [vmem:[%s8660_s2 + $0x520] sm:$0xff] }
 0x14f   : > { %v6229_v48 = vmax.f32 %v1142_v35, 0.0  ;;  %v6231_v21 = vmax.f32 %v1143_v4, 0.0  ;;  %1549 = vmatpush.msra.mxu2 %v1245_v26  ;;  %1753 = vmatpush.msrb.mxu1 %v4314_v2  ;;  %v4278_v35 = vld [vmem:[%s8660_s2 + $0x410] sm:$0xff]  ;;  %v4296_v55 = vld [vmem:[%s8660_s2 + $0x4a0] sm:$0xff] }
 0x150   : > { %v6233_v25 = vmax.f32 %v1144_v31, 0.0  ;;  %v6235_v62 = vmax.f32 %v1145_v47, 0.0  ;;  %v4310_v4 = vld [vmem:[%s8660_s2 + $0x510] sm:$0xff]  ;;  %1716 = vmatpush.msrb.mxu0 %v4280_v42  ;;  %v4292_v1 = vld [vmem:[%s8660_s2 + $0x480] sm:$0xff] }
 0x151   : > { %1410 = vmatmul.f32.gmra.mxu2 %v6229_v48  ;;  %4242 = vmatmul.msk.f32.gmra.mxu3 %vm1284_vm3, %v6231_v21  ;;  %v4262_v59 = vld [vmem:[%s8660_s2 + $0x390] sm:$0xff] }
 0x152   : > { %v1042_v14 = vpop.f32.mrf.mxu2  ;;  %v1080_v22 = vpop.f32.mrf.mxu3  ;;  %1337 = vmatmul.f32.gmra.mxu0 %v6233_v25  ;;  %1375 = vmatmul.f32.gmra.mxu1 %v6235_v62  ;;  %v4294_v32 = vld [vmem:[%s8660_s2 + $0x490] sm:$0xff] }
 0x153   : > { %v1108_v36 = vadd.f32 %v1042_v14, %v806_v63  ;;  %v1109_v5 = vadd.f32 %v1080_v22, %v844_v61  ;;  %v969_v37 = vpop.f32.mrf.mxu0  ;;  %v1007_v6 = vpop.f32.mrf.mxu1  ;;  %1754 = vmatpush.msrb.mxu1 %v4312_v3  ;;  %1717 = vmatpush.msrb.mxu0 %v4278_v35  ;;  %v4276_v63 = vld [vmem:[%s8660_s2 + $0x400] sm:$0xff]  ;;  %v4274_v61 = vld [vmem:[%s8660_s2 + $0x3f0] sm:$0xff] }
 0x154   : > { %v1110_v15 = vadd.f32 %v969_v37, %v733_v11  ;;  %v1111_v46 = vadd.f32 %v1007_v6, %v771_v41  ;;  %v4306_v11 = vld [vmem:[%s8660_s2 + $0x4f0] sm:$0xff]  ;;  %v4344_v41 = vld [vmem:[%s8660_s2 + $0x620] sm:$0xff] }
 0x155   : > { %v1146_v20 = vadd.f32 %v5980_v45, %v1108_v36  ;;  %v1147_v38 = vadd.f32 %v5982_v43, %v1109_v5  ;;  %1755 = vmatpush.msrb.mxu1 %v4310_v4  ;;  %1718 = vmatpush.msrb.mxu0 %v4276_v63  ;;  %v4272_v14 = vld [vmem:[%s8660_s2 + $0x3e0] sm:$0xff]  ;;  %v4342_v36 = vld [vmem:[%s8660_s2 + $0x610] sm:$0xff] }
 0x156   : > { %v1148_v7 = vadd.f32 %v5948_v50, %v1110_v15  ;;  %v1149_v39 = vadd.f32 %v5950_v51, %v1111_v46  ;;  %v4304_v22 = vld [vmem:[%s8660_s2 + $0x4e0] sm:$0xff]  ;;  %v4270_v5 = vld [vmem:[%s8660_s2 + $0x3d0] sm:$0xff] }
 0x157   : > { %v6257_v8 = vmax.f32 %v1146_v20, 0.0  ;;  %v6259_v13 = vmax.f32 %v1147_v38, 0.0  ;;  %1719 = vmatpush.msrb.mxu0 %v4274_v61  ;;  %v4302_v37 = vld [vmem:[%s8660_s2 + $0x4d0] sm:$0xff]  ;;  %v4340_v6 = vld [vmem:[%s8660_s2 + $0x600] sm:$0xff] }
 0x158   : > { %v6261_v23 = vmax.f32 %v1148_v7, 0.0  ;;  %v6263_v24 = vmax.f32 %v1149_v39, 0.0  ;;  %v4268_v15 = vld [vmem:[%s8660_s2 + $0x3c0] sm:$0xff]  ;;  %v4338_v20 = vld [vmem:[%s8660_s2 + $0x5f0] sm:$0xff] }
 0x159   : > { %1413 = vmatmul.f32.gmra.mxu2 %v6257_v8  ;;  %4243 = vmatmul.msk.f32.gmra.mxu3 %vm1284_vm3, %v6259_v13  ;;  %v4300_v46 = vld [vmem:[%s8660_s2 + $0x4c0] sm:$0xff]  ;;  %v4266_v38 = vld [vmem:[%s8660_s2 + $0x3b0] sm:$0xff] }
 0x15a   : > { %v1045_v50 = vpop.f32.mrf.mxu2  ;;  %v1083_v51 = vpop.f32.mrf.mxu3  ;;  %1340 = vmatmul.f32.gmra.mxu0 %v6261_v23  ;;  %1378 = vmatmul.f32.gmra.mxu1 %v6263_v24  ;;  %v4298_v7 = vld [vmem:[%s8660_s2 + $0x4b0] sm:$0xff]  ;;  %v4336_v39 = vld [vmem:[%s8660_s2 + $0x5e0] sm:$0xff] }
 0x15b   : > { %v1112_v30 = vadd.f32 %v1045_v50, %v809_v29  ;;  %v1113_v34 = vadd.f32 %v1083_v51, %v847_v33  ;;  %1720 = vmatpush.msrb.mxu0 %v4272_v14  ;;  %v4334_v29 = vld [vmem:[%s8660_s2 + $0x5d0] sm:$0xff]  ;;  %v4332_v33 = vld [vmem:[%s8660_s2 + $0x5c0] sm:$0xff] }
 0x15c   : > { %v4354_v50 = vld [vmem:[%s8660_s2 + $0x670] sm:$0xff]  ;;  %v4260_v51 = vld [vmem:[%s8660_s2 + $0x380] sm:$0xff] }
 0x15d   : > { %v1150_v28 = vadd.f32 %v5980_v45, %v1112_v30  ;;  %v1151_v31 = vadd.f32 %v5982_v43, %v1113_v34  ;;  %v4308_v45 = vld [vmem:[%s8660_s2 + $0x500] sm:$0xff]  ;;  %v4346_v43 = vld [vmem:[%s8660_s2 + $0x630] sm:$0xff]  ;;  %1721 = vmatpush.msrb.mxu0 %v4270_v5  ;;  %1841 = vmatpush.msrb.mxu3 %v4354_v50  ;;  %v6526_v50 = vld [vmem:[%s8660_s2 + $0x618] sm:$0xff] }
 0x15e   : > { %1756 = vmatpush.msrb.mxu1 %v4308_v45  ;;  %1791 = vmatpush.msrb.mxu2 %v4346_v43  ;;  %v4330_v2 = vld [vmem:[%s8660_s2 + $0x5b0] sm:$0xff]  ;;  %v4328_v34 = vld [vmem:[%s8660_s2 + $0x5a0] sm:$0xff] }
 0x15f   : > { %v6294_v47 = vmax.f32 %v1150_v28, 0.0  ;;  %v6296_v26 = vmax.f32 %v1151_v31, 0.0  ;;  %1722 = vmatpush.msrb.mxu0 %v4268_v15  ;;  %v4258_v42 = vld [vmem:[%s8660_s2 + $0x370] sm:$0xff]  ;;  %v4256_v3 = vld [vmem:[%s8660_s2 + $0x360] sm:$0xff]  ;;  %v4281_v15 = vld [vmem:[%s8660_s2 + $0x428] sm:$0xff] }
 0x160   : > { %1757 = vmatpush.msrb.mxu1 %v4306_v11  ;;  %1792 = vmatpush.msrb.mxu2 %v4344_v41  ;;  %v4290_v30 = vld [vmem:[%s8660_s2 + $0x470] sm:$0xff]  ;;  %v4288_v35 = vld [vmem:[%s8660_s2 + $0x460] sm:$0xff] }
 0x161   : > { %1416 = vmatmul.f32.gmra.mxu2 %v6294_v47  ;;  %4244 = vmatmul.msk.f32.gmra.mxu3 %vm1284_vm3, %v6296_v26  ;;  %v4352_v4 = vld [vmem:[%s8660_s2 + $0x660] sm:$0xff]  ;;  %v4326_v28 = vld [vmem:[%s8660_s2 + $0x590] sm:$0xff] }
 0x162   : > { %1474 = vmatmul.f32.vlgmr.msra.gmra.mxu0 %v5972_v52  ;;  %1512 = vmatmul.f32.vlgmr.msra.gmra.mxu1 %v5974_v53  ;;  %v4350_v31 = vld [vmem:[%s8660_s2 + $0x650] sm:$0xff]  ;;  %v4324_v43 = vld [vmem:[%s8660_s2 + $0x580] sm:$0xff] }
 0x163   : > { %1758 = vmatpush.msrb.mxu1 %v4304_v22  ;;  %1793 = vmatpush.msrb.mxu2 %v4342_v36  ;;  %v4254_v63 = vld [vmem:[%s8660_s2 + $0x350] sm:$0xff]  ;;  %v4348_v61 = vld [vmem:[%s8660_s2 + $0x640] sm:$0xff] }
 0x164   : > { %1723 = vmatpush.msrb.mxu0 %v4266_v38  ;;  %v4286_v45 = vld [vmem:[%s8660_s2 + $0x450] sm:$0xff]  ;;  %1842 = vmatpush.msrb.mxu3 %v4352_v4  ;;  %v4252_v11 = vld [vmem:[%s8660_s2 + $0x340] sm:$0xff]  ;;  %v4311_v38 = vld [vmem:[%s8660_s2 + $0x518] sm:$0xff] }
 0x165   : > { %1759 = vmatpush.msrb.mxu1 %v4302_v37  ;;  %1794 = vmatpush.msrb.mxu2 %v4340_v6  ;;  %v4284_v41 = vld [vmem:[%s8660_s2 + $0x440] sm:$0xff]  ;;  %v4322_v14 = vld [vmem:[%s8660_s2 + $0x570] sm:$0xff]  ;;  %v4283_v37 = vld [vmem:[%s8660_s2 + $0x438] sm:$0xff] }
 0x166   : > { %1724 = vmatpush.msrb.mxu0 %v4264_v54  ;;  %1843 = vmatpush.msrb.mxu3 %v4350_v31  ;;  %v4320_v22 = vld [vmem:[%s8660_s2 + $0x560] sm:$0xff]  ;;  %v4318_v36 = vld [vmem:[%s8660_s2 + $0x550] sm:$0xff]  ;;  %v4315_v6 = vld [vmem:[%s8660_s2 + $0x538] sm:$0xff] }
 0x167   : > { %1760 = vmatpush.msrb.mxu1 %v4300_v46  ;;  %1795 = vmatpush.msrb.mxu2 %v4338_v20  ;;  %v4316_v5 = vld [vmem:[%s8660_s2 + $0x540] sm:$0xff]  ;;  %v4313_v46 = vld [vmem:[%s8660_s2 + $0x528] sm:$0xff]  ;;  %v4279_v20 = vld [vmem:[%s8660_s2 + $0x418] sm:$0xff] }
 0x168   : > { %1725 = vmatpush.msrb.mxu0 %v4262_v59  ;;  %1844 = vmatpush.msrb.mxu3 %v4348_v61  ;;  %v6501_v54 = vld [vmem:[%s8660_s2 + $0x638] sm:$0xff]  ;;  %v6514_v59 = vld [vmem:[%s8660_s2 + $0x628] sm:$0xff] }
 0x169   : > { %1550 = vmatmul.f32.vlgmr.msra.gmra.mxu2 %v6021_v40  ;;  %4245 = vmatmul.msk.f32.vlgmr.msra.gmra.mxu3 %vm1284_vm3, %v6023_v56  ;;  %v6567_v4 = vld [vmem:[%s8660_s2 + $0x5e8] sm:$0xff]  ;;  %v4263_v61 = vld [vmem:[%s8660_s2 + $0x398] sm:$0xff] }
 0x16a   : > { %1477 = vmatmul.f32.gmra.mxu0 %v6025_v57  ;;  %1515 = vmatmul.f32.gmra.mxu1 %v6027_v9 }
 0x16b   : > { %1761 = vmatpush.msrb.mxu1 %v4298_v7  ;;  %1796 = vmatpush.msrb.mxu2 %v4336_v39  ;;  %v4277_v7 = vld [vmem:[%s8660_s2 + $0x408] sm:$0xff] }
 0x16c   : > { %1726 = vmatpush.msrb.mxu0 %v4260_v51  ;;  %v4309_v39 = vld [vmem:[%s8660_s2 + $0x508] sm:$0xff]  ;;  %v4271_v51 = vld [vmem:[%s8660_s2 + $0x3d8] sm:$0xff] }
 0x16d   : > { %1762 = vmatpush.msrb.mxu1 %v4296_v55  ;;  %1797 = vmatpush.msrb.mxu2 %v4334_v29  ;;  %v4275_v55 = vld [vmem:[%s8660_s2 + $0x3f8] sm:$0xff] }
 0x16e   : > { %1727 = vmatpush.msrb.mxu0 %v4258_v42  ;;  %v4307_v29 = vld [vmem:[%s8660_s2 + $0x4f8] sm:$0xff]  ;;  %v4269_v42 = vld [vmem:[%s8660_s2 + $0x3c8] sm:$0xff] }
 0x16f   : > { %1763 = vmatpush.msrb.mxu1 %v4294_v32  ;;  %1798 = vmatpush.msrb.mxu2 %v4332_v33  ;;  %v4273_v32 = vld [vmem:[%s8660_s2 + $0x3e8] sm:$0xff] }
 0x170   : > { %1728 = vmatpush.msrb.mxu0 %v4256_v3  ;;  %v4305_v33 = vld [vmem:[%s8660_s2 + $0x4e8] sm:$0xff]  ;;  %v4267_v3 = vld [vmem:[%s8660_s2 + $0x3b8] sm:$0xff] }
 0x171   : > { %1553 = vmatmul.f32.gmra.mxu2 %v6073_v12  ;;  %4246 = vmatmul.msk.f32.gmra.mxu3 %vm1284_vm3, %v6075_v16 }
 0x172   : > { %1480 = vmatmul.f32.gmra.mxu0 %v6077_v58  ;;  %1518 = vmatmul.f32.gmra.mxu1 %v6079_v60 }
 0x173   : > { %1764 = vmatpush.msrb.mxu1 %v4292_v1  ;;  %1799 = vmatpush.msrb.mxu2 %v4330_v2  ;;  %v4303_v1 = vld [vmem:[%s8660_s2 + $0x4d8] sm:$0xff]  ;;  %v6542_v2 = vld [vmem:[%s8660_s2 + $0x608] sm:$0xff] }
 0x174   : > { %1729 = vmatpush.msrb.mxu0 %v4254_v63  ;;  %v4265_v63 = vld [vmem:[%s8660_s2 + $0x3a8] sm:$0xff] }
 0x175   : > { %1765 = vmatpush.msrb.mxu1 %v4290_v30  ;;  %1800 = vmatpush.msrb.mxu2 %v4328_v34  ;;  %v4301_v30 = vld [vmem:[%s8660_s2 + $0x4c8] sm:$0xff]  ;;  %v6555_v34 = vld [vmem:[%s8660_s2 + $0x5f8] sm:$0xff] }
 0x176   : > { %1730 = vmatpush.msrb.mxu0 %v4252_v11  ;;  %v4295_v11 = vld [vmem:[%s8660_s2 + $0x498] sm:$0xff] }
 0x177   : > { %1766 = vmatpush.msrb.mxu1 %v4288_v35  ;;  %1801 = vmatpush.msrb.mxu2 %v4326_v28  ;;  %v4299_v35 = vld [vmem:[%s8660_s2 + $0x4b8] sm:$0xff] }
 0x178   : > { %1867 = vmatpush.msra.mxu0 %v4283_v37 }
 0x179   : > { %1556 = vmatmul.f32.gmra.mxu2 %v6125_v27  ;;  %4247 = vmatmul.msk.f32.gmra.mxu3 %vm1284_vm3, %v6127_v0 }
 0x17a   : > { %1483 = vmatmul.f32.gmra.mxu0 %v6132_v19  ;;  %1521 = vmatmul.f32.gmra.mxu1 %v6134_v10 }
 0x17b   : > { %1767 = vmatpush.msrb.mxu1 %v4286_v45  ;;  %1802 = vmatpush.msrb.mxu2 %v4324_v43  ;;  %v4297_v45 = vld [vmem:[%s8660_s2 + $0x4a8] sm:$0xff]  ;;  %v6583_v43 = vld [vmem:[%s8660_s2 + $0x5d8] sm:$0xff] }
 0x17c   : > { %1868 = vmatpush.msra.mxu0 %v4281_v15  ;;  %v4259_v15 = vld [vmem:[%s8660_s2 + $0x378] sm:$0xff] }
 0x17d   : > { %1768 = vmatpush.msrb.mxu1 %v4284_v41  ;;  %1803 = vmatpush.msrb.mxu2 %v4322_v14  ;;  %v6596_v41 = vld [vmem:[%s8660_s2 + $0x5c8] sm:$0xff] }
 0x17e   : > { %1869 = vmatpush.msra.mxu0 %v4279_v20  ;;  %v4261_v14 = vld [vmem:[%s8660_s2 + $0x388] sm:$0xff] }
 0x17f   : > { %1804 = vmatpush.msrb.mxu2 %v4320_v22  ;;  %1905 = vmatpush.msra.mxu1 %v4315_v6  ;;  %v4293_v22 = vld [vmem:[%s8660_s2 + $0x488] sm:$0xff]  ;;  %v4355_v6 = vld [vmem:[%s8660_s2 + $0x678] sm:$0xff] }
 0x180   : > { %1870 = vmatpush.msra.mxu0 %v4277_v7  ;;  %1993 = vmatpush.msra.mxu3 %v4355_v6  ;;  %v6627_v20 = vld [vmem:[%s8660_s2 + $0x5a8] sm:$0xff] }
 0x181   : > { %1559 = vmatmul.f32.gmra.mxu2 %v6189_v17  ;;  %4248 = vmatmul.msk.f32.gmra.mxu3 %vm1284_vm3, %v6191_v18  ;;  %v4289_v7 = vld [vmem:[%s8660_s2 + $0x468] sm:$0xff] }
 0x182   : > { %1486 = vmatmul.f32.gmra.mxu0 %v6193_v44  ;;  %1524 = vmatmul.f32.gmra.mxu1 %v6195_v49 }
 0x183   : > { %1805 = vmatpush.msrb.mxu2 %v4318_v36  ;;  %1906 = vmatpush.msra.mxu1 %v4313_v46  ;;  %v6608_v36 = vld [vmem:[%s8660_s2 + $0x5b8] sm:$0xff] }
 0x184   : > { %1871 = vmatpush.msra.mxu0 %v4275_v55  ;;  %v4291_v46 = vld [vmem:[%s8660_s2 + $0x478] sm:$0xff] }
 0x185   : > { %1806 = vmatpush.msrb.mxu2 %v4316_v5  ;;  %1907 = vmatpush.msra.mxu1 %v4311_v38  ;;  %v4257_v38 = vld [vmem:[%s8660_s2 + $0x368] sm:$0xff]  ;;  %v6640_v55 = vld [vmem:[%s8660_s2 + $0x598] sm:$0xff] }
 0x186   : > { %1872 = vmatpush.msra.mxu0 %v4273_v32 }
 0x187   : > { %1908 = vmatpush.msra.mxu1 %v4309_v39  ;;  %4692 = vmatpush.msra.mxu2 %v6501_v54 }
 0x188   : > { %1873 = vmatpush.msra.mxu0 %v4271_v51  ;;  %v4255_v51 = vld [vmem:[%s8660_s2 + $0x358] sm:$0xff] }
 0x189   : > { %1562 = vmatmul.f32.gmra.mxu2 %v6229_v48  ;;  %4249 = vmatmul.msk.f32.gmra.mxu3 %vm1284_vm3, %v6231_v21 }
 0x18a   : > { %1489 = vmatmul.f32.gmra.mxu0 %v6233_v25  ;;  %1527 = vmatmul.f32.gmra.mxu1 %v6235_v62 }
 0x18b   : > { %1909 = vmatpush.msra.mxu1 %v4307_v29  ;;  %4693 = vmatpush.msra.mxu2 %v6514_v59  ;;  %v4353_v29 = vld [vmem:[%s8660_s2 + $0x668] sm:$0xff] }
 0x18c   : > { %1874 = vmatpush.msra.mxu0 %v4269_v42  ;;  %1994 = vmatpush.msra.mxu3 %v4353_v29 }
 0x18d   : > { %1910 = vmatpush.msra.mxu1 %v4305_v33  ;;  %4694 = vmatpush.msra.mxu2 %v6526_v50 }
 0x18e   : > { %1875 = vmatpush.msra.mxu0 %v4267_v3  ;;  %v4351_v3 = vld [vmem:[%s8660_s2 + $0x658] sm:$0xff] }
 0x18f   : > { %1911 = vmatpush.msra.mxu1 %v4303_v1  ;;  %4695 = vmatpush.msra.mxu2 %v6542_v2  ;;  %v4287_v1 = vld [vmem:[%s8660_s2 + $0x458] sm:$0xff] }
 0x190   : > { %1876 = vmatpush.msra.mxu0 %v4265_v63  ;;  %1995 = vmatpush.msra.mxu3 %v4351_v3  ;;  %v4349_v63 = vld [vmem:[%s8660_s2 + $0x648] sm:$0xff] }
 0x191   : > { %1565 = vmatmul.f32.gmra.mxu2 %v6257_v8  ;;  %4250 = vmatmul.msk.f32.gmra.mxu3 %vm1284_vm3, %v6259_v13 }
 0x192   : > { %1492 = vmatmul.f32.gmra.mxu0 %v6261_v23  ;;  %1530 = vmatmul.f32.gmra.mxu1 %v6263_v24 }
 0x193   : > { %1912 = vmatpush.msra.mxu1 %v4301_v30  ;;  %4696 = vmatpush.msra.mxu2 %v6555_v34  ;;  %v6655_v30 = vld [vmem:[%s8660_s2 + $0x588] sm:$0xff] }
 0x194   : > { %1877 = vmatpush.msra.mxu0 %v4263_v61  ;;  %v4285_v61 = vld [vmem:[%s8660_s2 + $0x448] sm:$0xff]  ;;  %1996 = vmatpush.msra.mxu3 %v4349_v63 }
 0x195   : > { %1913 = vmatpush.msra.mxu1 %v4299_v35  ;;  %4697 = vmatpush.msra.mxu2 %v6567_v4 }
 0x196   : > { %1878 = vmatpush.msra.mxu0 %v4261_v14 }
 0x197   : > { %1914 = vmatpush.msra.mxu1 %v4297_v45  ;;  %4698 = vmatpush.msra.mxu2 %v6583_v43  ;;  %v4253_v45 = vld [vmem:[%s8660_s2 + $0x348] sm:$0xff] }
 0x198   : > { %1879 = vmatpush.msra.mxu0 %v4259_v15 }
 0x199   : > { %1568 = vmatmul.f32.gmra.mxu2 %v6294_v47  ;;  %4251 = vmatmul.msk.f32.gmra.mxu3 %vm1284_vm3, %v6296_v26 }
 0x19a   : > { %1731 = vmatmul.f32.vlgmr.msrb.gmra.mxu0 %v5972_v52  ;;  %1769 = vmatmul.f32.vlgmr.msrb.gmra.mxu1 %v5974_v53 }
 0x19b   : > { %1915 = vmatpush.msra.mxu1 %v4295_v11  ;;  %4699 = vmatpush.msra.mxu2 %v6596_v41  ;;  %v4323_v11 = vld [vmem:[%s8660_s2 + $0x578] sm:$0xff] }
 0x19c   : > { %1880 = vmatpush.msra.mxu0 %v4257_v38  ;;  %v4319_v38 = vld [vmem:[%s8660_s2 + $0x558] sm:$0xff] }
 0x19d   : > { %1916 = vmatpush.msra.mxu1 %v4293_v22  ;;  %4700 = vmatpush.msra.mxu2 %v6608_v36  ;;  %v4321_v22 = vld [vmem:[%s8660_s2 + $0x568] sm:$0xff] }
 0x19e   : > { %1881 = vmatpush.msra.mxu0 %v4255_v51 }
 0x19f   : > { %1917 = vmatpush.msra.mxu1 %v4291_v46  ;;  %4701 = vmatpush.msra.mxu2 %v6627_v20 }
 0x1a0   : > { %1882 = vmatpush.msra.mxu0 %v4253_v45 }
 0x1a1   : > { %1807 = vmatmul.f32.vlgmr.msrb.gmra.mxu2 %v6021_v40  ;;  %4356 = vmatmul.msk.f32.vlgmr.msrb.gmra.mxu3 %vm1284_vm3, %v6023_v56 }
 0x1a2   : > { %1734 = vmatmul.f32.gmra.mxu0 %v6025_v57  ;;  %1772 = vmatmul.f32.gmra.mxu1 %v6027_v9 }
 0x1a3   : > { %1918 = vmatpush.msra.mxu1 %v4289_v7  ;;  %4702 = vmatpush.msra.mxu2 %v6640_v55 }
 0x1a5   : > { %1919 = vmatpush.msra.mxu1 %v4287_v1  ;;  %4703 = vmatpush.msra.mxu2 %v6655_v30 }
 0x1a7   : > { %v1323_v28 = vpop.f32.mrf.mxu0  ;;  %v1361_v31 = vpop.f32.mrf.mxu1  ;;  %1920 = vmatpush.msra.mxu1 %v4285_v61  ;;  %4704 = vmatpush.msra.mxu2 %v4323_v11 }
 0x1a8   : > { %v1362_v39 = vadd.f32 %v1361_v31, %v1323_v28 }
 0x1a9   : > { %1810 = vmatmul.f32.gmra.mxu2 %v6073_v12  ;;  %4357 = vmatmul.msk.f32.gmra.mxu3 %vm1284_vm3, %v6075_v16 }
 0x1aa   : > { %1737 = vmatmul.f32.gmra.mxu0 %v6077_v58  ;;  %1775 = vmatmul.f32.gmra.mxu1 %v6079_v60 }
 0x1ab   : > { %1943 = vmatpush.msrb.mxu1 %v6501_v54  ;;  %4705 = vmatpush.msra.mxu2 %v4321_v22 }
 0x1ad   : > { %1944 = vmatpush.msrb.mxu1 %v6514_v59  ;;  %4706 = vmatpush.msra.mxu2 %v4319_v38 }
 0x1af   : > { %v1326_v5 = vpop.f32.mrf.mxu0  ;;  %v1364_v37 = vpop.f32.mrf.mxu1  ;;  %1945 = vmatpush.msrb.mxu1 %v6526_v50 }
 0x1b0   : > { %v1365_v14 = vadd.f32 %v1364_v37, %v1326_v5 }
 0x1b1   : > { %1813 = vmatmul.f32.gmra.mxu2 %v6125_v27  ;;  %4358 = vmatmul.msk.f32.gmra.mxu3 %vm1284_vm3, %v6127_v0 }
 0x1b2   : > { %1740 = vmatmul.f32.gmra.mxu0 %v6132_v19  ;;  %1778 = vmatmul.f32.gmra.mxu1 %v6134_v10 }
 0x1b3   : > { %1946 = vmatpush.msrb.mxu1 %v6542_v2 }
 0x1b4   : > { %v1399_v32 = vpop.f32.mrf.mxu2  ;;  %v1437_v33 = vpop.f32.mrf.mxu3 }
 0x1b5   : > { %v1400_v42 = vadd.f32 %v1399_v32, %v1362_v39  ;;  %v4317_v39 = vld [vmem:[%s8660_s2 + $0x548] sm:$0xff]  ;;  %1947 = vmatpush.msrb.mxu1 %v6555_v34 }
 0x1b6   : > { %4707 = vmatpush.msra.mxu2 %v4317_v39 }
 0x1b7   : > { %v6661_v35 = vadd.f32 %v1437_v33, %v1400_v42  ;;  %v1329_v28 = vpop.f32.mrf.mxu0  ;;  %v1367_v31 = vpop.f32.mrf.mxu1  ;;  %1948 = vmatpush.msrb.mxu1 %v6567_v4 }
 0x1b8   : > { %v1368_v54 = vadd.f32 %v1367_v31, %v1329_v28 }
 0x1b9   : > { %1816 = vmatmul.f32.gmra.mxu2 %v6189_v17  ;;  %4359 = vmatmul.msk.f32.gmra.mxu3 %vm1284_vm3, %v6191_v18 }
 0x1ba   : > { %1743 = vmatmul.f32.gmra.mxu0 %v6193_v44  ;;  %1781 = vmatmul.f32.gmra.mxu1 %v6195_v49 }
 0x1bb   : > { %1949 = vmatpush.msrb.mxu1 %v6583_v43 }
 0x1bc   : > { %v1402_v6 = vpop.f32.mrf.mxu2  ;;  %v1440_v15 = vpop.f32.mrf.mxu3 }
 0x1bd   : > { %v1403_v46 = vadd.f32 %v1402_v6, %v1365_v14  ;;  %1950 = vmatpush.msrb.mxu1 %v6596_v41 }
 0x1bf   : > { %v6689_v5 = vadd.f32 %v1440_v15, %v1403_v46  ;;  %v6691_v37 = vpop.f32.mrf.mxu0  ;;  %v6693_v7 = vpop.f32.mrf.mxu1  ;;  %1951 = vmatpush.msrb.mxu1 %v6608_v36 }
 0x1c1   : > { %1819 = vmatmul.f32.gmra.mxu2 %v6229_v48  ;;  %4360 = vmatmul.msk.f32.gmra.mxu3 %vm1284_vm3, %v6231_v21 }
 0x1c2   : > { %1746 = vmatmul.f32.gmra.mxu0 %v6233_v25  ;;  %1784 = vmatmul.f32.gmra.mxu1 %v6235_v62 }
 0x1c3   : > { %1952 = vmatpush.msrb.mxu1 %v6627_v20 }
 0x1c4   : > { %v1405_v59 = vpop.f32.mrf.mxu2  ;;  %v1443_v29 = vpop.f32.mrf.mxu3 }
 0x1c5   : > { %v1406_v32 = vadd.f32 %v1405_v59, %v1368_v54  ;;  %1953 = vmatpush.msrb.mxu1 %v6640_v55 }
 0x1c7   : > { %v6706_v33 = vadd.f32 %v1443_v29, %v1406_v32  ;;  %v6708_v50 = vpop.f32.mrf.mxu0  ;;  %v6710_v51 = vpop.f32.mrf.mxu1  ;;  %1954 = vmatpush.msrb.mxu1 %v6655_v30 }
 0x1c9   : > { %1822 = vmatmul.f32.gmra.mxu2 %v6257_v8  ;;  %4361 = vmatmul.msk.f32.gmra.mxu3 %vm1284_vm3, %v6259_v13 }
 0x1ca   : > { %1749 = vmatmul.f32.gmra.mxu0 %v6261_v23  ;;  %1787 = vmatmul.f32.gmra.mxu1 %v6263_v24 }
 0x1cb   : > { %1955 = vmatpush.msrb.mxu1 %v4323_v11 }
 0x1cc   : > { %v6719_v2 = vpop.f32.mrf.mxu2  ;;  %v6721_v34 = vpop.f32.mrf.mxu3 }
 0x1cd   : > { %1956 = vmatpush.msrb.mxu1 %v4321_v22 }
 0x1cf   : > { %v6724_v1 = vpop.f32.mrf.mxu0  ;;  %v6726_v4 = vpop.f32.mrf.mxu1  ;;  %1957 = vmatpush.msrb.mxu1 %v4319_v38 }
 0x1d1   : > { %1825 = vmatmul.f32.gmra.mxu2 %v6294_v47  ;;  %4362 = vmatmul.msk.f32.gmra.mxu3 %vm1284_vm3, %v6296_v26 }
 0x1d2   : > { %1883 = vmatmul.f32.vlgmr.msra.gmra.mxu0 %v5972_v52  ;;  %1921 = vmatmul.f32.vlgmr.msra.gmra.mxu1 %v5974_v53 }
 0x1d3   : > { %1958 = vmatpush.msrb.mxu1 %v4317_v39 }
 0x1d4   : > { %v6735_v43 = vpop.f32.mrf.mxu2  ;;  %v6737_v41 = vpop.f32.mrf.mxu3 }
 0x1d7   : > { %v6740_v42 = vpop.f32.mrf.mxu0  ;;  %v6742_v36 = vpop.f32.mrf.mxu1 }
 0x1d9   : > { %1962 = vmatmul.f32.vlgmr.msra.gmra.mxu2 %v6073_v12  ;;  %4363 = vmatmul.msk.f32.vlgmr.msra.gmra.mxu3 %vm1284_vm3, %v6023_v56 }
 0x1da   : > { %1886 = vmatmul.f32.gmra.mxu0 %v6025_v57  ;;  %1924 = vmatmul.f32.gmra.mxu1 %v6027_v9 }
 0x1dc   : > { %v6750_v52 = vpop.f32.mrf.mxu2  ;;  %v6752_v53 = vpop.f32.mrf.mxu3 }
 0x1df   : > { %v6754_v20 = vpop.f32.mrf.mxu0  ;;  %v6756_v55 = vpop.f32.mrf.mxu1 }
 0x1e0   : > { %8683 = vst [vmem:[#allocation8_spill] sm:$0xff] %v6754_v20 }
 0x1e1   : > { %8684 = vst [vmem:[#allocation10_spill] sm:$0xff] %v6756_v55  ;;  %1965 = vmatmul.f32.gmra.mxu2 %v6125_v27  ;;  %4364 = vmatmul.msk.f32.gmra.mxu3 %vm1284_vm3, %v6075_v16 }
 0x1e2   : > { %1889 = vmatmul.f32.gmra.mxu0 %v6077_v58  ;;  %1927 = vmatmul.f32.gmra.mxu1 %v6079_v60 }
 0x1e4   : > { %v6763_v56 = vpop.f32.mrf.mxu2  ;;  %v6765_v57 = vpop.f32.mrf.mxu3 }
 0x1e7   : > { %v6767_v9 = vpop.f32.mrf.mxu0  ;;  %v6769_v12 = vpop.f32.mrf.mxu1 }
 0x1e8   : > { %8685 = vst [vmem:[#allocation9_spill] sm:$0xff] %v6767_v9 }
 0x1e9   : > { %8686 = vst [vmem:[#allocation11_spill] sm:$0xff] %v6769_v12  ;;  %1968 = vmatmul.f32.gmra.mxu2 %v6189_v17  ;;  %4365 = vmatmul.msk.f32.gmra.mxu3 %vm1284_vm3, %v6127_v0 }
 0x1ea   : > { %1892 = vmatmul.f32.gmra.mxu0 %v6132_v19  ;;  %1930 = vmatmul.f32.gmra.mxu1 %v6134_v10 }
 0x1ec   : > { %v6776_v16 = vpop.f32.mrf.mxu2  ;;  %v6778_v58 = vpop.f32.mrf.mxu3 }
 0x1ed   : > { %8687 = vst [vmem:[#allocation12_spill] sm:$0xff] %v6776_v16 }
 0x1ee   : > { %8688 = vst [vmem:[#allocation13_spill] sm:$0xff] %v6778_v58 }
 0x1ef   : > { %v6780_v60 = vpop.f32.mrf.mxu0  ;;  %v6782_v27 = vpop.f32.mrf.mxu1 }
 0x1f0   : > { %8689 = vst [vmem:[#allocation14_spill] sm:$0xff] %v6780_v60  ;;  %v1377_v60 = vadd.f32 %v6726_v4, %v6724_v1 }
 0x1f1   : > { %8690 = vst [vmem:[#allocation15_spill] sm:$0xff] %v6782_v27  ;;  %1971 = vmatmul.f32.gmra.mxu2 %v6229_v48  ;;  %4366 = vmatmul.msk.f32.gmra.mxu3 %vm1284_vm3, %v6191_v18 }
 0x1f2   : > { %1895 = vmatmul.f32.gmra.mxu0 %v6193_v44  ;;  %1933 = vmatmul.f32.gmra.mxu1 %v6195_v49 }
 0x1f4   : > { %v6789_v0 = vpop.f32.mrf.mxu2  ;;  %v6791_v19 = vpop.f32.mrf.mxu3 }
 0x1f5   : > { %8691 = vst [vmem:[#allocation16_spill] sm:$0xff] %v6789_v0 }
 0x1f6   : > { %8692 = vst [vmem:[#allocation17_spill] sm:$0xff] %v6791_v19 }
 0x1f7   : > { %v6793_v10 = vpop.f32.mrf.mxu0  ;;  %v6795_v17 = vpop.f32.mrf.mxu1 }
 0x1f8   : > { %8693 = vst [vmem:[#allocation18_spill] sm:$0xff] %v6793_v10  ;;  %v1415_v10 = vadd.f32 %v6750_v52, %v1377_v60 }
 0x1f9   : > { %8694 = vst [vmem:[#allocation19_spill] sm:$0xff] %v6795_v17  ;;  %1974 = vmatmul.f32.gmra.mxu2 %v6257_v8  ;;  %4367 = vmatmul.msk.f32.gmra.mxu3 %vm1284_vm3, %v6231_v21  ;;  %v1374_v17 = vadd.f32 %v6710_v51, %v6708_v50 }
 0x1fa   : > { %1898 = vmatmul.f32.gmra.mxu0 %v6233_v25  ;;  %1936 = vmatmul.f32.gmra.mxu1 %v6235_v62  ;;  %v1453_v52 = vadd.f32 %v6752_v53, %v1415_v10 }
 0x1fb   : > { %v1412_v1 = vadd.f32 %v6735_v43, %v1374_v17 }
 0x1fc   : > { %v6802_v18 = vpop.f32.mrf.mxu2  ;;  %v6804_v44 = vpop.f32.mrf.mxu3 }
 0x1fd   : > { %8695 = vst [vmem:[#allocation20_spill] sm:$0xff] %v6802_v18 }
 0x1fe   : > { %8696 = vst [vmem:[#allocation21_spill] sm:$0xff] %v6804_v44 }
 0x1ff   : > { %v6806_v49 = vpop.f32.mrf.mxu0  ;;  %v6808_v48 = vpop.f32.mrf.mxu1 }
 0x200   : > { %8697 = vst [vmem:[#allocation22_spill] sm:$0xff] %v6806_v49 }
 0x201   : > { %8698 = vst [vmem:[#allocation23_spill] sm:$0xff] %v6808_v48  ;;  %1977 = vmatmul.f32.gmra.mxu2 %v6294_v47  ;;  %4368 = vmatmul.msk.f32.gmra.mxu3 %vm1284_vm3, %v6259_v13 }
 0x202   : > { %1901 = vmatmul.f32.gmra.mxu0 %v6261_v23  ;;  %1939 = vmatmul.f32.gmra.mxu1 %v6263_v24 }
 0x204   : > { %v6815_v21 = vpop.f32.mrf.mxu2  ;;  %v6817_v25 = vpop.f32.mrf.mxu3 }
 0x205   : > { %8699 = vst [vmem:[#allocation24_spill] sm:$0xff] %v6815_v21  ;;  %v1380_v21 = vadd.f32 %v6742_v36, %v6740_v42  ;;  %v1371_v42 = vadd.f32 %v6693_v7, %v6691_v37  ;;  %v1450_v7 = vadd.f32 %v6737_v41, %v1412_v1 }
 0x206   : > { %8700 = vst [vmem:[#allocation25_spill] sm:$0xff] %v6817_v25 }
 0x207   : > { %v6819_v62 = vpop.f32.mrf.mxu0  ;;  %v6821_v8 = vpop.f32.mrf.mxu1  ;;  %v1418_v12 = vadd.f32 %v6763_v56, %v1380_v21  ;;  %v1409_v51 = vadd.f32 %v6719_v2, %v1371_v42 }
 0x208   : > { %v1529_v1 = vadd.f32 %v6821_v8, %v6819_v62 }
 0x209   : > { %4369 = vmatmul.msk.f32.gmra.mxu3 %vm1284_vm3, %v6296_v26  ;;  %v1456_v4 = vadd.f32 %v6765_v57, %v1418_v12 }
 0x20a   : > { %1959 = vmatmul.f32.vlgmr.msrb.gmra.mxu1 %v6021_v40 }
 0x20c   : > { %v6826_v47 = vpop.f32.mrf.mxu2  ;;  %v6828_v13 = vpop.f32.mrf.mxu3 }
 0x20d   : > { %8701 = vst [vmem:[#allocation26_spill] sm:$0xff] %v6826_v47 }
 0x20e   : > { %8702 = vst [vmem:[#allocation27_spill] sm:$0xff] %v6828_v13 }
 0x20f   : > { %v6830_v23 = vpop.f32.mrf.mxu0  ;;  %v6832_v24 = vpop.f32.mrf.mxu1 }
 0x214   : > { %v6834_v30 = vpop.f32.mrf.mxu2  ;;  %v6836_v3 = vpop.f32.mrf.mxu3 }
 0x215   : > { %8703 = vst [vmem:[#allocation28_spill] sm:$0xff] %v6834_v30 }
 0x216   : > { %8704 = vst [vmem:[#allocation29_spill] sm:$0xff] %v6836_v3 }
 0x217   : > { %v1732_v28 = vpop.f32.mrf.mxu0  ;;  %v1770_v31 = vpop.f32.mrf.mxu1 }
 0x218   : > { %v1771_v43 = vadd.f32 %v1770_v31, %v1732_v28  ;;  %v6911_v31 = vld [vmem:[%s8661_s3 + $0x28] sm:$0xff] }
 0x21c   : > { %v6838_v63 = vpop.f32.mrf.mxu2  ;;  %v6840_v45 = vpop.f32.mrf.mxu3 }
 0x21d   : > { %8705 = vst [vmem:[#allocation30_spill] sm:$0xff] %v6840_v45 }
 0x21f   : > { %v1735_v26 = vpop.f32.mrf.mxu0  ;;  %v1773_v40 = vpop.f32.mrf.mxu1 }
 0x224   : > { %v6842_v61 = vpop.f32.mrf.mxu2  ;;  %v6844_v11 = vpop.f32.mrf.mxu3 }
 0x225   : > { %v1809_v53 = vadd.f32 %v6842_v61, %v1771_v43  ;;  %v8711_v43 = vld [vmem:[#allocation18_spill] sm:$0xff] }
 0x227   : > { %v1738_v14 = vpop.f32.mrf.mxu0  ;;  %v1776_v22 = vpop.f32.mrf.mxu1 }
 0x228   : > { %v1777_v36 = vadd.f32 %v1776_v22, %v1738_v14  ;;  %v6925_v14 = vld [vmem:[%s8661_s3 + $0x30] sm:$0xff] }
 0x229   : > { %v6930_v22 = vld [vmem:[%s8661_s3 + $0x10] sm:$0xff] }
 0x22c   : > { %v1811_v6 = vpop.f32.mrf.mxu2  ;;  %v6846_v15 = vpop.f32.mrf.mxu3 }
 0x22f   : > { %v1741_v46 = vpop.f32.mrf.mxu0  ;;  %v1779_v38 = vpop.f32.mrf.mxu1 }
 0x234   : > { %v1814_v39 = vpop.f32.mrf.mxu2  ;;  %v1852_v54 = vpop.f32.mrf.mxu3 }
 0x237   : > { %v1744_v59 = vpop.f32.mrf.mxu0  ;;  %v1782_v29 = vpop.f32.mrf.mxu1 }
 0x238   : > { %v1783_v9 = vadd.f32 %v1782_v29, %v1744_v59  ;;  %v1532_v29 = vadd.f32 %v6832_v24, %v6830_v23  ;;  %v8712_v23 = vld [vmem:[#allocation19_spill] sm:$0xff] }
 0x239   : > { %v1523_v24 = vadd.f32 %v8712_v23, %v8711_v43 }
 0x23c   : > { %v1817_v32 = vpop.f32.mrf.mxu2  ;;  %v1855_v58 = vpop.f32.mrf.mxu3 }
 0x23f   : > { %v1747_v19 = vpop.f32.mrf.mxu0  ;;  %v1785_v44 = vpop.f32.mrf.mxu1 }
 0x240   : > { %v1786_v27 = vadd.f32 %v1785_v44, %v1747_v19  ;;  %v1447_v19 = vadd.f32 %v6721_v34, %v1409_v51  ;;  %v1847_v34 = vadd.f32 %v6844_v11, %v1809_v53  ;;  %v8709_v51 = vld [vmem:[#allocation23_spill] sm:$0xff] }
 0x244   : > { %v1820_v16 = vpop.f32.mrf.mxu2  ;;  %v1858_v25 = vpop.f32.mrf.mxu3 }
 0x245   : > { %v1821_v48 = vadd.f32 %v1820_v16, %v1783_v9  ;;  %v1774_v9 = vadd.f32 %v1773_v40, %v1735_v26  ;;  %v1815_v16 = vadd.f32 %v1814_v39, %v1777_v36  ;;  %v6944_v39 = vld [vmem:[%s8661_s3 + $0x18] sm:$0x3] }
 0x247   : > { %v1750_v0 = vpop.f32.mrf.mxu0  ;;  %v1788_v55 = vpop.f32.mrf.mxu1  ;;  %v1859_v60 = vadd.f32 %v1858_v25, %v1821_v48  ;;  %v1812_v57 = vadd.f32 %v1811_v6, %v1774_v9  ;;  %v1853_v10 = vadd.f32 %v1852_v54, %v1815_v16  ;;  %v8710_v9 = vld [vmem:[#allocation28_spill] sm:$0xff] }
 0x248   : > { %v1789_v45 = vadd.f32 %v1788_v55, %v1750_v0  ;;  %v1567_v16 = vadd.f32 %v8710_v9, %v1529_v1  ;;  %v8728_v9 = vld [vmem:[#allocation25_spill] sm:$0xff] }
 0x249   : > { %v1850_v41 = vadd.f32 %v6846_v15, %v1812_v57  ;;  %v2023_v48 = vmax.f32 %v6706_v33, %v1853_v10  ;;  %v8713_v57 = vld [vmem:[#allocation26_spill] sm:$0xff] }
 0x24b   : > { %v2021_v21 = vmax.f32 %v6689_v5, %v1850_v41  ;;  %v6900_v5 = vld [vmem:[%s8661_s3] sm:$0xff] }
 0x24c   : > { %v1823_v20 = vpop.f32.mrf.mxu2  ;;  %v1861_v13 = vpop.f32.mrf.mxu3  ;;  %v8716_v41 = vld [vmem:[#allocation11_spill] sm:$0xff] }
 0x24d   : > { %v1824_v47 = vadd.f32 %v1823_v20, %v1786_v27 }
 0x24f   : > { %v6848_v18 = vpop.f32.mrf.mxu0  ;;  %v6850_v3 = vpop.f32.mrf.mxu1  ;;  %v1862_v20 = vadd.f32 %v1861_v13, %v1824_v47  ;;  %v2019_v13 = vmax.f32 %v6661_v35, %v1847_v34  ;;  %v8717_v34 = vld [vmem:[#allocation14_spill] sm:$0xff] }
 0x250   : > { %8706 = vst [vmem:[#allocation31_spill] sm:$0xff] %v6848_v18 }
 0x251   : > { %8707 = vst [vmem:[#allocation32_spill] sm:$0xff] %v6850_v3  ;;  %v1780_v3 = vadd.f32 %v1779_v38, %v1741_v46  ;;  %v2029_v0 = vmax.f32 %v1453_v52, %v1862_v20  ;;  %v6939_v38 = vld [vmem:[%s8661_s3 + $0x38] sm:$0x3] }
 0x253   : > { %v1818_v55 = vadd.f32 %v1817_v32, %v1780_v3 }
 0x254   : > { %v1826_v18 = vpop.f32.mrf.mxu2  ;;  %v1864_v30 = vpop.f32.mrf.mxu3 }
 0x255   : > { %v1827_v49 = vadd.f32 %v1826_v18, %v1789_v45  ;;  %v1856_v12 = vadd.f32 %v1855_v58, %v1818_v55  ;;  %v2027_v18 = vmax.f32 %v1450_v7, %v1859_v60  ;;  %v6916_v45 = vld [vmem:[%s8661_s3 + $0x8] sm:$0xff] }
 0x257   : > { %v1865_v56 = vadd.f32 %v1864_v30, %v1827_v49  ;;  %v6864_v27 = vpop.f32.mrf.mxu0  ;;  %v6866_v50 = vpop.f32.mrf.mxu1  ;;  %v2025_v58 = vmax.f32 %v1447_v19, %v1856_v12  ;;  %v6895_v30 = vld [vmem:[%s8661_s3 + $0x20] sm:$0xff] }
 0x258   : > { %v8724_v1 = vld [vmem:[#allocation32_spill] sm:$0xff] }
 0x259   : > { %v2031_v37 = vmax.f32 %v1456_v4, %v1865_v56  ;;  %v1570_v4 = vadd.f32 %v6838_v63, %v1532_v29  ;;  %v8708_v56 = vld [vmem:[#allocation22_spill] sm:$0xff] }
 0x25a   : > { %v1526_v52 = vadd.f32 %v8709_v51, %v8708_v56 }
 0x25b   : > { %4370 = vmatpush.msk.msrb.mxu0 %vm906_vm2, %v2031_v37  ;;  %4384 = vmatpush.msk.msrb.mxu2 %vm906_vm2, %v2031_v37 }
 0x25c   : > { %v6874_v17 = vpop.f32.mrf.mxu2  ;;  %v6876_v2 = vpop.f32.mrf.mxu3  ;;  %v1564_v12 = vadd.f32 %v8713_v57, %v1526_v52  ;;  %v4439_v57 = vld [vmem:[%s8662_s4 + $0x3d8] sm:$0xff] }
 0x25d   : > { %2066 = vmatpush.msrb.mxu0 %v2029_v0  ;;  %2141 = vmatpush.msrb.mxu2 %v2029_v0  ;;  %v8714_v0 = vld [vmem:[#allocation30_spill] sm:$0xff] }
 0x25e   : > { %v1608_v62 = vadd.f32 %v8714_v0, %v1570_v4 }
 0x25f   : > { %2067 = vmatpush.msrb.mxu0 %v2027_v18  ;;  %2142 = vmatpush.msrb.mxu2 %v2027_v18  ;;  %v6880_v44 = vpop.f32.mrf.mxu0  ;;  %v6882_v49 = vpop.f32.mrf.mxu1  ;;  %v8715_v18 = vld [vmem:[#allocation9_spill] sm:$0xff] }
 0x261   : > { %2068 = vmatpush.msrb.mxu0 %v2025_v58  ;;  %2143 = vmatpush.msrb.mxu2 %v2025_v58  ;;  %v1517_v58 = vadd.f32 %v8716_v41, %v8715_v18  ;;  %v4430_v41 = vld [vmem:[%s8662_s4 + $0x390] sm:$0xff] }
 0x263   : > { %2069 = vmatpush.msrb.mxu0 %v2023_v48  ;;  %2144 = vmatpush.msrb.mxu2 %v2023_v48  ;;  %v8718_v48 = vld [vmem:[#allocation15_spill] sm:$0xff] }
 0x264   : > { %v6887_v25 = vpop.f32.mrf.mxu2  ;;  %v6889_v47 = vpop.f32.mrf.mxu3 }
 0x265   : > { %2070 = vmatpush.msrb.mxu0 %v2021_v21  ;;  %2145 = vmatpush.msrb.mxu2 %v2021_v21  ;;  %v1520_v21 = vadd.f32 %v8718_v48, %v8717_v34  ;;  %v4427_v34 = vld [vmem:[%s8662_s4 + $0x378] sm:$0xff]  ;;  %v4428_v48 = vld [vmem:[%s8662_s4 + $0x380] sm:$0xff] }
 0x267   : > { %2071 = vmatpush.msrb.mxu0 %v2019_v13  ;;  %2146 = vmatpush.msrb.mxu2 %v2019_v13  ;;  %v1893_v33 = vpop.f32.mrf.mxu0  ;;  %v1931_v3 = vpop.f32.mrf.mxu1  ;;  %v8719_v13 = vld [vmem:[#allocation24_spill] sm:$0xff] }
 0x268   : > { %4385 = vmatmul.msk.f32.vlgmr.msrb.gmra.mxu2 %vm2037_vm4, %v6895_v30  ;;  %4371 = vmatmul.msk.f32.vlgmr.msrb.gmra.mxu0 %vm2037_vm4, %v6900_v5  ;;  %v1932_v63 = vadd.f32 %v1931_v3, %v1893_v33  ;;  %v8721_v33 = vld [vmem:[#allocation20_spill] sm:$0xff] }
 0x269   : > { %v1558_v3 = vadd.f32 %v8721_v33, %v1520_v21  ;;  %2386 = vmatpush.msra.mxu0 %v4439_v57  ;;  %v4424_v21 = vld [vmem:[%s8662_s4 + $0x360] sm:$0xff]  ;;  %v4407_v33 = vld [vmem:[%s8662_s4 + $0x2d8] sm:$0xff]  ;;  %v4402_v57 = vld [vmem:[%s8662_s4 + $0x2b0] sm:$0xff] }
 0x26c   : > { %v1969_v35 = vpop.f32.mrf.mxu2  ;;  %v6906_v28 = vpop.f32.mrf.mxu3 }
 0x26f   : > { %v1896_v26 = vpop.f32.mrf.mxu0  ;;  %v1934_v40 = vpop.f32.mrf.mxu1 }
 0x270   : > { %4386 = vmatmul.msk.f32.gmra.mxu2 %vm2037_vm4, %v6911_v31  ;;  %4372 = vmatmul.msk.f32.gmra.mxu0 %vm2037_vm4, %v6916_v45  ;;  %v1935_v60 = vadd.f32 %v1934_v40, %v1896_v26  ;;  %v1561_v26 = vadd.f32 %v8719_v13, %v1523_v24  ;;  %v8720_v40 = vld [vmem:[#allocation29_spill] sm:$0xff] }
 0x271   : > { %v4422_v13 = vld [vmem:[%s8662_s4 + $0x350] sm:$0xff] }
 0x274   : > { %v1972_v61 = vpop.f32.mrf.mxu2  ;;  %v2007_v11 = vpop.f32.mrf.mxu3 }
 0x275   : > { %v1973_v19 = vadd.f32 %v1972_v61, %v1935_v60  ;;  %v8722_v61 = vld [vmem:[#allocation27_spill] sm:$0xff] }
 0x277   : > { %v1899_v6 = vpop.f32.mrf.mxu0  ;;  %v1937_v15 = vpop.f32.mrf.mxu1 }
 0x278   : > { %4387 = vmatmul.msk.f32.gmra.mxu2 %vm2037_vm4, %v6925_v14  ;;  %4373 = vmatmul.msk.f32.gmra.mxu0 %vm2037_vm4, %v6930_v22  ;;  %v1938_v55 = vadd.f32 %v1937_v15, %v1899_v6  ;;  %v1605_v6 = vadd.f32 %v8720_v40, %v1567_v16  ;;  %v1929_v15 = vadd.f32 %v6882_v49, %v6880_v44  ;;  %v8725_v44 = vld [vmem:[#allocation8_spill] sm:$0xff]  ;;  %v8726_v49 = vld [vmem:[#allocation10_spill] sm:$0xff] }
 0x279   : > { %v1599_v16 = vadd.f32 %v8728_v9, %v1561_v26  ;;  %v4418_v26 = vld [vmem:[%s8662_s4 + $0x330] sm:$0xff]  ;;  %v4419_v40 = vld [vmem:[%s8662_s4 + $0x338] sm:$0xff]  ;;  %v4420_v9 = vld [vmem:[%s8662_s4 + $0x340] sm:$0xff] }
 0x27c   : > { %v2010_v46 = vpop.f32.mrf.mxu3  ;;  %v1975_v54 = vpop.f32.mrf.mxu2 }
 0x27d   : > { %v1976_v37 = vadd.f32 %v1975_v54, %v1938_v55  ;;  %v1970_v54 = vadd.f32 %v1969_v35, %v1932_v63  ;;  %v2011_v29 = vadd.f32 %v2010_v46, %v1973_v19  ;;  %v1514_v35 = vadd.f32 %v8726_v49, %v8725_v44  ;;  %v8727_v46 = vld [vmem:[#allocation16_spill] sm:$0xff]  ;;  %v8732_v63 = vld [vmem:[#allocation13_spill] sm:$0xff]  ;;  %v2236_v44 = vld [vmem:[%s8662_s4 + $0x138] sm:$0xff] }
 0x27e   : > { %v1555_v52 = vadd.f32 %v8727_v46, %v1517_v58  ;;  %v4431_v58 = vld [vmem:[%s8662_s4 + $0x398] sm:$0xff]  ;;  %v4426_v49 = vld [vmem:[%s8662_s4 + $0x370] sm:$0xff] }
 0x27f   : > { %v1902_v32 = vpop.f32.mrf.mxu0  ;;  %v1940_v42 = vpop.f32.mrf.mxu1  ;;  %v2008_v56 = vadd.f32 %v2007_v11, %v1970_v54  ;;  %v4412_v54 = vld [vmem:[%s8662_s4 + $0x300] sm:$0xff]  ;;  %v4423_v46 = vld [vmem:[%s8662_s4 + $0x358] sm:$0xff] }
 0x280   : > { %4388 = vmatmul.msk.f32.gmra.mxu2 %vm2037_vm4, %v6939_v38  ;;  %4374 = vmatmul.msk.f32.gmra.mxu0 %vm2037_vm4, %v6944_v39  ;;  %v1941_v20 = vadd.f32 %v1940_v42, %v1902_v32  ;;  %v8723_v42 = vld [vmem:[#allocation31_spill] sm:$0xff] }
 0x281   : > { %v1923_v4 = vadd.f32 %v8724_v1, %v8723_v42  ;;  %v2026_v24 = vmax.f32 %v1599_v16, %v2008_v56  ;;  %v4401_v42 = vld [vmem:[%s8662_s4 + $0x2a8] sm:$0xff]  ;;  %v2239_v56 = vld [vmem:[%s8662_s4 + $0x150] sm:$0xff] }
 0x282   : > { %v4441_v1 = vld [vmem:[%s8662_s4 + $0x3e8] sm:$0xff]  ;;  %v2227_v16 = vld [vmem:[%s8662_s4 + $0xf0] sm:$0xff] }
 0x284   : > { %v2013_v59 = vpop.f32.mrf.mxu3  ;;  %v1978_v36 = vpop.f32.mrf.mxu2 }
 0x285   : > { %v1979_v7 = vadd.f32 %v1978_v36, %v1941_v20  ;;  %v2014_v53 = vadd.f32 %v2013_v59, %v1976_v37  ;;  %v1602_v59 = vadd.f32 %v8722_v61, %v1564_v12  ;;  %v1926_v36 = vadd.f32 %v6866_v50, %v6864_v27  ;;  %v4404_v61 = vld [vmem:[%s8662_s4 + $0x2c0] sm:$0xff] }
 0x286   : > { %v1967_v20 = vadd.f32 %v6887_v25, %v1929_v15  ;;  %v8729_v25 = vld [vmem:[#allocation12_spill] sm:$0xff] }
 0x287   : > { %v1960_v55 = vpop.f32.mrf.mxu1  ;;  %v2030_v51 = vmax.f32 %v1605_v6, %v2014_v53  ;;  %v1964_v60 = vadd.f32 %v6874_v17, %v1926_v36  ;;  %v2028_v50 = vmax.f32 %v1602_v59, %v2011_v29  ;;  %v1552_v11 = vadd.f32 %v8729_v25, %v1514_v35  ;;  %v8731_v17 = vld [vmem:[#allocation17_spill] sm:$0xff]  ;;  %v4415_v6 = vld [vmem:[%s8662_s4 + $0x318] sm:$0xff]  ;;  %v4416_v15 = vld [vmem:[%s8662_s4 + $0x320] sm:$0xff] }
 0x288   : > { %v2005_v27 = vadd.f32 %v6906_v28, %v1967_v20  ;;  %v1961_v37 = vadd.f32 %v1960_v55, %v1923_v4  ;;  %v1593_v12 = vadd.f32 %v8731_v17, %v1555_v52  ;;  %v4410_v29 = vld [vmem:[%s8662_s4 + $0x2f0] sm:$0xff]  ;;  %v4400_v59 = vld [vmem:[%s8662_s4 + $0x2a0] sm:$0xff]  ;;  %v4435_v36 = vld [vmem:[%s8662_s4 + $0x3b8] sm:$0xff] }
 0x289   : > { %v2002_v23 = vadd.f32 %v6889_v47, %v1964_v60  ;;  %v4440_v47 = vld [vmem:[%s8662_s4 + $0x3e0] sm:$0xff]  ;;  %v1590_v19 = vadd.f32 %v8732_v63, %v1552_v11  ;;  %v4398_v4 = vld [vmem:[%s8662_s4 + $0x290] sm:$0xff]  ;;  %v2242_v55 = vld [vmem:[%s8662_s4 + $0x168] sm:$0xff] }
 0x28a   : > { %v1999_v0 = vadd.f32 %v6876_v2, %v1961_v37  ;;  %2438 = vmatpush.msra.mxu2 %v4440_v47  ;;  %v4433_v2 = vld [vmem:[%s8662_s4 + $0x3a8] sm:$0xff]  ;;  %v4432_v20 = vld [vmem:[%s8662_s4 + $0x3a0] sm:$0xff]  ;;  %v4411_v25 = vld [vmem:[%s8662_s4 + $0x2f8] sm:$0xff] }
 0x28b   : > { %v2022_v53 = vmax.f32 %v1593_v12, %v2002_v23  ;;  %v2233_v35 = vld [vmem:[%s8662_s4 + $0x120] sm:$0xff]  ;;  %v2230_v52 = vld [vmem:[%s8662_s4 + $0x108] sm:$0xff]  ;;  %v2203_v47 = vld [vmem:[%s8662_s4 + $0x30] sm:$0xff] }
 0x28c   : > { %v2016_v8 = vpop.f32.mrf.mxu3  ;;  %v2020_v18 = vmax.f32 %v1590_v19, %v1999_v0  ;;  %v4417_v60 = vld [vmem:[%s8662_s4 + $0x328] sm:$0xff]  ;;  %v2221_v37 = vld [vmem:[%s8662_s4 + $0xc0] sm:$0xff] }
 0x28d   : > { %v2017_v10 = vadd.f32 %v2016_v8, %v1979_v7  ;;  %v8730_v7 = vld [vmem:[#allocation21_spill] sm:$0xff]  ;;  %v2209_v12 = vld [vmem:[%s8662_s4 + $0x60] sm:$0xff] }
 0x28e   : > { %v1596_v43 = vadd.f32 %v8730_v7, %v1558_v3  ;;  %v4437_v8 = vld [vmem:[%s8662_s4 + $0x3c8] sm:$0xff]  ;;  %v4403_v3 = vld [vmem:[%s8662_s4 + $0x2b8] sm:$0xff]  ;;  %v4408_v7 = vld [vmem:[%s8662_s4 + $0x2e0] sm:$0xff] }
 0x28f   : > { %v2032_v32 = vmax.f32 %v1608_v62, %v2017_v10  ;;  %v4436_v62 = vld [vmem:[%s8662_s4 + $0x3c0] sm:$0xff]  ;;  %v4434_v10 = vld [vmem:[%s8662_s4 + $0x3b0] sm:$0xff]  ;;  %2439 = vmatpush.msra.mxu2 %v4437_v8  ;;  %v2218_v11 = vld [vmem:[%s8662_s4 + $0xa8] sm:$0xff] }
 0x290   : > { %v2024_v28 = vmax.f32 %v1596_v43, %v2005_v27  ;;  %2387 = vmatpush.msra.mxu0 %v4436_v62  ;;  %v2224_v27 = vld [vmem:[%s8662_s4 + $0xd8] sm:$0xff]  ;;  %v2215_v43 = vld [vmem:[%s8662_s4 + $0x90] sm:$0xff]  ;;  %v4405_v23 = vld [vmem:[%s8662_s4 + $0x2c8] sm:$0xff] }
 0x291   : > { %4375 = vmatpush.msk.msra.mxu1 %vm906_vm2, %v2032_v32  ;;  %4389 = vmatpush.msk.msrb.mxu3 %vm906_vm2, %v2032_v32  ;;  %v4406_v32 = vld [vmem:[%s8662_s4 + $0x2d0] sm:$0xff]  ;;  %v2206_v0 = vld [vmem:[%s8662_s4 + $0x48] sm:$0xff]  ;;  %v4396_v62 = vld [vmem:[%s8662_s4 + $0x280] sm:$0xff] }
 0x292   : > { %2388 = vmatpush.msra.mxu0 %v4433_v2  ;;  %2440 = vmatpush.msra.mxu2 %v4434_v10  ;;  %v2200_v8 = vld [vmem:[%s8662_s4 + $0x18] sm:$0xff]  ;;  %v2197_v19 = vld [vmem:[%s8662_s4] sm:$0xff] }
 0x293   : > { %2095 = vmatpush.msra.mxu1 %v2030_v51  ;;  %2170 = vmatpush.msrb.mxu3 %v2030_v51  ;;  %v4429_v51 = vld [vmem:[%s8662_s4 + $0x388] sm:$0xff] }
 0x294   : > { %2389 = vmatpush.msra.mxu0 %v4430_v41  ;;  %2441 = vmatpush.msra.mxu2 %v4431_v58 }
 0x295   : > { %2096 = vmatpush.msra.mxu1 %v2028_v50  ;;  %2171 = vmatpush.msrb.mxu3 %v2028_v50  ;;  %v4414_v50 = vld [vmem:[%s8662_s4 + $0x310] sm:$0xff] }
 0x296   : > { %2390 = vmatpush.msra.mxu0 %v4427_v34  ;;  %2442 = vmatpush.msra.mxu2 %v4428_v48 }
 0x297   : > { %2097 = vmatpush.msra.mxu1 %v2026_v24  ;;  %2172 = vmatpush.msrb.mxu3 %v2026_v24  ;;  %v2212_v24 = vld [vmem:[%s8662_s4 + $0x78] sm:$0xff] }
 0x298   : > { %2391 = vmatpush.msra.mxu0 %v4424_v21  ;;  %v2244_v21 = vld [vmem:[%s8662_s4 + $0x178] sm:$0xff] }
 0x299   : > { %2098 = vmatpush.msra.mxu1 %v2024_v28  ;;  %2173 = vmatpush.msrb.mxu3 %v2024_v28  ;;  %v4399_v28 = vld [vmem:[%s8662_s4 + $0x298] sm:$0xff] }
 0x29b   : > { %2099 = vmatpush.msra.mxu1 %v2022_v53  ;;  %2174 = vmatpush.msrb.mxu3 %v2022_v53 }
 0x29d   : > { %2100 = vmatpush.msra.mxu1 %v2020_v18  ;;  %2175 = vmatpush.msrb.mxu3 %v2020_v18  ;;  %v4469_v18 = vld [vmem:[%s8662_s4 + $0x4c8] sm:$0xff] }
 0x29e   : > { %4390 = vmatmul.msk.f32.vlgmr.msrb.gmra.mxu3 %vm2037_vm4, %v6895_v30  ;;  %4376 = vmatmul.msk.f32.vlgmr.msra.gmra.mxu1 %vm2037_vm4, %v6900_v5  ;;  %v4425_v30 = vld [vmem:[%s8662_s4 + $0x368] sm:$0xff] }
 0x29f   : > { %v4421_v5 = vld [vmem:[%s8662_s4 + $0x348] sm:$0xff]  ;;  %2443 = vmatpush.msra.mxu2 %v4425_v30  ;;  %2418 = vmatpush.msrb.mxu1 %v4469_v18  ;;  %v2272_v18 = vld [vmem:[%s8662_s4 + $0x258] sm:$0xff] }
 0x2a0   : > { %2392 = vmatpush.msra.mxu0 %v4421_v5  ;;  %v2274_v30 = vld [vmem:[%s8662_s4 + $0x268] sm:$0xff] }
 0x2a1   : > { %2444 = vmatpush.msra.mxu2 %v4422_v13  ;;  %v2241_v13 = vld [vmem:[%s8662_s4 + $0x160] sm:$0xff] }
 0x2a2   : > { %2393 = vmatpush.msra.mxu0 %v4418_v26  ;;  %v2271_v26 = vld [vmem:[%s8662_s4 + $0x250] sm:$0xff] }
 0x2a3   : > { %2445 = vmatpush.msra.mxu2 %v4419_v40  ;;  %v4466_v40 = vld [vmem:[%s8662_s4 + $0x4b0] sm:$0xff] }
 0x2a4   : > { %2394 = vmatpush.msra.mxu0 %v4415_v6  ;;  %v4463_v6 = vld [vmem:[%s8662_s4 + $0x498] sm:$0xff]  ;;  %2419 = vmatpush.msrb.mxu1 %v4466_v40 }
 0x2a5   : > { %2446 = vmatpush.msra.mxu2 %v4416_v15  ;;  %v4470_v15 = vld [vmem:[%s8662_s4 + $0x4d0] sm:$0xff]  ;;  %v4459_v40 = vld [vmem:[%s8662_s4 + $0x478] sm:$0xff] }
 0x2a6   : > { %4391 = vmatmul.msk.f32.gmra.mxu3 %vm2037_vm4, %v6911_v31  ;;  %4377 = vmatmul.msk.f32.gmra.mxu1 %vm2037_vm4, %v6916_v45  ;;  %v4413_v31 = vld [vmem:[%s8662_s4 + $0x308] sm:$0xff] }
 0x2a7   : > { %v4409_v45 = vld [vmem:[%s8662_s4 + $0x2e8] sm:$0xff]  ;;  %2395 = vmatpush.msra.mxu0 %v4412_v54  ;;  %2447 = vmatpush.msra.mxu2 %v4413_v31 }
 0x2a8   : > { %v2238_v31 = vld [vmem:[%s8662_s4 + $0x148] sm:$0xff]  ;;  %2470 = vmatpush.msra.mxu3 %v4470_v15  ;;  %2420 = vmatpush.msrb.mxu1 %v4463_v6  ;;  %v4521_v15 = vld [vmem:[%s8662_s4 + $0x5d8] sm:$0xff] }
 0x2a9   : > { %2396 = vmatpush.msra.mxu0 %v4409_v45  ;;  %2448 = vmatpush.msra.mxu2 %v4410_v29  ;;  %v2268_v45 = vld [vmem:[%s8662_s4 + $0x238] sm:$0xff]  ;;  %v2266_v6 = vld [vmem:[%s8662_s4 + $0x228] sm:$0xff] }
 0x2aa   : > { %v4467_v29 = vld [vmem:[%s8662_s4 + $0x4b8] sm:$0xff] }
 0x2ab   : > { %2397 = vmatpush.msra.mxu0 %v4406_v32  ;;  %2449 = vmatpush.msra.mxu2 %v4407_v33  ;;  %v4460_v33 = vld [vmem:[%s8662_s4 + $0x480] sm:$0xff] }
 0x2ac   : > { %2471 = vmatpush.msra.mxu3 %v4467_v29  ;;  %2421 = vmatpush.msrb.mxu1 %v4460_v33  ;;  %v4518_v33 = vld [vmem:[%s8662_s4 + $0x5c0] sm:$0xff] }
 0x2ad   : > { %2398 = vmatpush.msra.mxu0 %v4403_v3  ;;  %2450 = vmatpush.msra.mxu2 %v4404_v61  ;;  %v2235_v3 = vld [vmem:[%s8662_s4 + $0x130] sm:$0xff]  ;;  %v2265_v61 = vld [vmem:[%s8662_s4 + $0x220] sm:$0xff] }
 0x2ae   : > { %4392 = vmatmul.msk.f32.gmra.mxu3 %vm2037_vm4, %v6925_v14  ;;  %4378 = vmatmul.msk.f32.gmra.mxu1 %vm2037_vm4, %v6930_v22  ;;  %v4397_v14 = vld [vmem:[%s8662_s4 + $0x288] sm:$0xff]  ;;  %v4394_v22 = vld [vmem:[%s8662_s4 + $0x270] sm:$0xff] }
 0x2af   : > { %2399 = vmatpush.msra.mxu0 %v4400_v59  ;;  %2451 = vmatpush.msra.mxu2 %v4401_v42  ;;  %v4464_v59 = vld [vmem:[%s8662_s4 + $0x4a0] sm:$0xff]  ;;  %v2262_v42 = vld [vmem:[%s8662_s4 + $0x208] sm:$0xff] }
 0x2b0   : > { %2472 = vmatpush.msra.mxu3 %v4464_v59  ;;  %v2260_v59 = vld [vmem:[%s8662_s4 + $0x1f8] sm:$0xff] }
 0x2b1   : > { %2400 = vmatpush.msra.mxu0 %v4397_v14  ;;  %2452 = vmatpush.msra.mxu2 %v4398_v4  ;;  %v4457_v4 = vld [vmem:[%s8662_s4 + $0x468] sm:$0xff] }
 0x2b2   : > { %2422 = vmatpush.msrb.mxu1 %v4457_v4  ;;  %v4450_v4 = vld [vmem:[%s8662_s4 + $0x430] sm:$0xff] }
 0x2b3   : > { %2401 = vmatpush.msra.mxu0 %v4394_v22  ;;  %v2232_v22 = vld [vmem:[%s8662_s4 + $0x118] sm:$0xff] }
 0x2b5   : > { %2490 = vmatpush.msrb.mxu0 %v4441_v1 }
 0x2b6   : > { %4393 = vmatmul.msk.f32.gmra.mxu3 %vm2037_vm4, %v6939_v38  ;;  %4379 = vmatmul.msk.f32.gmra.mxu1 %vm2037_vm4, %v6944_v39  ;;  %v4438_v38 = vld [vmem:[%s8662_s4 + $0x3d0] sm:$0xff]  ;;  %v4395_v39 = vld [vmem:[%s8662_s4 + $0x278] sm:$0xff] }
 0x2b7   : > { %2491 = vmatpush.msrb.mxu0 %v4438_v38  ;;  %2453 = vmatpush.msra.mxu2 %v4395_v39  ;;  %v2229_v39 = vld [vmem:[%s8662_s4 + $0x100] sm:$0xff] }
 0x2b9   : > { %2492 = vmatpush.msrb.mxu0 %v4435_v36  ;;  %2548 = vmatpush.msrb.mxu2 %v2242_v55  ;;  %v2259_v36 = vld [vmem:[%s8662_s4 + $0x1f0] sm:$0xff]  ;;  %v4461_v55 = vld [vmem:[%s8662_s4 + $0x488] sm:$0xff] }
 0x2ba   : > { %2473 = vmatpush.msra.mxu3 %v4461_v55  ;;  %v4551_v55 = vld [vmem:[%s8662_s4 + $0x6c8] sm:$0xff] }
 0x2bb   : > { %2493 = vmatpush.msrb.mxu0 %v4432_v20  ;;  %2549 = vmatpush.msrb.mxu2 %v2239_v56  ;;  %v4454_v20 = vld [vmem:[%s8662_s4 + $0x450] sm:$0xff] }
 0x2bc   : > { %v4458_v56 = vld [vmem:[%s8662_s4 + $0x470] sm:$0xff]  ;;  %2423 = vmatpush.msrb.mxu1 %v4454_v20  ;;  %v4447_v20 = vld [vmem:[%s8662_s4 + $0x418] sm:$0xff] }
 0x2bd   : > { %2494 = vmatpush.msrb.mxu0 %v4429_v51  ;;  %2550 = vmatpush.msrb.mxu2 %v2236_v44  ;;  %v2226_v44 = vld [vmem:[%s8662_s4 + $0xe8] sm:$0xff] }
 0x2be   : > { %2474 = vmatpush.msra.mxu3 %v4458_v56  ;;  %v2254_v56 = vld [vmem:[%s8662_s4 + $0x1c8] sm:$0xff] }
 0x2bf   : > { %2495 = vmatpush.msrb.mxu0 %v4426_v49  ;;  %2551 = vmatpush.msrb.mxu2 %v2233_v35  ;;  %v2256_v49 = vld [vmem:[%s8662_s4 + $0x1d8] sm:$0xff] }
 0x2c1   : > { %2496 = vmatpush.msrb.mxu0 %v4423_v46  ;;  %2552 = vmatpush.msrb.mxu2 %v2230_v52  ;;  %v4451_v46 = vld [vmem:[%s8662_s4 + $0x438] sm:$0xff] }
 0x2c2   : > { %v4455_v52 = vld [vmem:[%s8662_s4 + $0x458] sm:$0xff]  ;;  %2424 = vmatpush.msrb.mxu1 %v4451_v46  ;;  %v4444_v46 = vld [vmem:[%s8662_s4 + $0x400] sm:$0xff] }
 0x2c3   : > { %2497 = vmatpush.msrb.mxu0 %v4420_v9  ;;  %2553 = vmatpush.msrb.mxu2 %v2227_v16  ;;  %v2223_v9 = vld [vmem:[%s8662_s4 + $0xd0] sm:$0xff]  ;;  %v2253_v16 = vld [vmem:[%s8662_s4 + $0x1c0] sm:$0xff] }
 0x2c4   : > { %2475 = vmatpush.msra.mxu3 %v4455_v52  ;;  %v2251_v52 = vld [vmem:[%s8662_s4 + $0x1b0] sm:$0xff] }
 0x2c5   : > { %2498 = vmatpush.msrb.mxu0 %v4417_v60  ;;  %2554 = vmatpush.msrb.mxu2 %v2224_v27  ;;  %v2220_v27 = vld [vmem:[%s8662_s4 + $0xb8] sm:$0xff] }
 0x2c7   : > { %2499 = vmatpush.msrb.mxu0 %v4414_v50  ;;  %2555 = vmatpush.msrb.mxu2 %v2221_v37  ;;  %v2250_v50 = vld [vmem:[%s8662_s4 + $0x1a8] sm:$0xff] }
 0x2c9   : > { %2500 = vmatpush.msrb.mxu0 %v4411_v25  ;;  %2556 = vmatpush.msrb.mxu2 %v2218_v11  ;;  %v4448_v25 = vld [vmem:[%s8662_s4 + $0x420] sm:$0xff] }
 0x2ca   : > { %v4452_v11 = vld [vmem:[%s8662_s4 + $0x440] sm:$0xff]  ;;  %2425 = vmatpush.msrb.mxu1 %v4448_v25 }
 0x2cb   : > { %2501 = vmatpush.msrb.mxu0 %v4408_v7  ;;  %2557 = vmatpush.msrb.mxu2 %v2215_v43  ;;  %v2217_v7 = vld [vmem:[%s8662_s4 + $0xa0] sm:$0xff]  ;;  %v2247_v43 = vld [vmem:[%s8662_s4 + $0x190] sm:$0xff] }
 0x2cc   : > { %2476 = vmatpush.msra.mxu3 %v4452_v11  ;;  %v4497_v11 = vld [vmem:[%s8662_s4 + $0x518] sm:$0xff] }
 0x2cd   : > { %2502 = vmatpush.msrb.mxu0 %v4405_v23  ;;  %2558 = vmatpush.msrb.mxu2 %v2212_v24  ;;  %v4445_v23 = vld [vmem:[%s8662_s4 + $0x408] sm:$0xff] }
 0x2ce   : > { %v4449_v24 = vld [vmem:[%s8662_s4 + $0x428] sm:$0xff]  ;;  %2426 = vmatpush.msrb.mxu1 %v4445_v23  ;;  %v2245_v23 = vld [vmem:[%s8662_s4 + $0x180] sm:$0xff] }
 0x2cf   : > { %2503 = vmatpush.msrb.mxu0 %v4402_v57  ;;  %2559 = vmatpush.msrb.mxu2 %v2209_v12  ;;  %v2214_v57 = vld [vmem:[%s8662_s4 + $0x88] sm:$0xff]  ;;  %v4446_v12 = vld [vmem:[%s8662_s4 + $0x410] sm:$0xff] }
 0x2d0   : > { %2477 = vmatpush.msra.mxu3 %v4449_v24  ;;  %v4494_v24 = vld [vmem:[%s8662_s4 + $0x500] sm:$0xff] }
 0x2d1   : > { %2504 = vmatpush.msrb.mxu0 %v4399_v28  ;;  %2560 = vmatpush.msrb.mxu2 %v2206_v0  ;;  %v2211_v28 = vld [vmem:[%s8662_s4 + $0x70] sm:$0xff]  ;;  %v4471_v0 = vld [vmem:[%s8662_s4 + $0x4d8] sm:$0xff] }
 0x2d2   : > { %2478 = vmatpush.msra.mxu3 %v4446_v12 }
 0x2d3   : > { %2505 = vmatpush.msrb.mxu0 %v4396_v62  ;;  %2561 = vmatpush.msrb.mxu2 %v2203_v47  ;;  %v2208_v62 = vld [vmem:[%s8662_s4 + $0x58] sm:$0xff]  ;;  %v4536_v47 = vld [vmem:[%s8662_s4 + $0x650] sm:$0xff] }
 0x2d5   : > { %2562 = vmatpush.msrb.mxu2 %v2200_v8  ;;  %v4468_v8 = vld [vmem:[%s8662_s4 + $0x4c0] sm:$0xff] }
 0x2d7   : > { %2563 = vmatpush.msrb.mxu2 %v2197_v19  ;;  %v2205_v19 = vld [vmem:[%s8662_s4 + $0x40] sm:$0xff] }
 0x2e5   : > { %v2073_v17 = vpop.f32.mrf.mxu0 }
 0x2eb   : > { %v2148_v63 = vpop.f32.mrf.mxu2 }
 0x2ec   : > { %v7199_v2 = vmax.f32 %v2073_v17, %v2148_v63  ;;  %v4442_v17 = vld [vmem:[%s8662_s4 + $0x3f0] sm:$0xff]  ;;  %v4443_v63 = vld [vmem:[%s8662_s4 + $0x3f8] sm:$0xff] }
 0x2ed   : > { %v2076_v53 = vpop.f32.mrf.mxu0  ;;  %2427 = vmatpush.msrb.mxu1 %v4442_v17  ;;  %2479 = vmatpush.msra.mxu3 %v4443_v63 }
 0x2ee   : > { %v2362_v58 = vrot.slane %v7199_v2, 1 }
 0x2ef   : > { %2522 = vmatpush.msra.mxu1 %v4471_v0  ;;  %2580 = vmatpush.msrb.mxu3 %v2272_v18  ;;  %v4491_v0 = vld [vmem:[%s8662_s4 + $0x4e8] sm:$0xff] }
 0x2f0   : > { %v2234_v18 = vld [vmem:[%s8662_s4 + $0x128] sm:$0xff] }
 0x2f1   : > { %2523 = vmatpush.msra.mxu1 %v4468_v8  ;;  %v2273_v8 = vld [vmem:[%s8662_s4 + $0x260] sm:$0xff] }
 0x2f3   : > { %v2151_v10 = vpop.f32.mrf.mxu2 }
 0x2f4   : > { %v7204_v41 = vmax.f32 %v2076_v53, %v2151_v10  ;;  %v4533_v53 = vld [vmem:[%s8662_s4 + $0x638] sm:$0xff]  ;;  %v4465_v10 = vld [vmem:[%s8662_s4 + $0x4a8] sm:$0xff] }
 0x2f5   : > { %v2079_v48 = vpop.f32.mrf.mxu0  ;;  %2524 = vmatpush.msra.mxu1 %v4465_v10 }
 0x2f6   : > { %v2363_v34 = vrot.slane %v7204_v41, 1 }
 0x2f8   : > { %v7215_v5 = vsel %vm502_vm0, %v2362_v58, %v2363_v34  ;;  %v2202_v58 = vld [vmem:[%s8662_s4 + $0x28] sm:$0xff] }
 0x2f9   : > { %2402 = vmatmul.f32.vlgmr.msra.gmra.mxu0 %v7215_v5  ;;  %2454 = vmatmul.f32.vlgmr.msra.gmra.mxu2 %v7215_v5 }
 0x2fa   : > { %2652 = vmatpush.msra.mxu0 %v2244_v21  ;;  %2684 = vmatpush.msra.mxu2 %v2274_v30  ;;  %v2269_v21 = vld [vmem:[%s8662_s4 + $0x240] sm:$0xff]  ;;  %v2199_v30 = vld [vmem:[%s8662_s4 + $0x10] sm:$0xff] }
 0x2fb   : > { %v2154_v54 = vpop.f32.mrf.mxu2  ;;  %2581 = vmatpush.msrb.mxu3 %v2269_v21  ;;  %v2264_v21 = vld [vmem:[%s8662_s4 + $0x218] sm:$0xff] }
 0x2fc   : > { %v7243_v32 = vmax.f32 %v2079_v48, %v2154_v54  ;;  %2653 = vmatpush.msra.mxu0 %v2241_v13  ;;  %2685 = vmatpush.msra.mxu2 %v2271_v26  ;;  %v4462_v48 = vld [vmem:[%s8662_s4 + $0x490] sm:$0xff]  ;;  %v4566_v26 = vld [vmem:[%s8662_s4 + $0x740] sm:$0xff]  ;;  %v4563_v54 = vld [vmem:[%s8662_s4 + $0x728] sm:$0xff] }
 0x2fd   : > { %v2082_v38 = vpop.f32.mrf.mxu0  ;;  %v4524_v13 = vld [vmem:[%s8662_s4 + $0x5f0] sm:$0xff]  ;;  %2525 = vmatpush.msra.mxu1 %v4462_v48  ;;  %2582 = vmatpush.msrb.mxu3 %v2266_v6  ;;  %v2225_v6 = vld [vmem:[%s8662_s4 + $0xe0] sm:$0xff] }
 0x2fe   : > { %v2368_v14 = vrot.slane %v7243_v32, 1  ;;  %2654 = vmatpush.msra.mxu0 %v2238_v31  ;;  %2686 = vmatpush.msra.mxu2 %v2268_v45  ;;  %v4456_v31 = vld [vmem:[%s8662_s4 + $0x460] sm:$0xff]  ;;  %v2263_v45 = vld [vmem:[%s8662_s4 + $0x210] sm:$0xff] }
 0x2ff   : > { %2526 = vmatpush.msra.mxu1 %v4459_v40  ;;  %2583 = vmatpush.msrb.mxu3 %v2263_v45  ;;  %v2231_v48 = vld [vmem:[%s8662_s4 + $0x110] sm:$0xff] }
 0x300   : > { %v7265_v1 = vsel %vm502_vm0, %v2363_v34, %v2368_v14  ;;  %2655 = vmatpush.msra.mxu0 %v2235_v3  ;;  %2687 = vmatpush.msra.mxu2 %v2265_v61  ;;  %v4530_v34 = vld [vmem:[%s8662_s4 + $0x620] sm:$0xff]  ;;  %v4560_v3 = vld [vmem:[%s8662_s4 + $0x710] sm:$0xff]  ;;  %v4453_v61 = vld [vmem:[%s8662_s4 + $0x448] sm:$0xff] }
 0x301   : > { %2405 = vmatmul.f32.gmra.mxu0 %v7265_v1  ;;  %2457 = vmatmul.f32.gmra.mxu2 %v7265_v1  ;;  %v2255_v45 = vld [vmem:[%s8662_s4 + $0x1d0] sm:$0xff] }
 0x302   : > { %2656 = vmatpush.msra.mxu0 %v2232_v22  ;;  %2688 = vmatpush.msra.mxu2 %v2262_v42  ;;  %v4557_v22 = vld [vmem:[%s8662_s4 + $0x6f8] sm:$0xff]  ;;  %v4512_v42 = vld [vmem:[%s8662_s4 + $0x590] sm:$0xff] }
 0x303   : > { %v2157_v51 = vpop.f32.mrf.mxu2  ;;  %2527 = vmatpush.msra.mxu1 %v4456_v31  ;;  %2584 = vmatpush.msrb.mxu3 %v2260_v59  ;;  %v2222_v31 = vld [vmem:[%s8662_s4 + $0xc8] sm:$0xff]  ;;  %v2219_v59 = vld [vmem:[%s8662_s4 + $0xb0] sm:$0xff] }
 0x304   : > { %v7293_v35 = vmax.f32 %v2082_v38, %v2157_v51  ;;  %2657 = vmatpush.msra.mxu0 %v2229_v39  ;;  %2689 = vmatpush.msra.mxu2 %v2259_v36  ;;  %v2257_v38 = vld [vmem:[%s8662_s4 + $0x1e0] sm:$0xff]  ;;  %v4509_v36 = vld [vmem:[%s8662_s4 + $0x578] sm:$0xff] }
 0x305   : > { %2528 = vmatpush.msra.mxu1 %v4453_v61  ;;  %2585 = vmatpush.msrb.mxu3 %v2257_v38 }
 0x306   : > { %v2372_v60 = vrot.slane %v7293_v35, 1  ;;  %2658 = vmatpush.msra.mxu0 %v2226_v44  ;;  %2690 = vmatpush.msra.mxu2 %v2256_v49  ;;  %v4506_v44 = vld [vmem:[%s8662_s4 + $0x560] sm:$0xff]  ;;  %v4548_v49 = vld [vmem:[%s8662_s4 + $0x6b0] sm:$0xff] }
 0x307   : > { %2529 = vmatpush.msra.mxu1 %v4450_v4  ;;  %2586 = vmatpush.msrb.mxu3 %v2254_v56  ;;  %v2249_v4 = vld [vmem:[%s8662_s4 + $0x1a0] sm:$0xff]  ;;  %v2789_v56 = vrot.slane %v7243_v32, 2 }
 0x308   : > { %v7315_v37 = vsel %vm502_vm0, %v2368_v14, %v2372_v60  ;;  %2659 = vmatpush.msra.mxu0 %v2223_v9  ;;  %2691 = vmatpush.msra.mxu2 %v2253_v16  ;;  %v4515_v14 = vld [vmem:[%s8662_s4 + $0x5a8] sm:$0xff]  ;;  %v4545_v16 = vld [vmem:[%s8662_s4 + $0x698] sm:$0xff] }
 0x309   : > { %2408 = vmatmul.f32.gmra.mxu0 %v7315_v37  ;;  %2460 = vmatmul.f32.gmra.mxu2 %v7315_v37  ;;  %v4503_v9 = vld [vmem:[%s8662_s4 + $0x548] sm:$0xff] }
 0x30a   : > { %2660 = vmatpush.msra.mxu0 %v2220_v27  ;;  %2692 = vmatpush.msra.mxu2 %v2250_v50  ;;  %v4500_v27 = vld [vmem:[%s8662_s4 + $0x530] sm:$0xff]  ;;  %v4542_v50 = vld [vmem:[%s8662_s4 + $0x680] sm:$0xff] }
 0x30b   : > { %2530 = vmatpush.msra.mxu1 %v4447_v20  ;;  %2587 = vmatpush.msrb.mxu3 %v2251_v52  ;;  %v2210_v20 = vld [vmem:[%s8662_s4 + $0x68] sm:$0xff]  ;;  %v4532_v52 = vld [vmem:[%s8662_s4 + $0x630] sm:$0xff] }
 0x30c   : > { %2661 = vmatpush.msra.mxu0 %v2217_v7  ;;  %2693 = vmatpush.msra.mxu2 %v2247_v43  ;;  %v4539_v7 = vld [vmem:[%s8662_s4 + $0x668] sm:$0xff] }
 0x30d   : > { %2531 = vmatpush.msra.mxu1 %v4444_v46  ;;  %v2204_v46 = vld [vmem:[%s8662_s4 + $0x38] sm:$0xff] }
 0x30e   : > { %2662 = vmatpush.msra.mxu0 %v2214_v57 }
 0x310   : > { %2663 = vmatpush.msra.mxu0 %v2211_v28  ;;  %v2243_v28 = vld [vmem:[%s8662_s4 + $0x170] sm:$0xff] }
 0x311   : > { %2506 = vmatmul.f32.vlgmr.msrb.gmra.mxu0 %v7215_v5  ;;  %2564 = vmatmul.f32.vlgmr.msrb.gmra.mxu2 %v7199_v2  ;;  %v4527_v5 = vld [vmem:[%s8662_s4 + $0x608] sm:$0xff] }
 0x312   : > { %2664 = vmatpush.msra.mxu0 %v2208_v62  ;;  %2858 = vmatpush.msrb.mxu2 %v4536_v47  ;;  %v2240_v47 = vld [vmem:[%s8662_s4 + $0x158] sm:$0xff] }
 0x314   : > { %2665 = vmatpush.msra.mxu0 %v2205_v19  ;;  %2859 = vmatpush.msrb.mxu2 %v4533_v53  ;;  %v2237_v19 = vld [vmem:[%s8662_s4 + $0x140] sm:$0xff]  ;;  %v2270_v53 = vld [vmem:[%s8662_s4 + $0x248] sm:$0xff] }
 0x316   : > { %2666 = vmatpush.msra.mxu0 %v2202_v58  ;;  %2860 = vmatpush.msrb.mxu2 %v4530_v34  ;;  %v2267_v58 = vld [vmem:[%s8662_s4 + $0x230] sm:$0xff] }
 0x318   : > { %2667 = vmatpush.msra.mxu0 %v2199_v30  ;;  %2861 = vmatpush.msrb.mxu2 %v4527_v5 }
 0x319   : > { %2509 = vmatmul.f32.gmra.mxu0 %v7265_v1  ;;  %2567 = vmatmul.f32.gmra.mxu2 %v7204_v41  ;;  %v4554_v1 = vld [vmem:[%s8662_s4 + $0x6e0] sm:$0xff] }
 0x31a   : > { %2862 = vmatpush.msrb.mxu2 %v4524_v13  ;;  %2890 = vmatpush.msrb.mxu0 %v4566_v26  ;;  %v2228_v13 = vld [vmem:[%s8662_s4 + $0xf8] sm:$0xff]  ;;  %v2261_v26 = vld [vmem:[%s8662_s4 + $0x200] sm:$0xff] }
 0x31b   : > { %v2102_v29 = vpop.f32.mrf.mxu1 }
 0x31c   : > { %2863 = vmatpush.msrb.mxu2 %v4521_v15  ;;  %2891 = vmatpush.msrb.mxu0 %v4563_v54  ;;  %v2258_v15 = vld [vmem:[%s8662_s4 + $0x1e8] sm:$0xff] }
 0x31e   : > { %2864 = vmatpush.msrb.mxu2 %v4518_v33  ;;  %2892 = vmatpush.msrb.mxu0 %v4560_v3  ;;  %v2783_v33 = vrot.slane %v7199_v2, 2  ;;  %v2784_v3 = vrot.slane %v7204_v41, 2 }
 0x320   : > { %2865 = vmatpush.msrb.mxu2 %v4515_v14  ;;  %2893 = vmatpush.msrb.mxu0 %v4557_v22  ;;  %v2252_v14 = vld [vmem:[%s8662_s4 + $0x1b8] sm:$0xff]  ;;  %v7612_v38 = vsel %vm906_vm2, %v2783_v33, %v2784_v3  ;;  %v4528_v33 = vld [vmem:[%s8662_s4 + $0x610] sm:$0xff] }
 0x321   : > { %v2177_v39 = vpop.f32.mrf.mxu3  ;;  %2512 = vmatmul.f32.gmra.mxu0 %v7315_v37  ;;  %2570 = vmatmul.f32.gmra.mxu2 %v7243_v32  ;;  %v2248_v37 = vld [vmem:[%s8662_s4 + $0x198] sm:$0xff] }
 0x322   : > { %2866 = vmatpush.msrb.mxu2 %v4512_v42  ;;  %2894 = vmatpush.msrb.mxu0 %v4554_v1  ;;  %v7484_v60 = vmax.f32 %v2102_v29, %v2177_v39  ;;  %v2216_v1 = vld [vmem:[%s8662_s4 + $0x98] sm:$0xff] }
 0x323   : > { %v2105_v51 = vpop.f32.mrf.mxu1  ;;  %2588 = vmatpush.msrb.mxu3 %v2248_v37  ;;  %v4529_v37 = vld [vmem:[%s8662_s4 + $0x618] sm:$0xff] }
 0x324   : > { %2867 = vmatpush.msrb.mxu2 %v4509_v36  ;;  %2895 = vmatpush.msrb.mxu0 %v4551_v55  ;;  %v2365_v57 = vrot.slane %v7484_v60, 1  ;;  %v2786_v42 = vrot.slane %v7484_v60, 2  ;;  %v2213_v36 = vld [vmem:[%s8662_s4 + $0x80] sm:$0xff]  ;;  %v2246_v55 = vld [vmem:[%s8662_s4 + $0x188] sm:$0xff] }
 0x325   : > { %2589 = vmatpush.msrb.mxu3 %v2245_v23  ;;  %v2793_v23 = vrot.slane %v7293_v35, 2  ;;  %v4562_v35 = vld [vmem:[%s8662_s4 + $0x720] sm:$0xff] }
 0x326   : > { %2868 = vmatpush.msrb.mxu2 %v4506_v44  ;;  %2896 = vmatpush.msrb.mxu0 %v4548_v49  ;;  %v2207_v44 = vld [vmem:[%s8662_s4 + $0x50] sm:$0xff]  ;;  %v4535_v49 = vld [vmem:[%s8662_s4 + $0x648] sm:$0xff] }
 0x328   : > { %2869 = vmatpush.msrb.mxu2 %v4503_v9  ;;  %2897 = vmatpush.msrb.mxu0 %v4545_v16  ;;  %v7648_v9 = vsel %vm906_vm2, %v2784_v3, %v2789_v56  ;;  %v4564_v3 = vld [vmem:[%s8662_s4 + $0x730] sm:$0xff] }
 0x329   : > { %v2180_v25 = vpop.f32.mrf.mxu3  ;;  %2668 = vmatmul.f32.vlgmr.msra.gmra.mxu0 %v7199_v2  ;;  %4487 = vmatmul.msk.f32.vlgmr.msra.gmra.mxu2 %vm2379_vm5, %v7484_v60 }
 0x32a   : > { %v7504_v43 = vmax.f32 %v2105_v51, %v2180_v25  ;;  %2870 = vmatpush.msrb.mxu2 %v4500_v27  ;;  %2898 = vmatpush.msrb.mxu0 %v4542_v50  ;;  %v7656_v27 = vld [vmem:[%s8667_s9 + $0x3] sm:$0x7] }
 0x32b   : > { %v2108_v12 = vpop.f32.mrf.mxu1  ;;  %v2201_v50 = vld [vmem:[%s8662_s4 + $0x20] sm:$0xff]  ;;  %v2974_v25 = vperm.slane %v7656_v27, 1 }
 0x32c   : > { %v2366_v17 = vrot.slane %v7504_v43, 1  ;;  %2871 = vmatpush.msrb.mxu2 %v4497_v11  ;;  %2899 = vmatpush.msrb.mxu0 %v4539_v7  ;;  %v2787_v61 = vrot.slane %v7504_v43, 2  ;;  %v2198_v11 = vld [vmem:[%s8662_s4 + $0x8] sm:$0xff]  ;;  %v4526_v7 = vld [vmem:[%s8662_s4 + $0x600] sm:$0xff] }
 0x32d   : > { %2978 = vrot.lane.b32.xlu0 %v2974_v25, %s4882_s12 }
 0x32e   : > { %v7521_v62 = vsel %vm502_vm0, %v2365_v57, %v2366_v17  ;;  %2872 = vmatpush.msrb.mxu2 %v4494_v24  ;;  %v7615_v39 = vsel %vm906_vm2, %v2786_v42, %v2787_v61  ;;  %v4565_v57 = vld [vmem:[%s8662_s4 + $0x738] sm:$0xff]  ;;  %v4516_v42 = vld [vmem:[%s8662_s4 + $0x5b0] sm:$0xff] }
 0x32f   : > { %4472 = vmatmul.msk.f32.vlgmr.msrb.gmra.mxu1 %vm2379_vm5, %v7521_v62  ;;  %4475 = vmatmul.msk.f32.vlgmr.msra.gmra.mxu3 %vm2379_vm5, %v7521_v62 }
 0x330   : > { %2600 = vmatpush.msrb.mxu1 %v2243_v28  ;;  %2873 = vmatpush.msrb.mxu2 %v4491_v0  ;;  %v2975_v28 = vperm.slane %v7656_v27, 2  ;;  %v7695_v0 = vsel %vm906_vm2, %v2789_v56, %v2793_v23  ;;  %v4504_v56 = vld [vmem:[%s8662_s4 + $0x550] sm:$0xff] }
 0x331   : > { %v2183_v63 = vpop.f32.mrf.mxu3  ;;  %2671 = vmatmul.f32.gmra.mxu0 %v7204_v41  ;;  %4488 = vmatmul.msk.f32.gmra.mxu2 %vm2379_vm5, %v7504_v43 }
 0x332   : > { %v7542_v10 = vmax.f32 %v2108_v12, %v2183_v63  ;;  %2601 = vmatpush.msrb.mxu1 %v2240_v47  ;;  %2632 = vmatpush.msra.mxu3 %v2273_v8  ;;  %v4520_v12 = vld [vmem:[%s8662_s4 + $0x5d0] sm:$0xff]  ;;  %v4559_v47 = vld [vmem:[%s8662_s4 + $0x708] sm:$0xff]  ;;  %v4517_v8 = vld [vmem:[%s8662_s4 + $0x5b8] sm:$0xff] }
 0x333   : > { %v2111_v5 = vpop.f32.mrf.mxu1  ;;  %v4556_v63 = vld [vmem:[%s8662_s4 + $0x6f0] sm:$0xff] }
 0x334   : > { %v2370_v34 = vrot.slane %v7542_v10, 1  ;;  %2602 = vmatpush.msrb.mxu1 %v2237_v19  ;;  %2633 = vmatpush.msra.mxu3 %v2270_v53  ;;  %v2791_v51 = vrot.slane %v7542_v10, 2  ;;  %v4514_v19 = vld [vmem:[%s8662_s4 + $0x5a0] sm:$0xff]  ;;  %v4553_v53 = vld [vmem:[%s8662_s4 + $0x6d8] sm:$0xff] }
 0x335   : > { %2980 = vrot.lane.b32.xlu0 %v2975_v28, %s4882_s12  ;;  %v3060_v28 = vld [vmem:[%s8663_s5 + $0x1b0] sm:$0xff] }
 0x336   : > { %v7558_v30 = vsel %vm502_vm0, %v2366_v17, %v2370_v34  ;;  %2603 = vmatpush.msrb.mxu1 %v2234_v18  ;;  %2634 = vmatpush.msra.mxu3 %v2267_v58  ;;  %v7651_v16 = vsel %vm906_vm2, %v2787_v61, %v2791_v51  ;;  %v4523_v17 = vld [vmem:[%s8662_s4 + $0x5e8] sm:$0xff]  ;;  %v4550_v58 = vld [vmem:[%s8662_s4 + $0x6c0] sm:$0xff]  ;;  %v4525_v61 = vld [vmem:[%s8662_s4 + $0x5f8] sm:$0xff] }
 0x337   : > { %4473 = vmatmul.msk.f32.gmra.mxu1 %vm2379_vm5, %v7558_v30  ;;  %4476 = vmatmul.msk.f32.gmra.mxu3 %vm2379_vm5, %v7558_v30  ;;  %v4511_v18 = vld [vmem:[%s8662_s4 + $0x588] sm:$0xff] }
 0x338   : > { %2604 = vmatpush.msrb.mxu1 %v2231_v48  ;;  %2635 = vmatpush.msra.mxu3 %v2264_v21  ;;  %v4547_v48 = vld [vmem:[%s8662_s4 + $0x6a8] sm:$0xff]  ;;  %v4505_v21 = vld [vmem:[%s8662_s4 + $0x558] sm:$0xff] }
 0x339   : > { %v2186_v40 = vpop.f32.mrf.mxu3  ;;  %2674 = vmatmul.f32.gmra.mxu0 %v7243_v32  ;;  %4489 = vmatmul.msk.f32.gmra.mxu2 %vm2379_vm5, %v7542_v10 }
 0x33a   : > { %v7579_v54 = vmax.f32 %v2111_v5, %v2186_v40  ;;  %2605 = vmatpush.msrb.mxu1 %v2228_v13  ;;  %2636 = vmatpush.msra.mxu3 %v2261_v26  ;;  %v4502_v5 = vld [vmem:[%s8662_s4 + $0x540] sm:$0xff]  ;;  %v4541_v13 = vld [vmem:[%s8662_s4 + $0x678] sm:$0xff]  ;;  %v4499_v26 = vld [vmem:[%s8662_s4 + $0x528] sm:$0xff] }
 0x33b   : > { %v4538_v40 = vld [vmem:[%s8662_s4 + $0x660] sm:$0xff] }
 0x33c   : > { %v2374_v29 = vrot.slane %v7579_v54, 1  ;;  %2606 = vmatpush.msrb.mxu1 %v2225_v6  ;;  %2637 = vmatpush.msra.mxu3 %v2258_v15  ;;  %v2795_v24 = vrot.slane %v7579_v54, 2  ;;  %v4496_v6 = vld [vmem:[%s8662_s4 + $0x510] sm:$0xff]  ;;  %v4537_v15 = vld [vmem:[%s8662_s4 + $0x658] sm:$0xff]  ;;  %v4490_v54 = vld [vmem:[%s8662_s4 + $0x4e0] sm:$0xff] }
 0x33e   : > { %v7598_v22 = vsel %vm502_vm0, %v2370_v34, %v2374_v29  ;;  %2607 = vmatpush.msrb.mxu1 %v2222_v31  ;;  %2638 = vmatpush.msra.mxu3 %v2255_v45  ;;  %v4508_v34 = vld [vmem:[%s8662_s4 + $0x570] sm:$0xff]  ;;  %v2973_v31 = vperm.slane %v7656_v27, 0  ;;  %v4531_v45 = vld [vmem:[%s8662_s4 + $0x628] sm:$0xff] }
 0x33f   : > { %4474 = vmatmul.msk.f32.gmra.mxu1 %vm2379_vm5, %v7598_v22  ;;  %4477 = vmatmul.msk.f32.gmra.mxu3 %vm2379_vm5, %v7598_v22  ;;  %v4567_v29 = vld [vmem:[%s8662_s4 + $0x748] sm:$0xff] }
 0x340   : > { %2608 = vmatpush.msrb.mxu1 %v2219_v59  ;;  %2639 = vmatpush.msra.mxu3 %v2252_v14  ;;  %v4558_v59 = vld [vmem:[%s8662_s4 + $0x700] sm:$0xff]  ;;  %v4519_v14 = vld [vmem:[%s8662_s4 + $0x5c8] sm:$0xff] }
 0x341   : > { %2874 = vmatmul.f32.vlgmr.msrb.gmra.mxu2 %v7612_v38  ;;  %4571 = vmatmul.msk.f32.vlgmr.msrb.gmra.mxu0 %vm2379_vm5, %v7615_v39 }
 0x342   : > { %2609 = vmatpush.msrb.mxu1 %v2216_v1  ;;  %2640 = vmatpush.msra.mxu3 %v2249_v4  ;;  %v4552_v1 = vld [vmem:[%s8662_s4 + $0x6d0] sm:$0xff]  ;;  %v4513_v4 = vld [vmem:[%s8662_s4 + $0x598] sm:$0xff] }
 0x343   : > { %2976 = vrot.lane.b32.xlu1 %v2973_v31, %s4882_s12  ;;  %v3048_v31 = vld [vmem:[%s8663_s5 + $0x150] sm:$0xff] }
 0x344   : > { %2610 = vmatpush.msrb.mxu1 %v2213_v36  ;;  %2641 = vmatpush.msra.mxu3 %v2246_v55  ;;  %v4546_v36 = vld [vmem:[%s8662_s4 + $0x6a0] sm:$0xff]  ;;  %v4507_v55 = vld [vmem:[%s8662_s4 + $0x568] sm:$0xff] }
 0x346   : > { %2611 = vmatpush.msrb.mxu1 %v2210_v20  ;;  %v4543_v20 = vld [vmem:[%s8662_s4 + $0x688] sm:$0xff] }
 0x347   : > { %4478 = vmatmul.msk.f32.vlgmr.msra.gmra.mxu1 %vm2379_vm5, %v7521_v62  ;;  %4481 = vmatmul.msk.f32.vlgmr.msrb.gmra.mxu3 %vm2379_vm5, %v7484_v60  ;;  %v7698_v62 = vsel %vm906_vm2, %v2791_v51, %v2795_v24  ;;  %v4540_v51 = vld [vmem:[%s8662_s4 + $0x670] sm:$0xff] }
 0x348   : > { %2612 = vmatpush.msrb.mxu1 %v2207_v44  ;;  %2806 = vmatpush.msrb.mxu3 %v4535_v49  ;;  %v4501_v44 = vld [vmem:[%s8662_s4 + $0x538] sm:$0xff]  ;;  %v4498_v49 = vld [vmem:[%s8662_s4 + $0x520] sm:$0xff] }
 0x349   : > { %2877 = vmatmul.f32.gmra.mxu2 %v7648_v9  ;;  %4572 = vmatmul.msk.f32.gmra.mxu0 %vm2379_vm5, %v7651_v16 }
 0x34a   : > { %2613 = vmatpush.msrb.mxu1 %v2204_v46  ;;  %2807 = vmatpush.msrb.mxu3 %v4532_v52  ;;  %v4495_v46 = vld [vmem:[%s8662_s4 + $0x508] sm:$0xff]  ;;  %v4492_v52 = vld [vmem:[%s8662_s4 + $0x4f0] sm:$0xff] }
 0x34c   : > { %2614 = vmatpush.msrb.mxu1 %v2201_v50  ;;  %2808 = vmatpush.msrb.mxu3 %v4529_v37 }
 0x34e   : > { %2615 = vmatpush.msrb.mxu1 %v2198_v11  ;;  %2809 = vmatpush.msrb.mxu3 %v4526_v7 }
 0x34f   : > { %4479 = vmatmul.msk.f32.gmra.mxu1 %vm2379_vm5, %v7558_v30  ;;  %4482 = vmatmul.msk.f32.gmra.mxu3 %vm2379_vm5, %v7504_v43  ;;  %v4544_v30 = vld [vmem:[%s8662_s4 + $0x690] sm:$0xff] }
 0x350   : > { %2838 = vmatpush.msra.mxu1 %v4565_v57  ;;  %2810 = vmatpush.msrb.mxu3 %v4523_v17  ;;  %v3064_v17 = vld [vmem:[%s8663_s5 + $0x1d0] sm:$0xff] }
 0x351   : > { %2880 = vmatmul.f32.gmra.mxu2 %v7695_v0  ;;  %4573 = vmatmul.msk.f32.gmra.mxu0 %vm2379_vm5, %v7698_v62 }
 0x352   : > { %2839 = vmatpush.msra.mxu1 %v4562_v35  ;;  %2811 = vmatpush.msrb.mxu3 %v4520_v12  ;;  %v3062_v35 = vld [vmem:[%s8663_s5 + $0x1c0] sm:$0xff] }
 0x354   : > { %2840 = vmatpush.msra.mxu1 %v4559_v47  ;;  %2812 = vmatpush.msrb.mxu3 %v4517_v8  ;;  %v3036_v8 = vld [vmem:[%s8663_s5 + $0xf0] sm:$0xff] }
 0x355   : > { %3103 = vmatpush.msra.mxu0 %v3036_v8 }
 0x356   : > { %2841 = vmatpush.msra.mxu1 %v4556_v63  ;;  %2813 = vmatpush.msrb.mxu3 %v4514_v19  ;;  %v3058_v63 = vld [vmem:[%s8663_s5 + $0x1a0] sm:$0xff] }
 0x357   : > { %4480 = vmatmul.msk.f32.gmra.mxu1 %vm2379_vm5, %v7598_v22  ;;  %4483 = vmatmul.msk.f32.gmra.mxu3 %vm2379_vm5, %v7542_v10  ;;  %v4555_v22 = vld [vmem:[%s8662_s4 + $0x6e8] sm:$0xff] }
 0x358   : > { %2842 = vmatpush.msra.mxu1 %v4553_v53  ;;  %2814 = vmatpush.msrb.mxu3 %v4511_v18  ;;  %v3034_v18 = vld [vmem:[%s8663_s5 + $0xe0] sm:$0xff] }
 0x359   : > { %3104 = vmatpush.msra.mxu0 %v3034_v18  ;;  %v3015_v18 = vld [vmem:[%s8663_s5 + $0x48] sm:$0xff] }
 0x35a   : > { %2843 = vmatpush.msra.mxu1 %v4550_v58  ;;  %2815 = vmatpush.msrb.mxu3 %v4508_v34  ;;  %v3056_v58 = vld [vmem:[%s8663_s5 + $0x190] sm:$0xff] }
 0x35b   : > { %v3032_v34 = vld [vmem:[%s8663_s5 + $0xd0] sm:$0xff] }
 0x35c   : > { %2844 = vmatpush.msra.mxu1 %v4547_v48  ;;  %2816 = vmatpush.msrb.mxu3 %v4505_v21  ;;  %v3054_v48 = vld [vmem:[%s8663_s5 + $0x180] sm:$0xff] }
 0x35d   : > { %3105 = vmatpush.msra.mxu0 %v3032_v34 }
 0x35e   : > { %2845 = vmatpush.msra.mxu1 %v4544_v30  ;;  %2817 = vmatpush.msrb.mxu3 %v4502_v5  ;;  %v3030_v30 = vld [vmem:[%s8663_s5 + $0xc0] sm:$0xff]  ;;  %v3052_v5 = vld [vmem:[%s8663_s5 + $0x170] sm:$0xff] }
 0x35f   : > { %2616 = vmatmul.f32.vlgmr.msrb.gmra.mxu1 %v7199_v2  ;;  %4484 = vmatmul.msk.f32.vlgmr.msra.gmra.mxu3 %vm2379_vm5, %v7484_v60  ;;  %v4493_v2 = vld [vmem:[%s8662_s4 + $0x4f8] sm:$0xff]  ;;  %v4534_v60 = vld [vmem:[%s8662_s4 + $0x640] sm:$0xff] }
 0x360   : > { %2846 = vmatpush.msra.mxu1 %v4541_v13  ;;  %2818 = vmatpush.msrb.mxu3 %v4499_v26  ;;  %v3037_v26 = vld [vmem:[%s8663_s5 + $0xf8] sm:$0xff] }
 0x361   : > { %3106 = vmatpush.msra.mxu0 %v3030_v30  ;;  %v3013_v30 = vld [vmem:[%s8663_s5 + $0x38] sm:$0xff] }
 0x362   : > { %2847 = vmatpush.msra.mxu1 %v4538_v40  ;;  %2819 = vmatpush.msrb.mxu3 %v4496_v6  ;;  %v3028_v6 = vld [vmem:[%s8663_s5 + $0xb0] sm:$0xff] }
 0x363   : > { %3107 = vmatpush.msra.mxu0 %v3028_v6  ;;  %v3067_v6 = vld [vmem:[%s8663_s5 + $0x1e8] sm:$0xff] }
 0x364   : > { %2910 = vmatpush.msrb.mxu1 %v4537_v15  ;;  %2820 = vmatpush.msrb.mxu3 %v4493_v2  ;;  %v3050_v15 = vld [vmem:[%s8663_s5 + $0x160] sm:$0xff]  ;;  %v3035_v2 = vld [vmem:[%s8663_s5 + $0xe8] sm:$0xff] }
 0x366   : > { %2911 = vmatpush.msrb.mxu1 %v4534_v60  ;;  %2821 = vmatpush.msrb.mxu3 %v4490_v54  ;;  %v3026_v54 = vld [vmem:[%s8663_s5 + $0xa0] sm:$0xff] }
 0x367   : > { %2619 = vmatmul.f32.gmra.mxu1 %v7204_v41  ;;  %4485 = vmatmul.msk.f32.gmra.mxu3 %vm2379_vm5, %v7504_v43  ;;  %v4561_v41 = vld [vmem:[%s8662_s4 + $0x718] sm:$0xff]  ;;  %v4522_v43 = vld [vmem:[%s8662_s4 + $0x5e0] sm:$0xff] }
 0x368   : > { %2912 = vmatpush.msrb.mxu1 %v4531_v45  ;;  %2942 = vmatpush.msra.mxu3 %v4567_v29  ;;  %v3033_v45 = vld [vmem:[%s8663_s5 + $0xd8] sm:$0xff] }
 0x369   : > { %3108 = vmatpush.msra.mxu0 %v3026_v54  ;;  %v3065_v54 = vld [vmem:[%s8663_s5 + $0x1d8] sm:$0xff] }
 0x36a   : > { %2913 = vmatpush.msrb.mxu1 %v4528_v33  ;;  %2943 = vmatpush.msra.mxu3 %v4564_v3  ;;  %v3024_v3 = vld [vmem:[%s8663_s5 + $0x90] sm:$0xff] }
 0x36b   : > { %3109 = vmatpush.msra.mxu0 %v3024_v3  ;;  %v3007_v3 = vld [vmem:[%s8663_s5 + $0x8] sm:$0xff] }
 0x36c   : > { %2914 = vmatpush.msrb.mxu1 %v4525_v61  ;;  %2944 = vmatpush.msra.mxu3 %v4561_v41  ;;  %v3046_v61 = vld [vmem:[%s8663_s5 + $0x140] sm:$0xff] }
 0x36e   : > { %2915 = vmatpush.msrb.mxu1 %v4522_v43  ;;  %2945 = vmatpush.msra.mxu3 %v4558_v59  ;;  %v3031_v43 = vld [vmem:[%s8663_s5 + $0xc8] sm:$0xff]  ;;  %v3022_v59 = vld [vmem:[%s8663_s5 + $0x80] sm:$0xff] }
 0x36f   : > { %2622 = vmatmul.f32.gmra.mxu1 %v7243_v32  ;;  %4486 = vmatmul.msk.f32.gmra.mxu3 %vm2379_vm5, %v7542_v10  ;;  %v4549_v32 = vld [vmem:[%s8662_s4 + $0x6b8] sm:$0xff]  ;;  %v4510_v10 = vld [vmem:[%s8662_s4 + $0x580] sm:$0xff] }
 0x370   : > { %2916 = vmatpush.msrb.mxu1 %v4519_v14  ;;  %2946 = vmatpush.msra.mxu3 %v4555_v22  ;;  %v3044_v14 = vld [vmem:[%s8663_s5 + $0x130] sm:$0xff] }
 0x371   : > { %3110 = vmatpush.msra.mxu0 %v3022_v59  ;;  %v4645_v59 = vld [vmem:[%s8663_s5 + $0x4b0] sm:$0xff] }
 0x372   : > { %2917 = vmatpush.msrb.mxu1 %v4516_v42  ;;  %2947 = vmatpush.msra.mxu3 %v4552_v1  ;;  %v3029_v42 = vld [vmem:[%s8663_s5 + $0xb8] sm:$0xff] }
 0x374   : > { %2918 = vmatpush.msrb.mxu1 %v4513_v4  ;;  %2948 = vmatpush.msra.mxu3 %v4549_v32  ;;  %v3020_v4 = vld [vmem:[%s8663_s5 + $0x70] sm:$0xff]  ;;  %v3042_v32 = vld [vmem:[%s8663_s5 + $0x120] sm:$0xff] }
 0x375   : > { %3111 = vmatpush.msra.mxu0 %v3020_v4  ;;  %v4643_v4 = vld [vmem:[%s8663_s5 + $0x4a0] sm:$0xff] }
 0x376   : > { %2919 = vmatpush.msrb.mxu1 %v4510_v10  ;;  %2949 = vmatpush.msra.mxu3 %v4546_v36  ;;  %v7859_v50 = vpop.f32.mrf.mxu0  ;;  %v3027_v10 = vld [vmem:[%s8663_s5 + $0xa8] sm:$0xff] }
 0x377   : > { %2822 = vmatmul.f32.vlgmr.msrb.gmra.mxu3 %v7612_v38  ;;  %4568 = vmatmul.msk.f32.vlgmr.msra.gmra.mxu1 %vm2379_vm5, %v7615_v39 }
 0x378   : > { %2920 = vmatpush.msrb.mxu1 %v4507_v55  ;;  %2950 = vmatpush.msra.mxu3 %v4543_v20  ;;  %v3018_v55 = vld [vmem:[%s8663_s5 + $0x60] sm:$0xff]  ;;  %v3040_v20 = vld [vmem:[%s8663_s5 + $0x110] sm:$0xff] }
 0x379   : > { %3112 = vmatpush.msra.mxu0 %v3018_v55  ;;  %v3082_v55 = vld [vmem:[%s8663_s5 + $0x260] sm:$0xff] }
 0x37a   : > { %2921 = vmatpush.msrb.mxu1 %v4504_v56  ;;  %2951 = vmatpush.msra.mxu3 %v4540_v51  ;;  %v3025_v51 = vld [vmem:[%s8663_s5 + $0x98] sm:$0xff] }
 0x37c   : > { %2922 = vmatpush.msrb.mxu1 %v4501_v44  ;;  %v7857_v27 = vpop.f32.mrf.mxu2  ;;  %v3016_v44 = vld [vmem:[%s8663_s5 + $0x50] sm:$0xff] }
 0x37d   : > { %3113 = vmatpush.msra.mxu0 %v3016_v44 }
 0x37e   : > { %2923 = vmatpush.msrb.mxu1 %v4498_v49  ;;  %v2406_v25 = vpop.f32.mrf.mxu0  ;;  %v3038_v49 = vld [vmem:[%s8663_s5 + $0x100] sm:$0xff] }
 0x37f   : > { %2825 = vmatmul.f32.gmra.mxu3 %v7648_v9  ;;  %4569 = vmatmul.msk.f32.gmra.mxu1 %vm2379_vm5, %v7651_v16 }
 0x380   : > { %2924 = vmatpush.msrb.mxu1 %v4495_v46 }
 0x382   : > { %2925 = vmatpush.msrb.mxu1 %v4492_v52 }
 0x384   : > { %v7864_v37 = vpop.f32.mrf.mxu2  ;;  %3181 = vmatpush.msra.mxu1 %v3037_v26  ;;  %v3092_v26 = vld [vmem:[%s8663_s5 + $0x2b0] sm:$0xff] }
 0x385   : > { %3159 = vmatpush.msrb.mxu3 %v3092_v26 }
 0x386   : > { %v2409_v7 = vpop.f32.mrf.mxu0  ;;  %3182 = vmatpush.msra.mxu1 %v3035_v2 }
 0x387   : > { %2828 = vmatmul.f32.gmra.mxu3 %v7695_v0  ;;  %4570 = vmatmul.msk.f32.gmra.mxu1 %vm2379_vm5, %v7698_v62 }
 0x388   : > { %3183 = vmatpush.msra.mxu1 %v3033_v45 }
 0x38a   : > { %3184 = vmatpush.msra.mxu1 %v3031_v43  ;;  %v3086_v43 = vld [vmem:[%s8663_s5 + $0x280] sm:$0xff] }
 0x38c   : > { %v7869_v11 = vpop.f32.mrf.mxu2  ;;  %3185 = vmatpush.msra.mxu1 %v3029_v42  ;;  %v3061_v42 = vld [vmem:[%s8663_s5 + $0x1b8] sm:$0xff] }
 0x38e   : > { %v7879_v24 = vpop.f32.mrf.mxu0  ;;  %3186 = vmatpush.msra.mxu1 %v3027_v10  ;;  %v3059_v10 = vld [vmem:[%s8663_s5 + $0x1a8] sm:$0xff] }
 0x38f   : > { %2926 = vmatmul.f32.vlgmr.msrb.gmra.mxu1 %v7612_v38  ;;  %4574 = vmatmul.msk.f32.vlgmr.msra.gmra.mxu3 %vm2379_vm5, %v7615_v39  ;;  %v3068_v39 = vld [vmem:[%s8663_s5 + $0x1f0] sm:$0xff] }
 0x390   : > { %3129 = vmatpush.msra.mxu2 %v3068_v39  ;;  %3187 = vmatpush.msra.mxu1 %v3025_v51  ;;  %v3021_v39 = vld [vmem:[%s8663_s5 + $0x78] sm:$0xff] }
 0x394   : > { %v7877_v23 = vpop.f32.mrf.mxu2 }
 0x396   : > { %v7884_v57 = vpop.f32.mrf.mxu0 }
 0x397   : > { %2929 = vmatmul.f32.gmra.mxu1 %v7648_v9  ;;  %4575 = vmatmul.msk.f32.gmra.mxu3 %vm2379_vm5, %v7651_v16  ;;  %v3066_v16 = vld [vmem:[%s8663_s5 + $0x1e0] sm:$0xff] }
 0x398   : > { %3130 = vmatpush.msra.mxu2 %v3066_v16 }
 0x39a   : > { %3131 = vmatpush.msra.mxu2 %v3064_v17  ;;  %v3012_v17 = vld [vmem:[%s8663_s5 + $0x30] sm:$0xff] }
 0x39c   : > { %v2568_v38 = vpop.f32.mrf.mxu2  ;;  %3132 = vmatpush.msra.mxu2 %v3062_v35  ;;  %v3019_v35 = vld [vmem:[%s8663_s5 + $0x68] sm:$0xff] }
 0x39e   : > { %3133 = vmatpush.msra.mxu2 %v3060_v28  ;;  %v7908_v19 = vpop.f32.mrf.mxu0 }
 0x39f   : > { %2932 = vmatmul.f32.gmra.mxu1 %v7695_v0  ;;  %4576 = vmatmul.msk.f32.gmra.mxu3 %vm2379_vm5, %v7698_v62  ;;  %v8055_v2 = vpop.permute.xlu0 %2978 }
 0x3a0   : > { %3134 = vmatpush.msra.mxu2 %v3058_v63 }
 0x3a2   : > { %3135 = vmatpush.msra.mxu2 %v3056_v58  ;;  %v3006_v58 = vld [vmem:[%s8663_s5] sm:$0xff] }
 0x3a4   : > { %v2571_v0 = vpop.f32.mrf.mxu2  ;;  %3136 = vmatpush.msra.mxu2 %v3054_v48 }
 0x3a6   : > { %3137 = vmatpush.msra.mxu2 %v3052_v5  ;;  %v2669_v33 = vpop.f32.mrf.mxu0  ;;  %v3069_v5 = vld [vmem:[%s8663_s5 + $0x1f8] sm:$0xff] }
 0x3a7   : > { %v8108_v44 = vpop.permute.xlu0 %2980 }
 0x3a8   : > { %3138 = vmatpush.msra.mxu2 %v3050_v15 }
 0x3aa   : > { %3139 = vmatpush.msra.mxu2 %v3048_v31  ;;  %v3088_v31 = vld [vmem:[%s8663_s5 + $0x290] sm:$0xff] }
 0x3ac   : > { %v7886_v9 = vpop.f32.mrf.mxu1  ;;  %v2695_v60 = vpop.f32.mrf.mxu2  ;;  %3140 = vmatpush.msra.mxu2 %v3046_v61  ;;  %v3063_v61 = vld [vmem:[%s8663_s5 + $0x1c8] sm:$0xff] }
 0x3ae   : > { %3141 = vmatpush.msra.mxu2 %v3044_v14  ;;  %v2672_v52 = vpop.f32.mrf.mxu0 }
 0x3b0   : > { %3142 = vmatpush.msra.mxu2 %v3042_v32 }
 0x3b2   : > { %v7897_v12 = vpop.f32.mrf.mxu3  ;;  %3143 = vmatpush.msra.mxu2 %v3040_v20  ;;  %v4641_v20 = vld [vmem:[%s8663_s5 + $0x490] sm:$0xff] }
 0x3b4   : > { %v2432_v62 = vpop.f32.mrf.mxu1  ;;  %v2698_v56 = vpop.f32.mrf.mxu2  ;;  %3144 = vmatpush.msra.mxu2 %v3038_v49 }
 0x3b5   : > { %v2433_v47 = vadd.f32 %v2432_v62, %v2406_v25  ;;  %v3008_v62 = vld [vmem:[%s8663_s5 + $0x10] sm:$0xff] }
 0x3b6   : > { %v2675_v34 = vpop.f32.mrf.mxu0 }
 0x3b7   : > { %v7910_v53 = vadd.f32 %v2568_v38, %v2433_v47 }
 0x3ba   : > { %v7924_v21 = vpop.f32.mrf.mxu3 }
 0x3bc   : > { %v2435_v13 = vpop.f32.mrf.mxu1  ;;  %v2701_v8 = vpop.f32.mrf.mxu2 }
 0x3bd   : > { %v2436_v40 = vadd.f32 %v2435_v13, %v2409_v7  ;;  %v3023_v7 = vld [vmem:[%s8663_s5 + $0x88] sm:$0xff] }
 0x3be   : > { %3188 = vmatpush.msra.mxu1 %v3023_v7  ;;  %v2901_v32 = vpop.f32.mrf.mxu0 }
 0x3bf   : > { %v7953_v29 = vadd.f32 %v2571_v0, %v2436_v40  ;;  %v3010_v0 = vld [vmem:[%s8663_s5 + $0x20] sm:$0xff]  ;;  %v3011_v40 = vld [vmem:[%s8663_s5 + $0x28] sm:$0xff] }
 0x3c0   : > { %3189 = vmatpush.msra.mxu1 %v3021_v39  ;;  %v3093_v39 = vld [vmem:[%s8663_s5 + $0x2b8] sm:$0xff] }
 0x3c1   : > { %3237 = vmatpush.msrb.mxu2 %v3093_v39  ;;  %v3039_v39 = vld [vmem:[%s8663_s5 + $0x108] sm:$0xff] }
 0x3c2   : > { %v7961_v41 = vpop.f32.mrf.mxu3  ;;  %3190 = vmatpush.msra.mxu1 %v3019_v35  ;;  %v8131_v35 = vsel %vm2982_vm6, %v8055_v2, %v8108_v44 }
 0x3c4   : > { %v2533_v22 = vpop.f32.mrf.mxu1  ;;  %v2875_v14 = vpop.f32.mrf.mxu2 }
 0x3c5   : > { %v2534_v1 = vadd.f32 %v2533_v22, %v7879_v24  ;;  %v3014_v24 = vld [vmem:[%s8663_s5 + $0x40] sm:$0xff]  ;;  %v2902_v7 = vadd.f32 %v2901_v32, %v2875_v14 }
 0x3c6   : > { %3114 = vmatpush.msra.mxu0 %v3014_v24  ;;  %v2904_v26 = vpop.f32.mrf.mxu0  ;;  %v4627_v32 = vld [vmem:[%s8663_s5 + $0x420] sm:$0xff] }
 0x3c7   : > { %v2670_v36 = vadd.f32 %v2669_v33, %v2534_v1  ;;  %v3084_v1 = vld [vmem:[%s8663_s5 + $0x270] sm:$0xff] }
 0x3c8   : > { %3115 = vmatpush.msra.mxu0 %v3012_v17 }
 0x3c9   : > { %v8000_v46 = vadd.f32 %v2695_v60, %v2670_v36  ;;  %v3009_v60 = vld [vmem:[%s8663_s5 + $0x18] sm:$0xff]  ;;  %v2482_v36 = vadd.f32 %v7897_v12, %v7857_v27  ;;  %v3080_v27 = vld [vmem:[%s8663_s5 + $0x250] sm:$0xff]  ;;  %v4639_v12 = vld [vmem:[%s8663_s5 + $0x480] sm:$0xff] }
 0x3ca   : > { %v8002_v25 = vpop.f32.mrf.mxu3  ;;  %3116 = vmatpush.msra.mxu0 %v3010_v0 }
 0x3cc   : > { %v2536_v38 = vpop.f32.mrf.mxu1  ;;  %3117 = vmatpush.msra.mxu0 %v3008_v62  ;;  %v3091_v62 = vld [vmem:[%s8663_s5 + $0x2a8] sm:$0xff] }
 0x3cd   : > { %v2537_v16 = vadd.f32 %v2536_v38, %v7884_v57  ;;  %v3017_v57 = vld [vmem:[%s8663_s5 + $0x58] sm:$0xff]  ;;  %v3078_v38 = vld [vmem:[%s8663_s5 + $0x240] sm:$0xff]  ;;  %3238 = vmatpush.msrb.mxu2 %v3091_v62 }
 0x3ce   : > { %3191 = vmatpush.msra.mxu1 %v3017_v57  ;;  %3118 = vmatpush.msra.mxu0 %v3006_v58  ;;  %v3076_v57 = vld [vmem:[%s8663_s5 + $0x230] sm:$0xff]  ;;  %v3051_v58 = vld [vmem:[%s8663_s5 + $0x168] sm:$0xff] }
 0x3cf   : > { %v2673_v28 = vadd.f32 %v2672_v52, %v2537_v16  ;;  %v3055_v52 = vld [vmem:[%s8663_s5 + $0x188] sm:$0xff]  ;;  %v4637_v16 = vld [vmem:[%s8663_s5 + $0x470] sm:$0xff] }
 0x3d0   : > { %3192 = vmatpush.msra.mxu1 %v3015_v18  ;;  %3207 = vmatpush.msrb.mxu0 %v3069_v5  ;;  %v2878_v18 = vpop.f32.mrf.mxu2  ;;  %v3089_v5 = vld [vmem:[%s8663_s5 + $0x298] sm:$0xff] }
 0x3d1   : > { %v8029_v47 = vadd.f32 %v2698_v56, %v2673_v28  ;;  %v3057_v56 = vld [vmem:[%s8663_s5 + $0x198] sm:$0xff]  ;;  %3239 = vmatpush.msrb.mxu2 %v3089_v5 }
 0x3d2   : > { %v8031_v63 = vpop.f32.mrf.mxu3  ;;  %3193 = vmatpush.msra.mxu1 %v3013_v30  ;;  %3208 = vmatpush.msrb.mxu0 %v3067_v6  ;;  %v3053_v28 = vld [vmem:[%s8663_s5 + $0x178] sm:$0xff]  ;;  %v3074_v30 = vld [vmem:[%s8663_s5 + $0x220] sm:$0xff]  ;;  %v3072_v6 = vld [vmem:[%s8663_s5 + $0x210] sm:$0xff] }
 0x3d4   : > { %v2539_v48 = vpop.f32.mrf.mxu1  ;;  %3194 = vmatpush.msra.mxu1 %v3011_v40  ;;  %3209 = vmatpush.msrb.mxu0 %v3065_v54  ;;  %v3047_v54 = vld [vmem:[%s8663_s5 + $0x148] sm:$0xff] }
 0x3d5   : > { %v2540_v13 = vadd.f32 %v2539_v48, %v7908_v19  ;;  %v3090_v19 = vld [vmem:[%s8663_s5 + $0x2a0] sm:$0xff] }
 0x3d6   : > { %3160 = vmatpush.msrb.mxu3 %v3090_v19  ;;  %3195 = vmatpush.msra.mxu1 %v3009_v60  ;;  %v4631_v19 = vld [vmem:[%s8663_s5 + $0x440] sm:$0xff] }
 0x3d7   : > { %v2676_v15 = vadd.f32 %v2675_v34, %v2540_v13  ;;  %3210 = vmatpush.msrb.mxu0 %v3063_v61  ;;  %v2485_v34 = vadd.f32 %v7924_v21, %v7864_v37  ;;  %v4633_v13 = vld [vmem:[%s8663_s5 + $0x450] sm:$0xff]  ;;  %v3049_v37 = vld [vmem:[%s8663_s5 + $0x158] sm:$0xff]  ;;  %v3070_v61 = vld [vmem:[%s8663_s5 + $0x200] sm:$0xff] }
 0x3d8   : > { %3161 = vmatpush.msrb.mxu3 %v3088_v31  ;;  %3196 = vmatpush.msra.mxu1 %v3007_v3  ;;  %v2905_v31 = vadd.f32 %v2904_v26, %v2878_v18  ;;  %v2430_v18 = vadd.f32 %v7886_v9, %v7859_v50  ;;  %v3073_v50 = vld [vmem:[%s8663_s5 + $0x218] sm:$0xff]  ;;  %v4617_v9 = vld [vmem:[%s8663_s5 + $0x3d0] sm:$0xff] }
 0x3d9   : > { %v8069_v45 = vadd.f32 %v2701_v8, %v2676_v15  ;;  %3211 = vmatpush.msrb.mxu0 %v3061_v42  ;;  %v4635_v8 = vld [vmem:[%s8663_s5 + $0x460] sm:$0xff]  ;;  %v3087_v15 = vld [vmem:[%s8663_s5 + $0x288] sm:$0xff]  ;;  %v4613_v42 = vld [vmem:[%s8663_s5 + $0x3b0] sm:$0xff] }
 0x3da   : > { %v8071_v33 = vpop.f32.mrf.mxu3  ;;  %3162 = vmatpush.msrb.mxu3 %v3086_v43  ;;  %3374 = vmatpush.msrb.mxu1 %v4645_v59  ;;  %v3085_v43 = vld [vmem:[%s8663_s5 + $0x278] sm:$0xff]  ;;  %v4629_v59 = vld [vmem:[%s8663_s5 + $0x430] sm:$0xff]  ;;  %v2566_v26 = vadd.f32 %v7877_v23, %v2430_v18  ;;  %v2977_v23 = vpop.permute.xlu1 %2976 }
 0x3db   : > { %3212 = vmatpush.msrb.mxu0 %v3059_v10  ;;  %3240 = vmatpush.msrb.mxu2 %v3087_v15  ;;  %v3043_v10 = vld [vmem:[%s8663_s5 + $0x128] sm:$0xff] }
 0x3dc   : > { %v2617_v22 = vpop.f32.mrf.mxu1  ;;  %3163 = vmatpush.msrb.mxu3 %v3084_v1  ;;  %3375 = vmatpush.msrb.mxu1 %v4643_v4  ;;  %v3083_v4 = vld [vmem:[%s8663_s5 + $0x268] sm:$0xff]  ;;  %v2592_v15 = vadd.f32 %v8002_v25, %v2566_v26  ;;  %v4597_v25 = vld [vmem:[%s8663_s5 + $0x330] sm:$0xff] }
 0x3dd   : > { %v2618_v51 = vadd.f32 %v2617_v22, %v2482_v36  ;;  %3213 = vmatpush.msrb.mxu0 %v3057_v56  ;;  %v3045_v22 = vld [vmem:[%s8663_s5 + $0x138] sm:$0xff]  ;;  %3241 = vmatpush.msrb.mxu2 %v3085_v43  ;;  %v4611_v36 = vld [vmem:[%s8663_s5 + $0x3a0] sm:$0xff]  ;;  %v4596_v26 = vld [vmem:[%s8663_s5 + $0x328] sm:$0xff] }
 0x3de   : > { %3164 = vmatpush.msrb.mxu3 %v3082_v55  ;;  %3376 = vmatpush.msrb.mxu1 %v4641_v20  ;;  %v2488_v55 = vadd.f32 %v7961_v41, %v7869_v11  ;;  %v3081_v56 = vld [vmem:[%s8663_s5 + $0x258] sm:$0xff]  ;;  %v4609_v11 = vld [vmem:[%s8663_s5 + $0x390] sm:$0xff]  ;;  %v4667_v43 = vld [vmem:[%s8663_s5 + $0x560] sm:$0xff] }
 0x3df   : > { %3214 = vmatpush.msrb.mxu0 %v3055_v52  ;;  %3242 = vmatpush.msrb.mxu2 %v3083_v4  ;;  %v3079_v52 = vld [vmem:[%s8663_s5 + $0x248] sm:$0xff] }
 0x3e0   : > { %3165 = vmatpush.msrb.mxu3 %v3080_v27  ;;  %3377 = vmatpush.msrb.mxu1 %v4639_v12  ;;  %v2881_v27 = vpop.f32.mrf.mxu2  ;;  %v3041_v12 = vld [vmem:[%s8663_s5 + $0x118] sm:$0xff] }
 0x3e1   : > { %3215 = vmatpush.msrb.mxu0 %v3053_v28  ;;  %3243 = vmatpush.msrb.mxu2 %v3081_v56 }
 0x3e2   : > { %v2643_v49 = vpop.f32.mrf.mxu3  ;;  %3166 = vmatpush.msrb.mxu3 %v3078_v38  ;;  %3378 = vmatpush.msrb.mxu1 %v4637_v16  ;;  %v4607_v16 = vld [vmem:[%s8663_s5 + $0x380] sm:$0xff] }
 0x3e3   : > { %v2644_v24 = vadd.f32 %v2643_v49, %v2618_v51  ;;  %3216 = vmatpush.msrb.mxu0 %v3051_v58  ;;  %v4625_v51 = vld [vmem:[%s8663_s5 + $0x410] sm:$0xff]  ;;  %3244 = vmatpush.msrb.mxu2 %v3079_v52  ;;  %v4587_v52 = vld [vmem:[%s8663_s5 + $0x2e0] sm:$0xff] }
 0x3e4   : > { %v2620_v17 = vpop.f32.mrf.mxu1  ;;  %3167 = vmatpush.msrb.mxu3 %v3076_v57  ;;  %3379 = vmatpush.msrb.mxu1 %v4635_v8  ;;  %v4621_v57 = vld [vmem:[%s8663_s5 + $0x3f0] sm:$0xff] }
 0x3e5   : > { %v2963_v0 = vadd.f32 %v2902_v7, %v2644_v24  ;;  %v2621_v21 = vadd.f32 %v2620_v17, %v2485_v34  ;;  %3217 = vmatpush.msrb.mxu0 %v3049_v37  ;;  %v4623_v7 = vld [vmem:[%s8663_s5 + $0x400] sm:$0xff]  ;;  %v2907_v24 = vpop.f32.mrf.mxu0  ;;  %v4605_v8 = vld [vmem:[%s8663_s5 + $0x370] sm:$0xff]  ;;  %v3075_v34 = vld [vmem:[%s8663_s5 + $0x228] sm:$0xff] }
 0x3e6   : > { %3168 = vmatpush.msrb.mxu3 %v3074_v30  ;;  %3380 = vmatpush.msrb.mxu1 %v4633_v13  ;;  %v2908_v17 = vadd.f32 %v2907_v24, %v2881_v27  ;;  %v4603_v30 = vld [vmem:[%s8663_s5 + $0x360] sm:$0xff]  ;;  %v4601_v13 = vld [vmem:[%s8663_s5 + $0x350] sm:$0xff]  ;;  %v4606_v24 = vld [vmem:[%s8663_s5 + $0x378] sm:$0xff] }
 0x3e7   : > { %v2989_v48 = vadd.f32 %v8131_v35, %v2963_v0  ;;  %3218 = vmatpush.msrb.mxu0 %v3047_v54  ;;  %v3077_v0 = vld [vmem:[%s8663_s5 + $0x238] sm:$0xff]  ;;  %v4589_v27 = vld [vmem:[%s8663_s5 + $0x2f0] sm:$0xff] }
 0x3e8   : > { %3169 = vmatpush.msrb.mxu3 %v3072_v6  ;;  %3381 = vmatpush.msrb.mxu1 %v4631_v19 }
 0x3e9   : > { %v8163_v40 = vmax.f32 %v2989_v48, 0.0  ;;  %3219 = vmatpush.msrb.mxu0 %v3045_v22  ;;  %v4619_v48 = vld [vmem:[%s8663_s5 + $0x3e0] sm:$0xff]  ;;  %3245 = vmatpush.msrb.mxu2 %v3077_v0  ;;  %v4665_v22 = vld [vmem:[%s8663_s5 + $0x550] sm:$0xff]  ;;  %v4604_v0 = vld [vmem:[%s8663_s5 + $0x368] sm:$0xff] }
 0x3ea   : > { %v2646_v60 = vpop.f32.mrf.mxu3  ;;  %3170 = vmatpush.msrb.mxu3 %v3070_v61  ;;  %3382 = vmatpush.msrb.mxu1 %v4629_v59  ;;  %v2983_v61 = vsel %vm2982_vm6, %v2977_v23, %v8055_v2  ;;  %v4614_v2 = vld [vmem:[%s8663_s5 + $0x3b8] sm:$0xff] }
 0x3eb   : > { %v2647_v3 = vadd.f32 %v2646_v60, %v2621_v21  ;;  %3145 = vmatmul.f32.vlgmr.msra.gmra.mxu2 %v8163_v40  ;;  %3220 = vmatpush.msrb.mxu0 %v3043_v10  ;;  %v4615_v21 = vld [vmem:[%s8663_s5 + $0x3c0] sm:$0xff]  ;;  %v2595_v10 = vadd.f32 %v8031_v63, %v7910_v53  ;;  %v4661_v53 = vld [vmem:[%s8663_s5 + $0x530] sm:$0xff] }
 0x3ec   : > { %v2623_v14 = vpop.f32.mrf.mxu1  ;;  %3348 = vmatpush.msra.mxu3 %v4613_v42  ;;  %3383 = vmatpush.msrb.mxu1 %v4627_v32  ;;  %v4599_v60 = vld [vmem:[%s8663_s5 + $0x340] sm:$0xff] }
 0x3ed   : > { %v2966_v1 = vadd.f32 %v2905_v31, %v2647_v3  ;;  %v2624_v49 = vadd.f32 %v2623_v14, %v2488_v55  ;;  %3221 = vmatpush.msrb.mxu0 %v3041_v12  ;;  %3246 = vmatpush.msrb.mxu2 %v3075_v34  ;;  %v4669_v31 = vld [vmem:[%s8663_s5 + $0x570] sm:$0xff]  ;;  %v4595_v14 = vld [vmem:[%s8663_s5 + $0x320] sm:$0xff]  ;;  %v4612_v55 = vld [vmem:[%s8663_s5 + $0x3a8] sm:$0xff] }
 0x3ee   : > { %3349 = vmatpush.msra.mxu3 %v4611_v36  ;;  %3384 = vmatpush.msrb.mxu1 %v4625_v51  ;;  %v4663_v32 = vld [vmem:[%s8663_s5 + $0x540] sm:$0xff]  ;;  %v4610_v51 = vld [vmem:[%s8663_s5 + $0x398] sm:$0xff]  ;;  %v4600_v34 = vld [vmem:[%s8663_s5 + $0x348] sm:$0xff] }
 0x3ef   : > { %v2992_v20 = vadd.f32 %v8131_v35, %v2966_v1  ;;  %3222 = vmatpush.msrb.mxu0 %v3039_v39  ;;  %3247 = vmatpush.msrb.mxu2 %v3073_v50  ;;  %v4593_v1 = vld [vmem:[%s8663_s5 + $0x310] sm:$0xff]  ;;  %v4659_v12 = vld [vmem:[%s8663_s5 + $0x520] sm:$0xff] }
 0x3f0   : > { %3350 = vmatpush.msra.mxu3 %v4609_v11  ;;  %3385 = vmatpush.msrb.mxu1 %v4623_v7  ;;  %v4649_v50 = vld [vmem:[%s8663_s5 + $0x4d0] sm:$0xff] }
 0x3f1   : > { %v8220_v41 = vmax.f32 %v2992_v20, 0.0  ;;  %v4591_v20 = vld [vmem:[%s8663_s5 + $0x300] sm:$0xff] }
 0x3f2   : > { %v2649_v38 = vpop.f32.mrf.mxu3  ;;  %3351 = vmatpush.msra.mxu3 %v4607_v16  ;;  %3386 = vmatpush.msrb.mxu1 %v4621_v57  ;;  %v4585_v16 = vld [vmem:[%s8663_s5 + $0x2d0] sm:$0xff]  ;;  %v4655_v57 = vld [vmem:[%s8663_s5 + $0x500] sm:$0xff] }
 0x3f3   : > { %v2650_v28 = vadd.f32 %v2649_v38, %v2624_v49  ;;  %3148 = vmatmul.f32.gmra.mxu2 %v8220_v41  ;;  %v4608_v49 = vld [vmem:[%s8663_s5 + $0x388] sm:$0xff]  ;;  %v4657_v38 = vld [vmem:[%s8663_s5 + $0x510] sm:$0xff] }
 0x3f4   : > { %v2849_v62 = vpop.f32.mrf.mxu1  ;;  %3352 = vmatpush.msra.mxu3 %v4605_v8  ;;  %3387 = vmatpush.msrb.mxu1 %v4619_v48  ;;  %v4653_v8 = vld [vmem:[%s8663_s5 + $0x4f0] sm:$0xff]  ;;  %v4651_v48 = vld [vmem:[%s8663_s5 + $0x4e0] sm:$0xff] }
 0x3f5   : > { %v2969_v58 = vadd.f32 %v2908_v17, %v2650_v28  ;;  %v2598_v17 = vadd.f32 %v8071_v33, %v7953_v29  ;;  %v4602_v33 = vld [vmem:[%s8663_s5 + $0x358] sm:$0xff] }
 0x3f6   : > { %3353 = vmatpush.msra.mxu3 %v4603_v30  ;;  %3388 = vmatpush.msrb.mxu1 %v4617_v9 }
 0x3f7   : > { %v2995_v5 = vadd.f32 %v8131_v35, %v2969_v58  ;;  %v3071_v35 = vld [vmem:[%s8663_s5 + $0x208] sm:$0xff] }
 0x3f8   : > { %3354 = vmatpush.msra.mxu3 %v4601_v13  ;;  %3248 = vmatpush.msrb.mxu2 %v3071_v35  ;;  %v4647_v35 = vld [vmem:[%s8663_s5 + $0x4c0] sm:$0xff] }
 0x3f9   : > { %v8266_v37 = vmax.f32 %v2995_v5, 0.0  ;;  %3389 = vmatpush.msrb.mxu1 %v4615_v21  ;;  %v4598_v5 = vld [vmem:[%s8663_s5 + $0x338] sm:$0xff] }
 0x3fa   : > { %v2823_v6 = vpop.f32.mrf.mxu3  ;;  %3355 = vmatpush.msra.mxu3 %v4599_v60  ;;  %3404 = vmatpush.msra.mxu2 %v4669_v31  ;;  %v4646_v31 = vld [vmem:[%s8663_s5 + $0x4b8] sm:$0xff] }
 0x3fb   : > { %v2850_v19 = vadd.f32 %v2849_v62, %v2823_v6  ;;  %3151 = vmatmul.f32.gmra.mxu2 %v8266_v37  ;;  %v4583_v62 = vld [vmem:[%s8663_s5 + $0x2c0] sm:$0xff]  ;;  %v4594_v6 = vld [vmem:[%s8663_s5 + $0x318] sm:$0xff] }
 0x3fc   : > { %v2852_v54 = vpop.f32.mrf.mxu1  ;;  %3356 = vmatpush.msra.mxu3 %v4597_v25  ;;  %3405 = vmatpush.msra.mxu2 %v4667_v43  ;;  %v4670_v25 = vld [vmem:[%s8663_s5 + $0x578] sm:$0xff]  ;;  %v4644_v43 = vld [vmem:[%s8663_s5 + $0x4a8] sm:$0xff] }
 0x3fd   : > { %v2962_v3 = vadd.f32 %v2850_v19, %v2592_v15  ;;  %v4592_v19 = vld [vmem:[%s8663_s5 + $0x308] sm:$0xff] }
 0x3fe   : > { %3357 = vmatpush.msra.mxu3 %v4595_v14  ;;  %3406 = vmatpush.msra.mxu2 %v4665_v22  ;;  %v4668_v14 = vld [vmem:[%s8663_s5 + $0x568] sm:$0xff]  ;;  %v4586_v22 = vld [vmem:[%s8663_s5 + $0x2d8] sm:$0xff] }
 0x3ff   : > { %v2988_v59 = vadd.f32 %v2983_v61, %v2962_v3 }
 0x400   : > { %3358 = vmatpush.msra.mxu3 %v4593_v1  ;;  %3407 = vmatpush.msra.mxu2 %v4663_v32 }
 0x401   : > { %v8296_v42 = vmax.f32 %v2988_v59, 0.0 }
 0x402   : > { %v2826_v4 = vpop.f32.mrf.mxu3  ;;  %3359 = vmatpush.msra.mxu3 %v4591_v20  ;;  %3408 = vmatpush.msra.mxu2 %v4661_v53  ;;  %v4638_v53 = vld [vmem:[%s8663_s5 + $0x478] sm:$0xff] }
 0x403   : > { %v2853_v36 = vadd.f32 %v2852_v54, %v2826_v4  ;;  %3119 = vmatmul.f32.vlgmr.msra.gmra.mxu0 %v8296_v42  ;;  %3197 = vmatmul.f32.vlgmr.msra.gmra.mxu1 %v8296_v42 }
 0x404   : > { %v2855_v56 = vpop.f32.mrf.mxu1  ;;  %3426 = vmatpush.msra.mxu0 %v4614_v2  ;;  %3360 = vmatpush.msra.mxu3 %v4589_v27  ;;  %v4642_v2 = vld [vmem:[%s8663_s5 + $0x498] sm:$0xff]  ;;  %v4636_v27 = vld [vmem:[%s8663_s5 + $0x468] sm:$0xff] }
 0x405   : > { %v2965_v63 = vadd.f32 %v2853_v36, %v2595_v10  ;;  %3409 = vmatpush.msra.mxu2 %v4659_v12  ;;  %v4584_v36 = vld [vmem:[%s8663_s5 + $0x2c8] sm:$0xff] }
 0x406   : > { %3427 = vmatpush.msra.mxu0 %v4612_v55  ;;  %3361 = vmatpush.msra.mxu3 %v4587_v52  ;;  %v4640_v55 = vld [vmem:[%s8663_s5 + $0x488] sm:$0xff]  ;;  %v4658_v52 = vld [vmem:[%s8663_s5 + $0x518] sm:$0xff] }
 0x407   : > { %v2991_v11 = vadd.f32 %v2983_v61, %v2965_v63  ;;  %3410 = vmatpush.msra.mxu2 %v4657_v38  ;;  %v4630_v38 = vld [vmem:[%s8663_s5 + $0x438] sm:$0xff] }
 0x408   : > { %3428 = vmatpush.msra.mxu0 %v4610_v51  ;;  %3362 = vmatpush.msra.mxu3 %v4585_v16  ;;  %v4662_v51 = vld [vmem:[%s8663_s5 + $0x538] sm:$0xff]  ;;  %v4628_v16 = vld [vmem:[%s8663_s5 + $0x428] sm:$0xff] }
 0x409   : > { %v8335_v7 = vmax.f32 %v2991_v11, 0.0  ;;  %3411 = vmatpush.msra.mxu2 %v4655_v57  ;;  %v4660_v11 = vld [vmem:[%s8663_s5 + $0x528] sm:$0xff] }
 0x40a   : > { %v2829_v39 = vpop.f32.mrf.mxu3  ;;  %3429 = vmatpush.msra.mxu0 %v4608_v49  ;;  %3363 = vmatpush.msra.mxu3 %v4583_v62  ;;  %v4634_v49 = vld [vmem:[%s8663_s5 + $0x458] sm:$0xff]  ;;  %v4624_v57 = vld [vmem:[%s8663_s5 + $0x408] sm:$0xff] }
 0x40b   : > { %v2856_v28 = vadd.f32 %v2855_v56, %v2829_v39  ;;  %3122 = vmatmul.f32.gmra.mxu0 %v8335_v7  ;;  %3200 = vmatmul.f32.gmra.mxu1 %v8335_v7  ;;  %v4664_v56 = vld [vmem:[%s8663_s5 + $0x548] sm:$0xff]  ;;  %v4654_v39 = vld [vmem:[%s8663_s5 + $0x4f8] sm:$0xff] }
 0x40c   : > { %3430 = vmatpush.msra.mxu0 %v4606_v24  ;;  %v2927_v18 = vpop.f32.mrf.mxu1  ;;  %3412 = vmatpush.msra.mxu2 %v4653_v8  ;;  %v4656_v24 = vld [vmem:[%s8663_s5 + $0x508] sm:$0xff]  ;;  %v4622_v62 = vld [vmem:[%s8663_s5 + $0x3f8] sm:$0xff] }
 0x40d   : > { %v2968_v29 = vadd.f32 %v2856_v28, %v2598_v17  ;;  %v4652_v17 = vld [vmem:[%s8663_s5 + $0x4e8] sm:$0xff]  ;;  %v4626_v28 = vld [vmem:[%s8663_s5 + $0x418] sm:$0xff] }
 0x40e   : > { %3431 = vmatpush.msra.mxu0 %v4604_v0  ;;  %3413 = vmatpush.msra.mxu2 %v4651_v48  ;;  %v4650_v0 = vld [vmem:[%s8663_s5 + $0x4d8] sm:$0xff]  ;;  %v4616_v8 = vld [vmem:[%s8663_s5 + $0x3c8] sm:$0xff] }
 0x40f   : > { %v2994_v58 = vadd.f32 %v2983_v61, %v2968_v29  ;;  %v4588_v61 = vld [vmem:[%s8663_s5 + $0x2e8] sm:$0xff] }
 0x410   : > { %3432 = vmatpush.msra.mxu0 %v4602_v33  ;;  %3414 = vmatpush.msra.mxu2 %v4649_v50  ;;  %v4620_v29 = vld [vmem:[%s8663_s5 + $0x3e8] sm:$0xff]  ;;  %v4618_v33 = vld [vmem:[%s8663_s5 + $0x3d8] sm:$0xff] }
 0x411   : > { %v8371_v30 = vmax.f32 %v2994_v58, 0.0 }
 0x412   : > { %v2953_v9 = vpop.f32.mrf.mxu3  ;;  %3433 = vmatpush.msra.mxu0 %v4600_v34  ;;  %3415 = vmatpush.msra.mxu2 %v4647_v35 }
 0x413   : > { %v2954_v13 = vadd.f32 %v2953_v9, %v2927_v18  ;;  %3125 = vmatmul.f32.gmra.mxu0 %v8371_v30  ;;  %3203 = vmatmul.f32.gmra.mxu1 %v8371_v30 }
 0x414   : > { %3434 = vmatpush.msra.mxu0 %v4598_v5  ;;  %v2930_v23 = vpop.f32.mrf.mxu1 }
 0x415   : > { %v2964_v21 = vadd.f32 %v2954_v13, %v8000_v46  ;;  %v4590_v46 = vld [vmem:[%s8663_s5 + $0x2f8] sm:$0xff] }
 0x416   : > { %3435 = vmatpush.msra.mxu0 %v4596_v26 }
 0x417   : > { %v2990_v15 = vadd.f32 %v8108_v44, %v2964_v21 }
 0x418   : > { %3436 = vmatpush.msra.mxu0 %v4594_v6 }
 0x419   : > { %v8395_v60 = vmax.f32 %v2990_v15, 0.0 }
 0x41a   : > { %v2956_v54 = vpop.f32.mrf.mxu3  ;;  %3437 = vmatpush.msra.mxu0 %v4592_v19 }
 0x41b   : > { %v2957_v3 = vadd.f32 %v2956_v54, %v2930_v23  ;;  %4577 = vmatmul.msk.f32.vlgmr.msrb.gmra.mxu3 %vm2982_vm6, %v8395_v60  ;;  %3223 = vmatmul.f32.vlgmr.msrb.gmra.mxu0 %v8163_v40 }
 0x41c   : > { %4580 = vmatmul.msk.f32.vlgmr.msrb.gmra.mxu2 %vm2982_vm6, %v8395_v60  ;;  %3390 = vmatmul.f32.vlgmr.msrb.gmra.mxu1 %v8163_v40  ;;  %v2933_v32 = vpop.f32.mrf.mxu1 }
 0x41d   : > { %v2967_v59 = vadd.f32 %v2957_v3, %v8029_v47  ;;  %3438 = vmatpush.msra.mxu0 %v4590_v46  ;;  %3452 = vmatpush.msrb.mxu3 %v4646_v31  ;;  %v4666_v47 = vld [vmem:[%s8663_s5 + $0x558] sm:$0xff] }
 0x41e   : > { %3482 = vmatpush.msrb.mxu2 %v4670_v25 }
 0x41f   : > { %v2993_v1 = vadd.f32 %v8108_v44, %v2967_v59  ;;  %3439 = vmatpush.msra.mxu0 %v4588_v61  ;;  %3453 = vmatpush.msrb.mxu3 %v4644_v43 }
 0x420   : > { %3483 = vmatpush.msrb.mxu2 %v4668_v14 }
 0x421   : > { %v8432_v4 = vmax.f32 %v2993_v1, 0.0  ;;  %3440 = vmatpush.msra.mxu0 %v4586_v22  ;;  %3454 = vmatpush.msrb.mxu3 %v4642_v2 }
 0x422   : > { %v2959_v10 = vpop.f32.mrf.mxu3  ;;  %3484 = vmatpush.msrb.mxu2 %v4666_v47 }
 0x423   : > { %v2960_v20 = vadd.f32 %v2959_v10, %v2933_v32  ;;  %4578 = vmatmul.msk.f32.gmra.mxu3 %vm2982_vm6, %v8432_v4  ;;  %3226 = vmatmul.f32.gmra.mxu0 %v8220_v41 }
 0x424   : > { %4581 = vmatmul.msk.f32.gmra.mxu2 %vm2982_vm6, %v8432_v4  ;;  %3393 = vmatmul.f32.gmra.mxu1 %v8220_v41 }
 0x425   : > { %v2970_v63 = vadd.f32 %v2960_v20, %v8069_v45  ;;  %3441 = vmatpush.msra.mxu0 %v4584_v36  ;;  %3455 = vmatpush.msrb.mxu3 %v4640_v55 }
 0x426   : > { %3485 = vmatpush.msrb.mxu2 %v4664_v56 }
 0x427   : > { %v2996_v12 = vadd.f32 %v8108_v44, %v2970_v63  ;;  %3456 = vmatpush.msrb.mxu3 %v4638_v53  ;;  %v4632_v44 = vld [vmem:[%s8663_s5 + $0x448] sm:$0xff] }
 0x428   : > { %3486 = vmatpush.msrb.mxu2 %v4662_v51 }
 0x429   : > { %v3005_v45 = vmax.f32 %v2996_v12, 0.0  ;;  %3457 = vmatpush.msrb.mxu3 %v4636_v27 }
 0x42a   : > { %3487 = vmatpush.msrb.mxu2 %v4660_v11 }
 0x42b   : > { %4579 = vmatmul.msk.f32.gmra.mxu3 %vm2982_vm6, %v3005_v45  ;;  %3229 = vmatmul.f32.gmra.mxu0 %v8266_v37 }
 0x42c   : > { %4582 = vmatmul.msk.f32.gmra.mxu2 %vm2982_vm6, %v3005_v45  ;;  %3396 = vmatmul.f32.gmra.mxu1 %v8266_v37 }
 0x42d   : > { %3458 = vmatpush.msrb.mxu3 %v4634_v49  ;;  %3488 = vmatpush.msrb.mxu2 %v4658_v52 }
 0x42f   : > { %3459 = vmatpush.msrb.mxu3 %v4632_v44  ;;  %3489 = vmatpush.msrb.mxu2 %v4656_v24  ;;  %v3511_v24 = vld [vmem:[%s8664_s6 + $0x8] sm:$0x3] }
 0x431   : > { %3460 = vmatpush.msrb.mxu3 %v4630_v38  ;;  %3490 = vmatpush.msrb.mxu2 %v4654_v39 }
 0x433   : > { %3364 = vmatmul.f32.vlgmr.msra.gmra.mxu3 %v8296_v42  ;;  %3442 = vmatmul.f32.vlgmr.msra.gmra.mxu0 %v8296_v42  ;;  %v4648_v42 = vld [vmem:[%s8663_s5 + $0x4c8] sm:$0xff] }
 0x434   : > { %4671 = vmatmul.msk.f32.vlgmr.msra.gmra.mxu2 %vm2982_vm6, %v8395_v60  ;;  %3461 = vmatpush.msrb.mxu3 %v4628_v16 }
 0x435   : > { %3491 = vmatpush.msrb.mxu2 %v4652_v17 }
 0x436   : > { %3462 = vmatpush.msrb.mxu3 %v4626_v28 }
 0x437   : > { %3492 = vmatpush.msrb.mxu2 %v4650_v0 }
 0x438   : > { %3463 = vmatpush.msrb.mxu3 %v4624_v57 }
 0x439   : > { %3493 = vmatpush.msrb.mxu2 %v4648_v42  ;;  %v4681_v42 = vld [vmem:[%s8664_s6 + $0x10] sm:$0xff] }
 0x43a   : > { %3464 = vmatpush.msrb.mxu3 %v4622_v62 }
 0x43b   : > { %3367 = vmatmul.f32.gmra.mxu3 %v8335_v7  ;;  %3445 = vmatmul.f32.gmra.mxu0 %v8335_v7 }
 0x43c   : > { %4672 = vmatmul.msk.f32.gmra.mxu2 %vm2982_vm6, %v8432_v4  ;;  %3465 = vmatpush.msrb.mxu3 %v4620_v29 }
 0x43e   : > { %3466 = vmatpush.msrb.mxu3 %v4618_v33 }
 0x440   : > { %3467 = vmatpush.msrb.mxu3 %v4616_v8 }
 0x443   : > { %3370 = vmatmul.f32.gmra.mxu3 %v8371_v30  ;;  %3448 = vmatmul.f32.gmra.mxu0 %v8371_v30 }
 0x444   : > { %4673 = vmatmul.msk.f32.gmra.mxu2 %vm2982_vm6, %v3005_v45 }
 0x44b   : > { %3468 = vmatmul.f32.vlgmr.msrb.gmra.mxu3 %v8163_v40 }
 0x44c   : > { %4674 = vmatmul.msk.f32.vlgmr.msrb.gmra.mxu2 %vm2982_vm6, %v8395_v60 }
 0x453   : > { %3471 = vmatmul.f32.gmra.mxu3 %v8220_v41 }
 0x454   : > { %4675 = vmatmul.msk.f32.gmra.mxu2 %vm2982_vm6, %v8432_v4 }
 0x45b   : > { %3474 = vmatmul.f32.gmra.mxu3 %v8266_v37 }
 0x45c   : > { %4676 = vmatmul.msk.f32.gmra.mxu2 %vm2982_vm6, %v3005_v45  ;;  %v3510_v45 = vld [vmem:[%s8664_s6] sm:$0xff] }
 0x46e   : > { %v3146_v18 = vpop.f32.mrf.mxu2 }
 0x476   : > { %v3149_v34 = vpop.f32.mrf.mxu2 }
 0x47e   : > { %v3152_v5 = vpop.f32.mrf.mxu2 }
 0x480   : > { %v3120_v7 = vpop.f32.mrf.mxu0  ;;  %v3198_v30 = vpop.f32.mrf.mxu1 }
 0x481   : > { %v3147_v55 = vadd.f32 %v3146_v18, %v3120_v7 }
 0x488   : > { %v3123_v58 = vpop.f32.mrf.mxu0  ;;  %v3201_v50 = vpop.f32.mrf.mxu1 }
 0x489   : > { %v3150_v47 = vadd.f32 %v3149_v34, %v3123_v58 }
 0x490   : > { %v3126_v48 = vpop.f32.mrf.mxu0  ;;  %v3204_v6 = vpop.f32.mrf.mxu1 }
 0x491   : > { %v3153_v14 = vadd.f32 %v3152_v5, %v3126_v48  ;;  %v3672_v5 = vld [vmem:[#allocation2 + $0x78] sm:$0xff] }
 0x492   : > { %3764 = vmatpush.msra.mxu3 %v3672_v5  ;;  %v3730_v5 = vld [vmem:[#allocation2 + $0x248] sm:$0xff] }
 0x498   : > { %v3224_v40 = vpop.f32.mrf.mxu0 }
 0x499   : > { %v3225_v9 = vadd.f32 %v3224_v40, %v3198_v30  ;;  %v3391_v19 = vpop.f32.mrf.mxu1  ;;  %v4682_v30 = vld [vmem:[%s8664_s6 + $0x18] sm:$0x3]  ;;  %v3671_v40 = vld [vmem:[#allocation2 + $0x70] sm:$0xff] }
 0x49a   : > { %3765 = vmatpush.msra.mxu3 %v3671_v40  ;;  %v3729_v40 = vld [vmem:[#allocation2 + $0x240] sm:$0xff] }
 0x49e   : > { %v3172_v13 = vpop.f32.mrf.mxu3 }
 0x49f   : > { %v3250_v26 = vpop.f32.mrf.mxu2  ;;  %v3173_v63 = vadd.f32 %v3172_v13, %v3147_v55  ;;  %v3668_v13 = vld [vmem:[#allocation2 + $0x58] sm:$0xff]  ;;  %v3681_v55 = vld [vmem:[#allocation2 + $0xc0] sm:$0xff] }
 0x4a0   : > { %v8534_v41 = vadd.f32 %v3250_v26, %v3225_v9  ;;  %v3227_v23 = vpop.f32.mrf.mxu0  ;;  %v3669_v9 = vld [vmem:[#allocation2 + $0x60] sm:$0xff]  ;;  %v3667_v26 = vld [vmem:[#allocation2 + $0x50] sm:$0xff] }
 0x4a1   : > { %v3394_v46 = vpop.f32.mrf.mxu1  ;;  %v3228_v62 = vadd.f32 %v3227_v23, %v3201_v50  ;;  %v3670_v50 = vld [vmem:[#allocation2 + $0x68] sm:$0xff]  ;;  %v3659_v23 = vld [vmem:[#allocation2 + $0x10] sm:$0xff] }
 0x4a2   : > { %3766 = vmatpush.msra.mxu3 %v3670_v50  ;;  %v3728_v50 = vld [vmem:[#allocation2 + $0x238] sm:$0xff] }
 0x4a4   : > { %3767 = vmatpush.msra.mxu3 %v3669_v9  ;;  %v3727_v9 = vld [vmem:[#allocation2 + $0x230] sm:$0xff] }
 0x4a6   : > { %v3175_v35 = vpop.f32.mrf.mxu3  ;;  %3768 = vmatpush.msra.mxu3 %v3668_v13  ;;  %v3726_v13 = vld [vmem:[#allocation2 + $0x228] sm:$0xff] }
 0x4a7   : > { %v3253_v21 = vpop.f32.mrf.mxu2  ;;  %v3176_v20 = vadd.f32 %v3175_v35, %v3150_v47  ;;  %v3665_v35 = vld [vmem:[#allocation2 + $0x40] sm:$0xff]  ;;  %v3720_v47 = vld [vmem:[#allocation2 + $0x1f8] sm:$0xff] }
 0x4a8   : > { %v3230_v25 = vpop.f32.mrf.mxu0  ;;  %v3254_v7 = vadd.f32 %v3253_v21, %v3228_v62  ;;  %3769 = vmatpush.msra.mxu3 %v3667_v26  ;;  %v3664_v21 = vld [vmem:[#allocation2 + $0x38] sm:$0xff]  ;;  %v3751_v62 = vld [vmem:[#allocation2 + $0x2f0] sm:$0xff]  ;;  %v3725_v26 = vld [vmem:[#allocation2 + $0x220] sm:$0xff] }
 0x4a9   : > { %v3397_v43 = vpop.f32.mrf.mxu1  ;;  %v3231_v17 = vadd.f32 %v3230_v25, %v3204_v6  ;;  %v3663_v6 = vld [vmem:[#allocation2 + $0x30] sm:$0xff] }
 0x4aa   : > { %v3687_v25 = vld [vmem:[#allocation2 + $0xf0] sm:$0xff] }
 0x4ae   : > { %v3178_v37 = vpop.f32.mrf.mxu3 }
 0x4af   : > { %v3256_v15 = vpop.f32.mrf.mxu2  ;;  %v3179_v4 = vadd.f32 %v3178_v37, %v3153_v14  ;;  %v3662_v37 = vld [vmem:[#allocation2 + $0x28] sm:$0xff] }
 0x4b0   : > { %v3443_v36 = vpop.f32.mrf.mxu0  ;;  %v3257_v29 = vadd.f32 %v3256_v15, %v3231_v17  ;;  %v3661_v15 = vld [vmem:[#allocation2 + $0x20] sm:$0xff]  ;;  %v3674_v17 = vld [vmem:[#allocation2 + $0x88] sm:$0xff] }
 0x4b6   : > { %v3365_v60 = vpop.f32.mrf.mxu3 }
 0x4b7   : > { %v3417_v54 = vpop.f32.mrf.mxu2  ;;  %v3392_v22 = vadd.f32 %v3391_v19, %v3365_v60  ;;  %v3660_v19 = vld [vmem:[#allocation2 + $0x18] sm:$0xff]  ;;  %v3658_v60 = vld [vmem:[#allocation2 + $0x8] sm:$0xff] }
 0x4b8   : > { %v3446_v49 = vpop.f32.mrf.mxu0 }
 0x4b9   : > { %v3418_v56 = vadd.f32 %v3417_v54, %v3392_v22  ;;  %v3657_v54 = vld [vmem:[#allocation2] sm:$0xff]  ;;  %v3684_v22 = vld [vmem:[#allocation2 + $0xd8] sm:$0xff] }
 0x4bb   : > { %v3504_v12 = vmax.f32 %v3173_v63, %v3418_v56 }
 0x4be   : > { %v3368_v31 = vpop.f32.mrf.mxu3 }
 0x4bf   : > { %v3420_v3 = vpop.f32.mrf.mxu2  ;;  %v3395_v61 = vadd.f32 %v3394_v46, %v3368_v31 }
 0x4c0   : > { %v3449_v39 = vpop.f32.mrf.mxu0 }
 0x4c1   : > { %v3421_v32 = vadd.f32 %v3420_v3, %v3395_v61  ;;  %v3688_v3 = vld [vmem:[#allocation2 + $0xf8] sm:$0xff]  ;;  %v3686_v61 = vld [vmem:[#allocation2 + $0xe8] sm:$0xff] }
 0x4c3   : > { %v3506_v51 = vmax.f32 %v3176_v20, %v3421_v32  ;;  %v3682_v32 = vld [vmem:[#allocation2 + $0xc8] sm:$0xff]  ;;  %v3680_v20 = vld [vmem:[#allocation2 + $0xb8] sm:$0xff] }
 0x4c6   : > { %v3371_v59 = vpop.f32.mrf.mxu3 }
 0x4c7   : > { %v3398_v2 = vadd.f32 %v3397_v43, %v3371_v59  ;;  %v3423_v1 = vpop.f32.mrf.mxu2  ;;  %v3685_v59 = vld [vmem:[#allocation2 + $0xe0] sm:$0xff] }
 0x4c9   : > { %v3424_v10 = vadd.f32 %v3423_v1, %v3398_v2  ;;  %v3704_v2 = vld [vmem:[#allocation2 + $0x178] sm:$0xff]  ;;  %v3683_v1 = vld [vmem:[#allocation2 + $0xd0] sm:$0xff] }
 0x4cb   : > { %v3508_v53 = vmax.f32 %v3179_v4, %v3424_v10  ;;  %v3703_v4 = vld [vmem:[#allocation2 + $0x170] sm:$0xff] }
 0x4cc   : > { %v3719_v10 = vld [vmem:[#allocation2 + $0x1f0] sm:$0xff] }
 0x4cd   : > { %3532 = vmatpush.msra.mxu1 %v3508_v53 }
 0x4ce   : > { %v3469_v27 = vpop.f32.mrf.mxu3 }
 0x4cf   : > { %v3495_v11 = vpop.f32.mrf.mxu2  ;;  %3533 = vmatpush.msra.mxu1 %v3506_v51  ;;  %v3470_v28 = vadd.f32 %v3469_v27, %v3443_v36  ;;  %v3736_v36 = vld [vmem:[#allocation2 + $0x278] sm:$0xff]  ;;  %v3678_v27 = vld [vmem:[#allocation2 + $0xa8] sm:$0xff] }
 0x4d1   : > { %3534 = vmatpush.msra.mxu1 %v3504_v12  ;;  %v3496_v18 = vadd.f32 %v3495_v11, %v3470_v28 }
 0x4d2   : > { %4677 = vmatmul.msk.f32.vlgmr.msra.gmra.mxu1 %vm3512_vm7, %v3510_v45 }
 0x4d3   : > { %3587 = vmatpush.msrb.mxu1 %v3508_v53  ;;  %v3505_v48 = vmax.f32 %v8534_v41, %v3496_v18  ;;  %v3666_v41 = vld [vmem:[#allocation2 + $0x48] sm:$0xff]  ;;  %v3679_v53 = vld [vmem:[#allocation2 + $0xb0] sm:$0xff] }
 0x4d4   : > { %3770 = vmatpush.msra.mxu3 %v3666_v41  ;;  %v3735_v18 = vld [vmem:[#allocation2 + $0x270] sm:$0xff]  ;;  %v3724_v41 = vld [vmem:[#allocation2 + $0x218] sm:$0xff] }
 0x4d5   : > { %3588 = vmatpush.msrb.mxu1 %v3506_v51 }
 0x4d6   : > { %v3472_v52 = vpop.f32.mrf.mxu3  ;;  %3771 = vmatpush.msra.mxu3 %v3665_v35  ;;  %v3723_v35 = vld [vmem:[#allocation2 + $0x210] sm:$0xff] }
 0x4d7   : > { %3589 = vmatpush.msrb.mxu1 %v3504_v12  ;;  %v3498_v44 = vpop.f32.mrf.mxu2  ;;  %v3473_v38 = vadd.f32 %v3472_v52, %v3446_v49  ;;  %v3677_v52 = vld [vmem:[#allocation2 + $0xa0] sm:$0xff] }
 0x4d8   : > { %3772 = vmatpush.msra.mxu3 %v3664_v21  ;;  %v3702_v21 = vld [vmem:[#allocation2 + $0x168] sm:$0xff] }
 0x4d9   : > { %v3499_v33 = vadd.f32 %v3498_v44, %v3473_v38  ;;  %3804 = vmatpush.msra.mxu1 %v3704_v2  ;;  %v3676_v38 = vld [vmem:[#allocation2 + $0x98] sm:$0xff]  ;;  %v3714_v2 = vld [vmem:[#allocation2 + $0x1c8] sm:$0xff] }
 0x4da   : > { %4678 = vmatmul.msk.f32.gmra.mxu1 %vm3512_vm7, %v3511_v24  ;;  %3773 = vmatpush.msra.mxu3 %v3663_v6  ;;  %v3746_v6 = vld [vmem:[#allocation2 + $0x2c8] sm:$0xff] }
 0x4db   : > { %v3507_v34 = vmax.f32 %v3254_v7, %v3499_v33  ;;  %3805 = vmatpush.msra.mxu1 %v3703_v4  ;;  %v3749_v33 = vld [vmem:[#allocation2 + $0x2e0] sm:$0xff]  ;;  %v3747_v7 = vld [vmem:[#allocation2 + $0x2d0] sm:$0xff] }
 0x4dc   : > { %3774 = vmatpush.msra.mxu3 %v3662_v37  ;;  %v3718_v37 = vld [vmem:[#allocation2 + $0x1e8] sm:$0xff]  ;;  %v3713_v4 = vld [vmem:[#allocation2 + $0x1c0] sm:$0xff] }
 0x4dd   : > { %3806 = vmatpush.msra.mxu1 %v3702_v21 }
 0x4de   : > { %v3475_v16 = vpop.f32.mrf.mxu3  ;;  %3775 = vmatpush.msra.mxu3 %v3661_v15  ;;  %v3701_v15 = vld [vmem:[#allocation2 + $0x160] sm:$0xff] }
 0x4df   : > { %v3476_v0 = vadd.f32 %v3475_v16, %v3449_v39  ;;  %v3501_v57 = vpop.f32.mrf.mxu2  ;;  %v3675_v39 = vld [vmem:[#allocation2 + $0x90] sm:$0xff]  ;;  %3807 = vmatpush.msra.mxu1 %v3701_v15  ;;  %v3917_v15 = vld [vmem:[%s8666_s8 + $0x60] sm:$0xff] }
 0x4e0   : > { %3776 = vmatpush.msra.mxu3 %v3660_v19  ;;  %v3745_v19 = vld [vmem:[#allocation2 + $0x2c0] sm:$0xff] }
 0x4e1   : > { %v3502_v8 = vadd.f32 %v3501_v57, %v3476_v0  ;;  %v3673_v0 = vld [vmem:[#allocation2 + $0x80] sm:$0xff]  ;;  %v3752_v57 = vld [vmem:[#allocation2 + $0x2f8] sm:$0xff] }
 0x4e2   : > { %4683 = vmatmul.msk.f32.vlgmr.msrb.gmra.mxu1 %vm3512_vm7, %v4681_v42  ;;  %3777 = vmatpush.msra.mxu3 %v3659_v23  ;;  %v3717_v23 = vld [vmem:[#allocation2 + $0x1e0] sm:$0xff] }
 0x4e3   : > { %v3509_v58 = vmax.f32 %v3257_v29, %v3502_v8  ;;  %v3750_v29 = vld [vmem:[#allocation2 + $0x2e8] sm:$0xff]  ;;  %v3748_v8 = vld [vmem:[#allocation2 + $0x2d8] sm:$0xff] }
 0x4e4   : > { %3778 = vmatpush.msra.mxu3 %v3658_v60  ;;  %v3700_v60 = vld [vmem:[#allocation2 + $0x158] sm:$0xff] }
 0x4e5   : > { %3555 = vmatpush.msrb.mxu0 %v3509_v58  ;;  %3610 = vmatpush.msra.mxu2 %v3509_v58  ;;  %v3734_v58 = vld [vmem:[#allocation2 + $0x268] sm:$0xff] }
 0x4e6   : > { %3779 = vmatpush.msra.mxu3 %v3657_v54  ;;  %v3744_v54 = vld [vmem:[#allocation2 + $0x2b8] sm:$0xff]  ;;  %3808 = vmatpush.msra.mxu1 %v3700_v60  ;;  %v3914_v60 = vld [vmem:[%s8666_s8 + $0x48] sm:$0xff] }
 0x4e7   : > { %3556 = vmatpush.msrb.mxu0 %v3507_v34  ;;  %3611 = vmatpush.msra.mxu2 %v3507_v34  ;;  %v3733_v34 = vld [vmem:[#allocation2 + $0x260] sm:$0xff] }
 0x4e8   : > { %3844 = vmatpush.msrb.mxu3 %v3736_v36  ;;  %v3712_v36 = vld [vmem:[#allocation2 + $0x1b8] sm:$0xff] }
 0x4e9   : > { %3557 = vmatpush.msrb.mxu0 %v3505_v48  ;;  %3612 = vmatpush.msra.mxu2 %v3505_v48  ;;  %v3732_v48 = vld [vmem:[#allocation2 + $0x258] sm:$0xff] }
 0x4ea   : > { %4685 = vmatmul.msk.f32.vlgmr.msra.gmra.mxu2 %vm3512_vm7, %v4681_v42  ;;  %4679 = vmatmul.msk.f32.vlgmr.msrb.gmra.mxu0 %vm3512_vm7, %v3510_v45 }
 0x4eb   : > { %4684 = vmatmul.msk.f32.gmra.mxu1 %vm3512_vm7, %v4682_v30  ;;  %3784 = vmatpush.msra.mxu0 %v3688_v3  ;;  %v3699_v3 = vld [vmem:[#allocation2 + $0x150] sm:$0xff] }
 0x4ec   : > { %3824 = vmatpush.msrb.mxu2 %v3720_v47  ;;  %3845 = vmatpush.msrb.mxu3 %v3735_v18  ;;  %v3741_v47 = vld [vmem:[#allocation2 + $0x2a0] sm:$0xff] }
 0x4ed   : > { %3785 = vmatpush.msra.mxu0 %v3687_v25  ;;  %v3743_v25 = vld [vmem:[#allocation2 + $0x2b0] sm:$0xff]  ;;  %3809 = vmatpush.msra.mxu1 %v3699_v3 }
 0x4ee   : > { %3825 = vmatpush.msrb.mxu2 %v3719_v10  ;;  %3846 = vmatpush.msrb.mxu3 %v3734_v58  ;;  %v3740_v10 = vld [vmem:[#allocation2 + $0x298] sm:$0xff]  ;;  %v3911_v3 = vld [vmem:[%s8666_s8 + $0x30] sm:$0xff] }
 0x4ef   : > { %3786 = vmatpush.msra.mxu0 %v3686_v61  ;;  %v3722_v61 = vld [vmem:[#allocation2 + $0x208] sm:$0xff] }
 0x4f0   : > { %3847 = vmatpush.msrb.mxu3 %v3733_v34  ;;  %3826 = vmatpush.msrb.mxu2 %v3718_v37  ;;  %v3918_v37 = vld [vmem:[%s8666_s8 + $0x68] sm:$0xff] }
 0x4f1   : > { %3787 = vmatpush.msra.mxu0 %v3685_v59  ;;  %v3721_v59 = vld [vmem:[#allocation2 + $0x200] sm:$0xff] }
 0x4f2   : > { %4686 = vmatmul.msk.f32.gmra.mxu2 %vm3512_vm7, %v4682_v30  ;;  %4680 = vmatmul.msk.f32.gmra.mxu0 %vm3512_vm7, %v3511_v24  ;;  %v3731_v30 = vld [vmem:[#allocation2 + $0x250] sm:$0xff] }
 0x4f3   : > { %3788 = vmatpush.msra.mxu0 %v3684_v22  ;;  %3848 = vmatpush.msrb.mxu3 %v3732_v48  ;;  %v3742_v22 = vld [vmem:[#allocation2 + $0x2a8] sm:$0xff] }
 0x4f4   : > { %3827 = vmatpush.msrb.mxu2 %v3717_v23  ;;  %v3915_v23 = vld [vmem:[%s8666_s8 + $0x50] sm:$0xff] }
 0x4f5   : > { %3789 = vmatpush.msra.mxu0 %v3683_v1  ;;  %3849 = vmatpush.msrb.mxu3 %v3731_v30  ;;  %v3697_v1 = vld [vmem:[#allocation2 + $0x140] sm:$0xff] }
 0x4f7   : > { %3790 = vmatpush.msra.mxu0 %v3682_v32  ;;  %3850 = vmatpush.msrb.mxu3 %v3730_v5  ;;  %v3696_v32 = vld [vmem:[#allocation2 + $0x138] sm:$0xff] }
 0x4f9   : > { %3791 = vmatpush.msra.mxu0 %v3681_v55  ;;  %3851 = vmatpush.msrb.mxu3 %v3729_v40  ;;  %v3695_v55 = vld [vmem:[#allocation2 + $0x130] sm:$0xff] }
 0x4fb   : > { %3792 = vmatpush.msra.mxu0 %v3680_v20  ;;  %3852 = vmatpush.msrb.mxu3 %v3728_v50  ;;  %v3739_v20 = vld [vmem:[#allocation2 + $0x290] sm:$0xff] }
 0x4fd   : > { %3793 = vmatpush.msra.mxu0 %v3679_v53  ;;  %3853 = vmatpush.msrb.mxu3 %v3727_v9  ;;  %v3694_v53 = vld [vmem:[#allocation2 + $0x128] sm:$0xff] }
 0x4ff   : > { %3794 = vmatpush.msra.mxu0 %v3678_v27  ;;  %3854 = vmatpush.msrb.mxu3 %v3726_v13  ;;  %v3710_v27 = vld [vmem:[#allocation2 + $0x1a8] sm:$0xff] }
 0x501   : > { %3795 = vmatpush.msra.mxu0 %v3677_v52  ;;  %3855 = vmatpush.msrb.mxu3 %v3725_v26  ;;  %v3708_v52 = vld [vmem:[#allocation2 + $0x198] sm:$0xff] }
 0x503   : > { %3796 = vmatpush.msra.mxu0 %v3676_v38  ;;  %3856 = vmatpush.msrb.mxu3 %v3724_v41  ;;  %v3690_v38 = vld [vmem:[#allocation2 + $0x108] sm:$0xff] }
 0x505   : > { %3797 = vmatpush.msra.mxu0 %v3675_v39  ;;  %3857 = vmatpush.msrb.mxu3 %v3723_v35  ;;  %v3706_v39 = vld [vmem:[#allocation2 + $0x188] sm:$0xff] }
 0x507   : > { %3798 = vmatpush.msra.mxu0 %v3674_v17  ;;  %3858 = vmatpush.msrb.mxu3 %v3722_v61  ;;  %v3705_v17 = vld [vmem:[#allocation2 + $0x180] sm:$0xff] }
 0x508   : > { %v3909_v61 = vld [vmem:[%s8666_s8 + $0x20] sm:$0xff] }
 0x509   : > { %3799 = vmatpush.msra.mxu0 %v3673_v0  ;;  %3859 = vmatpush.msrb.mxu3 %v3721_v59  ;;  %v3755_v0 = vld [vmem:[#allocation2 + $0x310] sm:$0xff] }
 0x50a   : > { %v3907_v59 = vld [vmem:[%s8666_s8 + $0x10] sm:$0xff] }
 0x50b   : > { %3864 = vmatpush.msrb.mxu0 %v3752_v57  ;;  %v3754_v57 = vld [vmem:[#allocation2 + $0x308] sm:$0xff] }
 0x50d   : > { %3865 = vmatpush.msrb.mxu0 %v3751_v62 }
 0x50f   : > { %3866 = vmatpush.msrb.mxu0 %v3750_v29 }
 0x511   : > { %3867 = vmatpush.msrb.mxu0 %v3749_v33  ;;  %v3753_v33 = vld [vmem:[#allocation2 + $0x300] sm:$0xff] }
 0x513   : > { %3868 = vmatpush.msrb.mxu0 %v3748_v8 }
 0x515   : > { %3869 = vmatpush.msrb.mxu0 %v3747_v7 }
 0x517   : > { %3870 = vmatpush.msrb.mxu0 %v3746_v6  ;;  %v3919_v6 = vld [vmem:[%s8666_s8 + $0x70] sm:$0xff] }
 0x519   : > { %3871 = vmatpush.msrb.mxu0 %v3745_v19  ;;  %v3916_v19 = vld [vmem:[%s8666_s8 + $0x58] sm:$0xff] }
 0x51b   : > { %3872 = vmatpush.msrb.mxu0 %v3744_v54  ;;  %v3913_v54 = vld [vmem:[%s8666_s8 + $0x40] sm:$0xff] }
 0x51d   : > { %3873 = vmatpush.msrb.mxu0 %v3743_v25  ;;  %v3910_v25 = vld [vmem:[%s8666_s8 + $0x28] sm:$0xff] }
 0x51f   : > { %3874 = vmatpush.msrb.mxu0 %v3742_v22  ;;  %v3905_v22 = vld [vmem:[%s8666_s8] sm:$0xff] }
 0x521   : > { %3875 = vmatpush.msrb.mxu0 %v3741_v47 }
 0x523   : > { %3876 = vmatpush.msrb.mxu0 %v3740_v10 }
 0x525   : > { %3877 = vmatpush.msrb.mxu0 %v3739_v20 }
 0x54f   : > { %v3536_v46 = vpop.f32.mrf.mxu1 }
 0x557   : > { %v8557_v31 = vpop.f32.mrf.mxu1 }
 0x55f   : > { %v3591_v43 = vpop.f32.mrf.mxu1 }
 0x560   : > { %v3620_v14 = vmax.f32 %v3536_v46, %v3591_v43  ;;  %v3716_v46 = vld [vmem:[#allocation2 + $0x1d8] sm:$0xff]  ;;  %v3715_v43 = vld [vmem:[#allocation2 + $0x1d0] sm:$0xff] }
 0x561   : > { %3828 = vmatpush.msrb.mxu2 %v3716_v46  ;;  %v3912_v46 = vld [vmem:[%s8666_s8 + $0x38] sm:$0xff] }
 0x562   : > { %3780 = vmatmul.f32.vlgmr.msra.gmra.mxu3 %v3620_v14  ;;  %v3645_v12 = vrot.slane %v3620_v14, 6  ;;  %v3635_v45 = vrot.slane %v3620_v14, 4  ;;  %v3626_v28 = vrot.slane %v3620_v14, 2  ;;  %v3698_v14 = vld [vmem:[#allocation2 + $0x148] sm:$0xff] }
 0x563   : > { %3829 = vmatpush.msrb.mxu2 %v3715_v43  ;;  %3810 = vmatpush.msra.mxu1 %v3698_v14  ;;  %v3908_v43 = vld [vmem:[%s8666_s8 + $0x18] sm:$0xff]  ;;  %v3906_v14 = vld [vmem:[%s8666_s8 + $0x8] sm:$0xff] }
 0x565   : > { %3830 = vmatpush.msrb.mxu2 %v3714_v2  ;;  %3811 = vmatpush.msra.mxu1 %v3697_v1  ;;  %v4779_v2 = vld [vmem:[%s8667_s9 + $0x6] ss:$0 sm:$0xff] }
 0x567   : > { %v3559_v56 = vpop.f32.mrf.mxu0  ;;  %3831 = vmatpush.msrb.mxu2 %v3713_v4  ;;  %3812 = vmatpush.msra.mxu1 %v3696_v32 }
 0x568   : > { %v3594_v34 = vpop.f32.mrf.mxu1 }
 0x569   : > { %3832 = vmatpush.msrb.mxu2 %v3712_v36  ;;  %3813 = vmatpush.msra.mxu1 %v3695_v55  ;;  %v3622_v48 = vmax.f32 %v8557_v31, %v3594_v34  ;;  %v3920_v31 = vld [vmem:[%s8666_s8 + $0x78] sm:$0xff] }
 0x56b   : > { %3814 = vmatpush.msra.mxu1 %v3694_v53 }
 0x56d   : > { %v3614_v63 = vpop.f32.mrf.mxu2 }
 0x56e   : > { %v8559_v51 = vmax.f32 %v3559_v56, %v3614_v63  ;;  %v3711_v56 = vld [vmem:[#allocation2 + $0x1b0] sm:$0xff]  ;;  %v3738_v63 = vld [vmem:[#allocation2 + $0x288] sm:$0xff] }
 0x56f   : > { %3833 = vmatpush.msrb.mxu2 %v3711_v56  ;;  %3878 = vmatpush.msrb.mxu0 %v3738_v63  ;;  %v3562_v35 = vpop.f32.mrf.mxu0 }
 0x570   : > { %v3646_v11 = vrot.slane %v8559_v51, 6  ;;  %v3636_v49 = vrot.slane %v8559_v51, 4  ;;  %v3627_v16 = vrot.slane %v8559_v51, 2 }
 0x571   : > { %3834 = vmatpush.msrb.mxu2 %v3710_v27 }
 0x572   : > { %v4769_v44 = vpack.i.bf16 %v3646_v11, %v3645_v12  ;;  %v4764_v24 = vpack.i.bf16 %v3636_v49, %v3635_v45  ;;  %v4774_v42 = vpack.i.bf16 %v3627_v16, %v3626_v28  ;;  %v3693_v12 = vld [vmem:[#allocation2 + $0x120] sm:$0xff]  ;;  %v3692_v49 = vld [vmem:[#allocation2 + $0x118] sm:$0xff] }
 0x573   : > { %v3737_v11 = vld [vmem:[#allocation2 + $0x280] sm:$0xff]  ;;  %3815 = vmatpush.msra.mxu1 %v3693_v12  ;;  %v3756_v28 = vld [vmem:[#allocation2 + $0x318] sm:$0xff] }
 0x574   : > { %4770 = vrot.lane.b32.xlu2 %v4769_v44, %s4882_s12  ;;  %4765 = vrot.lane.b32.xlu1 %v4764_v24, %s4883_s7  ;;  %v3709_v45 = vld [vmem:[#allocation2 + $0x1a0] sm:$0xff]  ;;  %v3691_v44 = vld [vmem:[#allocation2 + $0x110] sm:$0xff]  ;;  %s367_s7 = sand.u32 1, %s4869_s14   ;;  %s4689_s12 = sshll.u32 %s4961_s17, 1 }
 0x575   : > { %3879 = vmatpush.msrb.mxu0 %v3737_v11  ;;  %3835 = vmatpush.msrb.mxu2 %v3709_v45  ;;  %v3707_v24 = vld [vmem:[#allocation2 + $0x190] sm:$0xff]  ;;  %v3689_v16 = vld [vmem:[#allocation2 + $0x100] sm:$0xff]  ;;  %s3958_s25 = scalar_lea.hbm %s8668_s10, %s4689_s12  ;;  %s3948_s18 = scalar_lea.sflag [#allocation4], %s367_s7 }
 0x576   : > { %3816 = vmatpush.msra.mxu1 %v3692_v49  ;;  %v4780_v49 = vld [vmem:[%s8667_s9 + $0x7] ss:$0 sm:$0xff]  ;;  %s3962_s11 = sshll.u32 %s3958_s25, 4  ;;  %s3963_s11 = int_to_ptr.hbm [resolvable:$true] %s3962_s11 }
 0x577   : > { %3836 = vmatpush.msrb.mxu2 %v3708_v52  ;;  %s4825_s17 = sshra.s32 %s3963_s11, 4  ;;  %s4826_s17 = int_to_ptr.hbm [resolvable:$true] %s4825_s17 }
 0x578   : > { %3817 = vmatpush.msra.mxu1 %v3691_v44  ;;  %s4827_s0 = scalar_lea.hbm %s4826_s17, 2  ;;  %p4832_p3 = scmp.lt.s32.totalorder %s4826_s17, %s8668_s10 }
 0x579   : > { %3837 = vmatpush.msrb.mxu2 %v3707_v24  ;;  %p4828_p0 = scmp.ne.s32.totalorder %s4826_s17, %s4827_s0 }
 0x57a   : > { %3818 = vmatpush.msra.mxu1 %v3690_v38 }
 0x57b   : > { %3838 = vmatpush.msrb.mxu2 %v3706_v39  ;;  %p4829_p1 = pnand %p4828_p0, %p4978_p5 }
 0x57c   : > { %4775 = vrot.lane.b32.xlu2 %v4774_v42, %s4884_s28  ;;  %3819 = vmatpush.msra.mxu1 %v3689_v16  ;;  %s4040_s28 = sshll.u32 %s367_s7, 1 }
 0x57d   : > { %3839 = vmatpush.msrb.mxu2 %v3705_v17  ;;  %s369_s29 = scalar_lea.vmem [#allocation5], %s4040_s28  ;;  %p4830_p2 = pneg %p4829_p1 }
 0x57e   : > { %3896 = vmatpush.msrb.mxu1 %v3756_v28  ;;  %s3960_s30 = sshll.u32 %s369_s29, 4  ;;  %s4831_s28 = scalar_lea.hbm %s8668_s10, 4  ;;  %s3961_s30 = int_to_ptr.vmem [resolvable:$true] %s3960_s30 }
 0x57f   : > { %3925 = vmatpush.msra.mxu2 %v3920_v31  ;;  %p4833_p4 = scmp.lt.s32.totalorder %s4831_s28, %s4827_s0 }
 0x580   : > { %3897 = vmatpush.msrb.mxu1 %v3755_v0 }
 0x581   : > { %3926 = vmatpush.msra.mxu2 %v3919_v6  ;;  %p4834_p7 = por %p4833_p4, %p4832_p3 }
 0x582   : > { %3898 = vmatpush.msrb.mxu1 %v3754_v57 }
 0x583   : > { %3927 = vmatpush.msra.mxu2 %v3918_v37  ;;  %p4835_p8 = pnand %p4834_p7, %p4830_p2 }
 0x584   : > { %3899 = vmatpush.msrb.mxu1 %v3753_v33 }
 0x585   : > { %3928 = vmatpush.msra.mxu2 %v3917_v15 }
 0x587   : > { %3929 = vmatpush.msra.mxu2 %v3916_v19 }
 0x589   : > { %3930 = vmatpush.msra.mxu2 %v3915_v23 }
 0x58b   : > { %3931 = vmatpush.msra.mxu2 %v3914_v60 }
 0x58d   : > { %3932 = vmatpush.msra.mxu2 %v3913_v54 }
 0x58f   : > { %3933 = vmatpush.msra.mxu2 %v3912_v46 }
 0x591   : > { %3934 = vmatpush.msra.mxu2 %v3911_v3 }
 0x593   : > { %3935 = vmatpush.msra.mxu2 %v3910_v25 }
 0x595   : > { %3936 = vmatpush.msra.mxu2 %v3909_v61 }
 0x597   : > { %3937 = vmatpush.msra.mxu2 %v3908_v43 }
 0x599   : > { %3938 = vmatpush.msra.mxu2 %v3907_v59 }
 0x59b   : > { %3939 = vmatpush.msra.mxu2 %v3906_v14 }
 0x59d   : > { %3940 = vmatpush.msra.mxu2 %v3905_v22 }
 0x5ce   : > { %v4771_v42 = vpop.permute.xlu2 %4770 }
 0x5cf   : > { %v4773_v62 = vunpack.i.h.bf16 %v4771_v42  ;;  %v4772_v29 = vunpack.i.l.bf16 %v4771_v42 }
 0x5d1   : > { %v3651_v8 = vsel %vm2982_vm6, %v4772_v29, %v4773_v62 }
 0x5d2   : > { %3860 = vmatmul.f32.vlgmr.msrb.gmra.mxu3 %v3651_v8 }
 0x5d6   : > { %v4776_v7 = vpop.permute.xlu2 %4775 }
 0x5d7   : > { %v4777_v18 = vunpack.i.l.bf16 %v4776_v7  ;;  %v4778_v30 = vunpack.i.h.bf16 %v4776_v7 }
 0x5d9   : > { %v3654_v58 = vsel %vm1284_vm3, %v8559_v51, %v4777_v18  ;;  %v3632_v9 = vsel %vm1284_vm3, %v4777_v18, %v4778_v30  ;;  %v3617_v51 = vpop.f32.mrf.mxu2 }
 0x5da   : > { %3800 = vmatmul.f32.vlgmr.msra.gmra.mxu0 %v3654_v58  ;;  %v3623_v21 = vmax.f32 %v3562_v35, %v3617_v51 }
 0x5e2   : > { %3880 = vmatmul.f32.vlgmr.msrb.gmra.mxu0 %v3622_v48 }
 0x5e5   : > { %v3781_v1 = vpop.f32.mrf.mxu3 }
 0x5e6   : > { %v4766_v5 = vpop.permute.xlu1 %4765  ;;  %v3782_v4 = vadd.f32 %v4779_v2, %v3781_v1 }
 0x5e7   : > { %v4768_v40 = vunpack.i.h.bf16 %v4766_v5  ;;  %v4767_v50 = vunpack.i.l.bf16 %v4766_v5 }
 0x5e9   : > { %v3642_v13 = vsel %vm3641_vm8, %v4767_v50, %v4768_v40  ;;  %v3655_v26 = vsel %vm3641_vm8, %v3632_v9, %v4767_v50 }
 0x5ea   : > { %3820 = vmatmul.f32.vlgmr.msra.gmra.mxu1 %v3655_v26  ;;  %v3656_v41 = vsel %vm2982_vm6, %v3642_v13, %v4772_v29 }
 0x5eb   : > { %3840 = vmatmul.f32.vlgmr.msrb.gmra.mxu2 %v3656_v41 }
 0x5f2   : > { %4687 = vmatmul.msk.f32.vlgmr.msrb.gmra.mxu1 %vm1284_vm3, %v3623_v21 }
 0x655   : > { %v3861_v56 = vpop.f32.mrf.mxu3 }
 0x657   : > { %v3801_v47 = vpop.f32.mrf.mxu0 }
 0x658   : > { %v3802_v10 = vadd.f32 %v3801_v47, %v3782_v4 }
 0x65f   : > { %v3881_v63 = vpop.f32.mrf.mxu0 }
 0x667   : > { %v3821_v32 = vpop.f32.mrf.mxu1 }
 0x668   : > { %v3822_v36 = vadd.f32 %v3821_v32, %v3802_v10 }
 0x66e   : > { %v3841_v55 = vpop.f32.mrf.mxu2 }
 0x66f   : > { %v3842_v20 = vadd.f32 %v3841_v55, %v3822_v36  ;;  %v3901_v27 = vpop.f32.mrf.mxu1 }
 0x671   : > { %v3862_v53 = vadd.f32 %v3861_v56, %v3842_v20 }
 0x673   : > { %v3882_v12 = vadd.f32 %v3881_v63, %v3862_v53 }
 0x675   : > { %v3902_v11 = vadd.f32 %v3901_v27, %v3882_v12 }
 0x677   : > { %v3904_v45 = vmax.f32 %v3902_v11, 0.0 }
 0x679   : > { %3941 = vmatmul.f32.vlgmr.msra.gmra.mxu2 %v3904_v45 }
 0x6fc   : > { %v3942_v52 = vpop.f32.mrf.mxu2 }
 0x6fd   : > { %v3943_v44 = vadd.f32 %v4780_v49, %v3942_v52 }
 0x6ff   : > { %3946 = vst.msk [vmem:[%s369_s29] sm:$0x3] %vm3945_vm9, %v3943_v44 }
 0x700   : > { %4838 = shalt.err (!%p4835_p8)
}
 0x701   : > { %4713 = dma.vmem_to_hbm [thread:$0]  (%p4978_p5), %s3961_s30, 32, %s3963_s11, %s3948_s18  }
 0x702 PF: > { %p4725_p9 = scmp.ge.s32.totalorder %s4877_s16, 2  ;;  %s3974_s7 = sand.u32 1, %s4865_s13  }
 0x703   : > { %s3975_s26 = scalar_lea.sflag [#allocation4], %s3974_s7 }
 0x704   : > { %p4720_p10 = pnand %p4725_p9, %p4982_p6 }
 0x706   : > { %p4721_p11 = pneg %p4720_p10 }
 0x708   : > { %4860 = dma.done.wait (%p4721_p11), %s3975_s26, 32  }
 0x709   : > { %4862 = vsyncadd (%p4721_p11), %s3975_s26, 4294967264  ;;  %p21_p12 = scmp.ge.s32.totalorder %s4965_s19, 4   ;;  %s8733_s13 = smov %s4869_s14 }
 0x70a   : > { %s8734_s14 = smov %s4873_s15  ;;  %s8735_s15 = smov %s4976_s22 }
 0x70b   : > { %s8736_s16 = smov %s4965_s19  ;;  %23 = sbr.rel (!%p21_p12) target bundleno = 7 (0x7), region = 108 }
 0x710   :  { %3981 = vsyncpa [#allocation3], 1 }
 0x711   :  { %3983 = vsyncpa [#allocation3 + $0x1], 1 }
 0x712   :  { %3984 = vsyncpa [#allocation4], 1 }
 0x713   :  { %3986 = vsyncpa [#allocation4 + $0x1], 1 }

</bundles_post_ra>
